<compile_context>
chip_gen: v5e
topology: v5e:2x2
jax: 0.10.0
libtpu: 0.0.40
codegen_flags: <defaults>
</compile_context>

<pallas_src>
import jax
import jax.numpy as jnp
from jax.experimental import pallas as pl
from jax.experimental.pallas import tpu as pltpu

N_INPUTS = 28 * 28   # 784
N_LAYER_1 = 800
N_LAYER_2 = 800
N_CLASSES = 10
N_OUT_PAD = 128      # lane-dense padded logits width (sliced back to 10 in the wrapper)


def _student_kernel(x_ref, w1_ref, b1_ref, w2_ref, b2_ref, w3_ref, b3_ref, o_ref):
    # Fused 3-layer MLP on one batch tile: relu(x@W1+b1) -> relu(.@W2+b2) -> .@W3+b3
    x = x_ref[...]                                                      # (TB, 784) bf16
    h1 = jnp.dot(x, w1_ref[...], preferred_element_type=jnp.float32)   # (TB, 800) f32 acc
    h1 = jnp.maximum(h1 + b1_ref[...], 0.0).astype(jnp.bfloat16)       # bias + ReLU in f32
    # dropout(0.5) -> identity (eval mode)
    h2 = jnp.dot(h1, w2_ref[...], preferred_element_type=jnp.float32)  # (TB, 800)
    h2 = jnp.maximum(h2 + b2_ref[...], 0.0).astype(jnp.bfloat16)
    # dropout(0.5) -> identity (eval mode)
    out = jnp.dot(h2, w3_ref[...], preferred_element_type=jnp.float32)  # (TB, 128)
    o_ref[...] = (out + b3_ref[...]).astype(o_ref.dtype)


def student_forward(x, params, *, batch_tile=512):
    """x: (B, C, H, W) or (B, 784); params: dict of f32 weights/biases (see init_params)."""
    x2d = x.reshape(-1, N_INPUTS)                       # mirrors x.view(-1, 784)
    B = x2d.shape[0]

    # Batch tile: multiple of 8 sublanes, capped at `batch_tile`; pad B up to a tile multiple.
    tb = min(batch_tile, ((B + 7) // 8) * 8)
    b_pad = ((B + tb - 1) // tb) * tb
    if b_pad != B:
        x2d = jnp.pad(x2d, ((0, b_pad - B), (0, 0)))
    x2d = x2d.astype(jnp.bfloat16)

    # bf16 weights (f32 accumulation in-kernel); keep the tiny biases in f32.
    w1 = params["w1"].astype(jnp.bfloat16)
    w2 = params["w2"].astype(jnp.bfloat16)
    w3 = params["w3"].astype(jnp.bfloat16)
    b1 = params["b1"].astype(jnp.float32)
    b2 = params["b2"].astype(jnp.float32)
    b3 = params["b3"].astype(jnp.float32)

    # Lane-dense output: zero-pad last layer to 128 output columns.
    w3p = jnp.pad(w3, ((0, 0), (0, N_OUT_PAD - N_CLASSES)))
    b3p = jnp.pad(b3, ((0, 0), (0, N_OUT_PAD - N_CLASSES)))

    grid = (b_pad // tb,)
    resident = lambda shape: pl.BlockSpec(shape, lambda i: (0, 0))  # stays in VMEM across steps

    flops = 2 * b_pad * (N_INPUTS * N_LAYER_1 + N_LAYER_1 * N_LAYER_2 + N_LAYER_2 * N_OUT_PAD)
    bytes_accessed = (
        x2d.size * 2
        + (w1.size + w2.size + w3p.size) * 2
        + (b1.size + b2.size + b3p.size) * 4
        + b_pad * N_OUT_PAD * 4
    )

    out = pl.pallas_call(
        _student_kernel,
        out_shape=jax.ShapeDtypeStruct((b_pad, N_OUT_PAD), jnp.float32),
        grid=grid,
        in_specs=[
            pl.BlockSpec((tb, N_INPUTS), lambda i: (i, 0)),   # activation tile, pipelined
            resident((N_INPUTS, N_LAYER_1)),
            resident((1, N_LAYER_1)),
            resident((N_LAYER_1, N_LAYER_2)),
            resident((1, N_LAYER_2)),
            resident((N_LAYER_2, N_OUT_PAD)),
            resident((1, N_OUT_PAD)),
        ],
        out_specs=pl.BlockSpec((tb, N_OUT_PAD), lambda i: (i, 0)),
        compiler_params=pltpu.CompilerParams(
            dimension_semantics=("parallel",),    # shard batch across TCs on v7x
            vmem_limit_bytes=32 << 20,            # real footprint ~ a few MiB
        ),
        cost_estimate=pl.CostEstimate(
            flops=flops, transcendentals=0, bytes_accessed=bytes_accessed),
    )(x2d, w1, b1, w2, b2, w3p, b3p)

    return out[:B, :N_CLASSES]


def init_params(key):
    """Deterministic init mimicking torch.nn.Linear: U(-1/sqrt(fan_in), +1/sqrt(fan_in)).

    Weights are stored as (in_features, out_features) — transposed vs torch — so the
    kernel computes x @ W directly.
    """
    def linear(k, fan_in, fan_out):
        kw, kb = jax.random.split(k)
        bound = 1.0 / jnp.sqrt(fan_in)
        w = jax.random.uniform(kw, (fan_in, fan_out), jnp.float32, -bound, bound)
        b = jax.random.uniform(kb, (1, fan_out), jnp.float32, -bound, bound)
        return w, b

    k1, k2, k3 = jax.random.split(key, 3)
    w1, b1 = linear(k1, N_INPUTS, N_LAYER_1)
    w2, b2 = linear(k2, N_LAYER_1, N_LAYER_2)
    w3, b3 = linear(k3, N_LAYER_2, N_CLASSES)
    return {"w1": w1, "b1": b1, "w2": w2, "b2": b2, "w3": w3, "b3": b3}


def _reference(x, params):
    """Same math as the kernel (bf16 weights/activations, f32 accumulation)."""
    x2d = x.reshape(-1, N_INPUTS).astype(jnp.bfloat16)
    w1 = params["w1"].astype(jnp.bfloat16)
    w2 = params["w2"].astype(jnp.bfloat16)
    w3 = params["w3"].astype(jnp.bfloat16)
    h1 = jnp.maximum(
        jnp.dot(x2d, w1, preferred_element_type=jnp.float32) + params["b1"], 0.0
    ).astype(jnp.bfloat16)
    h2 = jnp.maximum(
        jnp.dot(h1, w2, preferred_element_type=jnp.float32) + params["b2"], 0.0
    ).astype(jnp.bfloat16)
    return jnp.dot(h2, w3, preferred_element_type=jnp.float32) + params["b3"]


if __name__ == "__main__":
    key = jax.random.PRNGKey(0)
    k_param, k_x = jax.random.split(key)
    params = init_params(k_param)

    # Small batch of MNIST-shaped inputs (B, C, H, W) = (2, 1, 28, 28).
    x = jax.random.normal(k_x, (2, 1, 28, 28), jnp.float32)

    out = student_forward(x, params)
    out = jax.block_until_ready(out)

    ref = _reference(x, params)
    assert out.shape == (2, N_CLASSES), out.shape
    assert jnp.allclose(out, ref, atol=1e-2, rtol=1e-2), "mismatch vs reference"

    print("KERNEL_OK")
</pallas_src>

<mosaic_0001>
module attributes {stable_mosaic.version = 11 : i64} {
  func.func @_student_kernel(%arg0: i32, %arg1: memref<8x784xbf16, #tpu.memory_space<vmem>>, %arg2: memref<784x800xbf16, #tpu.memory_space<vmem>>, %arg3: memref<1x800xf32, #tpu.memory_space<vmem>>, %arg4: memref<800x800xbf16, #tpu.memory_space<vmem>>, %arg5: memref<1x800xf32, #tpu.memory_space<vmem>>, %arg6: memref<800x128xbf16, #tpu.memory_space<vmem>>, %arg7: memref<1x128xf32, #tpu.memory_space<vmem>>, %arg8: memref<8x128xf32, #tpu.memory_space<vmem>>) attributes {dimension_semantics = [#tpu.dimension_semantics<parallel>], iteration_bounds = array<i64: 1>, scalar_prefetch = 0 : i64, scratch_operands = 0 : i64, tpu.core_type = #tpu.core_type<tc>, window_params = [{transform_indices = @transform_0, window_bounds = array<i64: 8, 784>}, {pipeline_mode = #tpu.pipeline_mode<synchronous>, transform_indices = @transform_1, window_bounds = array<i64: 784, 800>}, {pipeline_mode = #tpu.pipeline_mode<synchronous>, transform_indices = @transform_2, window_bounds = array<i64: 1, 800>}, {pipeline_mode = #tpu.pipeline_mode<synchronous>, transform_indices = @transform_3, window_bounds = array<i64: 800, 800>}, {pipeline_mode = #tpu.pipeline_mode<synchronous>, transform_indices = @transform_4, window_bounds = array<i64: 1, 800>}, {pipeline_mode = #tpu.pipeline_mode<synchronous>, transform_indices = @transform_5, window_bounds = array<i64: 800, 128>}, {pipeline_mode = #tpu.pipeline_mode<synchronous>, transform_indices = @transform_6, window_bounds = array<i64: 1, 128>}, {transform_indices = @transform_7, window_bounds = array<i64: 8, 128>}]} {
    %c0 = arith.constant 0 : index
    %c0_0 = arith.constant 0 : index
    %0 = vector.load %arg1[%c0, %c0_0] : memref<8x784xbf16, #tpu.memory_space<vmem>>, vector<8x784xbf16>
    %c0_1 = arith.constant 0 : index
    %c0_2 = arith.constant 0 : index
    %1 = vector.load %arg2[%c0_1, %c0_2] : memref<784x800xbf16, #tpu.memory_space<vmem>>, vector<784x800xbf16>
    %cst = arith.constant dense<0.000000e+00> : vector<8x800xf32>
    %2 = tpu.matmul %0, %1, %cst {dimension_numbers = #tpu.dot_dimension_numbers<[1], [0], [0], [1], [0, 0, 1, 1], [], []>} : vector<8x784xbf16>, vector<784x800xbf16>, vector<8x800xf32> -> vector<8x800xf32>
    %c0_3 = arith.constant 0 : index
    %c0_4 = arith.constant 0 : index
    %3 = vector.load %arg3[%c0_3, %c0_4] : memref<1x800xf32, #tpu.memory_space<vmem>>, vector<1x800xf32>
    %4 = vector.broadcast %3 : vector<1x800xf32> to vector<8x800xf32>
    %5 = arith.addf %2, %4 : vector<8x800xf32>
    %cst_5 = arith.constant 0.000000e+00 : f32
    %6 = vector.broadcast %cst_5 : f32 to vector<8x800xf32>
    %7 = arith.maximumf %5, %6 : vector<8x800xf32>
    %8 = arith.truncf %7 : vector<8x800xf32> to vector<8x800xbf16>
    %c0_6 = arith.constant 0 : index
    %c0_7 = arith.constant 0 : index
    %9 = vector.load %arg4[%c0_6, %c0_7] : memref<800x800xbf16, #tpu.memory_space<vmem>>, vector<800x800xbf16>
    %cst_8 = arith.constant dense<0.000000e+00> : vector<8x800xf32>
    %10 = tpu.matmul %8, %9, %cst_8 {dimension_numbers = #tpu.dot_dimension_numbers<[1], [0], [0], [1], [0, 0, 1, 1], [], []>} : vector<8x800xbf16>, vector<800x800xbf16>, vector<8x800xf32> -> vector<8x800xf32>
    %c0_9 = arith.constant 0 : index
    %c0_10 = arith.constant 0 : index
    %11 = vector.load %arg5[%c0_9, %c0_10] : memref<1x800xf32, #tpu.memory_space<vmem>>, vector<1x800xf32>
    %12 = vector.broadcast %11 : vector<1x800xf32> to vector<8x800xf32>
    %13 = arith.addf %10, %12 : vector<8x800xf32>
    %cst_11 = arith.constant 0.000000e+00 : f32
    %14 = vector.broadcast %cst_11 : f32 to vector<8x800xf32>
    %15 = arith.maximumf %13, %14 : vector<8x800xf32>
    %16 = arith.truncf %15 : vector<8x800xf32> to vector<8x800xbf16>
    %c0_12 = arith.constant 0 : index
    %c0_13 = arith.constant 0 : index
    %17 = vector.load %arg6[%c0_12, %c0_13] : memref<800x128xbf16, #tpu.memory_space<vmem>>, vector<800x128xbf16>
    %cst_14 = arith.constant dense<0.000000e+00> : vector<8x128xf32>
    %18 = tpu.matmul %16, %17, %cst_14 {dimension_numbers = #tpu.dot_dimension_numbers<[1], [0], [0], [1], [0, 0, 1, 1], [], []>} : vector<8x800xbf16>, vector<800x128xbf16>, vector<8x128xf32> -> vector<8x128xf32>
    %c0_15 = arith.constant 0 : index
    %c0_16 = arith.constant 0 : index
    %19 = vector.load %arg7[%c0_15, %c0_16] : memref<1x128xf32, #tpu.memory_space<vmem>>, vector<1x128xf32>
    %20 = vector.broadcast %19 : vector<1x128xf32> to vector<8x128xf32>
    %21 = arith.addf %18, %20 : vector<8x128xf32>
    %c0_17 = arith.constant 0 : index
    %c0_18 = arith.constant 0 : index
    %22 = vector.load %arg8[%c0_17, %c0_18] : memref<8x128xf32, #tpu.memory_space<vmem>>, vector<8x128xf32>
    tpu.vector_store %arg8[%c0_17, %c0_18], %21 {strides = array<i32>} : memref<8x128xf32, #tpu.memory_space<vmem>>, vector<8x128xf32>,
    return
  }
  func.func @transform_0(%arg0: i32) -> (i32, i32) {
    %c0_i32 = arith.constant 0 : i32
    %c0_i32_0 = arith.constant 0 : i32
    return %arg0, %c0_i32 : i32, i32
  }
  func.func @transform_1(%arg0: i32) -> (i32, i32) {
    %c0_i32 = arith.constant 0 : i32
    %c0_i32_0 = arith.constant 0 : i32
    %c0_i32_1 = arith.constant 0 : i32
    return %c0_i32, %c0_i32_0 : i32, i32
  }
  func.func @transform_2(%arg0: i32) -> (i32, i32) {
    %c0_i32 = arith.constant 0 : i32
    %c0_i32_0 = arith.constant 0 : i32
    %c0_i32_1 = arith.constant 0 : i32
    return %c0_i32, %c0_i32_0 : i32, i32
  }
  func.func @transform_3(%arg0: i32) -> (i32, i32) {
    %c0_i32 = arith.constant 0 : i32
    %c0_i32_0 = arith.constant 0 : i32
    %c0_i32_1 = arith.constant 0 : i32
    return %c0_i32, %c0_i32_0 : i32, i32
  }
  func.func @transform_4(%arg0: i32) -> (i32, i32) {
    %c0_i32 = arith.constant 0 : i32
    %c0_i32_0 = arith.constant 0 : i32
    %c0_i32_1 = arith.constant 0 : i32
    return %c0_i32, %c0_i32_0 : i32, i32
  }
  func.func @transform_5(%arg0: i32) -> (i32, i32) {
    %c0_i32 = arith.constant 0 : i32
    %c0_i32_0 = arith.constant 0 : i32
    %c0_i32_1 = arith.constant 0 : i32
    return %c0_i32, %c0_i32_0 : i32, i32
  }
  func.func @transform_6(%arg0: i32) -> (i32, i32) {
    %c0_i32 = arith.constant 0 : i32
    %c0_i32_0 = arith.constant 0 : i32
    %c0_i32_1 = arith.constant 0 : i32
    return %c0_i32, %c0_i32_0 : i32, i32
  }
  func.func @transform_7(%arg0: i32) -> (i32, i32) {
    %c0_i32 = arith.constant 0 : i32
    %c0_i32_0 = arith.constant 0 : i32
    return %arg0, %c0_i32 : i32, i32
  }
}

</mosaic_0001>

<bundles_post_ra>
// kernel: tpu_custom_call.1
= control target key start
LH: loop header
LB: loop body
LE: loop exit
PB: predicated region body
PF: predicated region fallthrough
CT: control target
= control target key end

     0   :  { %12 = vsyncpa [#allocation3], 0  ;;  %s10716_s0 = inlined_call_operand.hbm [shape: bf16[8,784], index: 0, kind: input, shape index: {}]   ;;  %s10717_s1 = inlined_call_operand.hbm [shape: bf16[784,800], index: 1, kind: input, shape index: {}]   ;;  %s10718_s2 = inlined_call_operand.hbm [shape: f32[1,800], index: 2, kind: input, shape index: {}]   ;;  %s10719_s3 = inlined_call_operand.hbm [shape: bf16[800,800], index: 3, kind: input, shape index: {}]   ;;  %s10720_s4 = inlined_call_operand.hbm [shape: f32[1,800], index: 4, kind: input, shape index: {}]   ;;  %s10721_s5 = inlined_call_operand.hbm [shape: bf16[800,128], index: 5, kind: input, shape index: {}]   ;;  %s10722_s6 = inlined_call_operand.hbm [shape: f32[1,128], index: 6, kind: input, shape index: {}]   ;;  %s10723_s7 = inlined_call_operand.hbm [shape: f32[8,128], index: 7, kind: output, shape index: {}]  }
   0x1   :  { %13 = vsyncpa [#allocation6], 0 }
   0x2   :  { %14 = vsyncpa [#allocation9], 0 }
   0x3   :  { %15 = vsyncpa [#allocation12], 0  ;;  %s32_s26 = sshll.u32 %s10717_s1, 4  ;;  %s33_s26 = int_to_ptr.hbm [resolvable:$true] %s32_s26 }
   0x4   :  { %16 = vsyncpa [#allocation4], 0  ;;  %s10321_s27 = smov [#allocation5]   ;;  %s56_s8 = sshll.u32 %s10719_s3, 4  ;;  %s57_s8 = int_to_ptr.hbm [resolvable:$true] %s56_s8 }
   0x5   :  { %s34_s28 = sshll.u32 %s10321_s27, 4  ;;  %s10322_s9 = smov 448   ;;  %s35_s28 = int_to_ptr.vmem [resolvable:$true] %s34_s28 }
   0x6   :  { %s10323_s10 = smov 28   ;;  %s10324_s11 = smov [#allocation8]  }
   0x7   :  { %40 = dma.hbm_to_vmem [thread:$0]  %s33_s26, 43904, %s35_s28, [#allocation6], %s10322_s9, %s10322_s9, %s10323_s10  }
   0x8   :  { %s58_s12 = sshll.u32 %s10324_s11, 4  ;;  %s80_s15 = sshll.u32 %s10721_s5, 4  ;;  %s59_s12 = int_to_ptr.vmem [resolvable:$true] %s58_s12  ;;  %s81_s15 = int_to_ptr.hbm [resolvable:$true] %s80_s15 }
   0x9   :  { %64 = dma.hbm_to_vmem [thread:$0]  %s57_s8, 44800, %s59_s12, [#allocation9], %s10322_s9, %s10322_s9, %s10323_s10  }
   0xa   :  { %s10325_s1 = smov [#allocation11]   ;;  %s22_s3 = sshll.u32 %s10716_s0, 4  ;;  %s23_s3 = int_to_ptr.hbm [resolvable:$true] %s22_s3 }
   0xb   :  { %s82_s16 = sshll.u32 %s10325_s1, 4  ;;  %s10326_s19 = smov 64   ;;  %s83_s16 = int_to_ptr.vmem [resolvable:$true] %s82_s16 }
   0xc   :  { %s10327_s20 = smov 4   ;;  %s10328_s21 = smov [#allocation2]  }
   0xd   :  { %88 = dma.hbm_to_vmem [thread:$0]  %s81_s15, 6400, %s83_s16, [#allocation12], %s10326_s19, %s10326_s19, %s10327_s20  }
   0xe   :  { %s24_s22 = sshll.u32 %s10328_s21, 4  ;;  %s46_s5 = sshll.u32 %s10718_s2, 4  ;;  %s25_s22 = int_to_ptr.vmem [resolvable:$true] %s24_s22  ;;  %s47_s5 = int_to_ptr.hbm [resolvable:$true] %s46_s5 }
   0xf   :  { %27 = dma.hbm_to_vmem [thread:$0]  %s23_s3, 448, %s25_s22, [#allocation3]  }
  0x10   :  { %s70_s27 = sshll.u32 %s10720_s4, 4  ;;  %s10329_s28 = smov [#allocation7]   ;;  %s71_s27 = int_to_ptr.hbm [resolvable:$true] %s70_s27 }
  0x11   :  { %s48_s29 = sshll.u32 %s10329_s28, 4  ;;  %s10330_s0 = smov [#allocation10]   ;;  %s49_s29 = int_to_ptr.vmem [resolvable:$true] %s48_s29 }
  0x12   :  { %51 = dma.hbm_to_vmem [thread:$0]  %s47_s5, 112, %s49_s29, [#allocation6]  }
  0x13   :  { %s72_s30 = sshll.u32 %s10330_s0, 4  ;;  %s94_s10 = sshll.u32 %s10722_s6, 4  ;;  %s73_s30 = int_to_ptr.vmem [resolvable:$true] %s72_s30  ;;  %s95_s10 = int_to_ptr.hbm [resolvable:$true] %s94_s10 }
  0x14   :  { %75 = dma.hbm_to_vmem [thread:$0]  %s71_s27, 112, %s73_s30, [#allocation9]  }
  0x15   :  { %s10331_s2 = smov [#allocation13]  }
  0x16   :  { %s96_s11 = sshll.u32 %s10331_s2, 4  ;;  %s97_s11 = int_to_ptr.vmem [resolvable:$true] %s96_s11 }
  0x17   :  { %99 = dma.hbm_to_vmem [thread:$0]  %s95_s10, 16, %s97_s11, [#allocation12]  }
  0x18   :  { %10311 = dma.done.wait [#allocation3], 448  }
  0x19   :  { %10312 = vsyncadd [#allocation3], 4294966848 }
  0x1a   :  { %10313 = dma.done.wait [#allocation6], 44016  }
  0x1b   :  { %10314 = vsyncadd [#allocation6], 4294923280 }
  0x1c   :  { %10315 = dma.done.wait [#allocation9], 44912  }
  0x1d   :  { %10316 = vsyncadd [#allocation9], 4294922384 }
  0x1e   :  { %10317 = dma.done.wait [#allocation12], 6416  }
  0x1f   :  { %10318 = vsyncadd [#allocation12], 4294960880  ;;  %v6572_v0 = vld [vmem:[#allocation5 + $0x188] sm:$0xf]  ;;  %v9413_v1 = vld [vmem:[#allocation5 + $0x1a0] sm:$0xf0] }
  0x20   :  { %v6796_v2 = vld [vmem:[#allocation5 + $0x348] sm:$0xf]  ;;  %v6573_v3 = vor.u32 %v9413_v1, %v6572_v0  ;;  %v9469_v4 = vld [vmem:[#allocation5 + $0x360] sm:$0xf0]  ;;  %v6544_v11 = vld [vmem:[#allocation5 + $0x150] sm:$0xf] }
  0x21   :  { %v7020_v5 = vld [vmem:[#allocation5 + $0x508] sm:$0xf]  ;;  %v9525_v6 = vld [vmem:[#allocation5 + $0x520] sm:$0xf0]  ;;  %v6797_v7 = vor.u32 %v9469_v4, %v6796_v2  ;;  %v9406_v13 = vld [vmem:[#allocation5 + $0x168] sm:$0xf0] }
  0x22   :  { %v7021_v8 = vor.u32 %v9525_v6, %v7020_v5  ;;  %v7244_v9 = vld [vmem:[#allocation5 + $0x6c8] sm:$0xf]  ;;  %v9581_v10 = vld [vmem:[#allocation5 + $0x6e0] sm:$0xf0]  ;;  %2333 = vmatpush.bf16.msra.mxu0 %v6573_v3  ;;  %v6768_v14 = vld [vmem:[#allocation5 + $0x310] sm:$0xf]  ;;  %v6545_v16 = vor.u32 %v9406_v13, %v6544_v11 }
  0x23   :  { %v7245_v12 = vor.u32 %v9581_v10, %v7244_v9  ;;  %v9462_v15 = vld [vmem:[#allocation5 + $0x328] sm:$0xf0]  ;;  %2346 = vmatpush.bf16.msra.mxu1 %v6797_v7  ;;  %v6992_v18 = vld [vmem:[#allocation5 + $0x4d0] sm:$0xf]  ;;  %v6516_v23 = vld [vmem:[#allocation5 + $0x118] sm:$0xf] }
  0x24   :  { %2359 = vmatpush.bf16.msra.mxu2 %v7021_v8  ;;  %v6769_v17 = vor.u32 %v9462_v15, %v6768_v14  ;;  %v9518_v19 = vld [vmem:[#allocation5 + $0x4e8] sm:$0xf0]  ;;  %v7216_v20 = vld [vmem:[#allocation5 + $0x690] sm:$0xf]  ;;  %v9399_v24 = vld [vmem:[#allocation5 + $0x130] sm:$0xf0] }
  0x25   :  { %2372 = vmatpush.bf16.msra.mxu3 %v7245_v12  ;;  %v6993_v21 = vor.u32 %v9518_v19, %v6992_v18  ;;  %v9574_v22 = vld [vmem:[#allocation5 + $0x6a8] sm:$0xf0]  ;;  %v6740_v26 = vld [vmem:[#allocation5 + $0x2d8] sm:$0xf]  ;;  %v9455_v27 = vld [vmem:[#allocation5 + $0x2f0] sm:$0xf0]  ;;  %v6517_v29 = vor.u32 %v9399_v24, %v6516_v23 }
  0x26   :  { %v7217_v25 = vor.u32 %v9574_v22, %v7216_v20  ;;  %v6964_v28 = vld [vmem:[#allocation5 + $0x498] sm:$0xf]  ;;  %2334 = vmatpush.bf16.msra.mxu0 %v6545_v16  ;;  %v9511_v30 = vld [vmem:[#allocation5 + $0x4b0] sm:$0xf0]  ;;  %v6741_v33 = vor.u32 %v9455_v27, %v6740_v26  ;;  %v6488_v35 = vld [vmem:[#allocation5 + $0xe0] sm:$0xf] }
  0x27   :  { %v7188_v31 = vld [vmem:[#allocation5 + $0x658] sm:$0xf]  ;;  %v9567_v32 = vld [vmem:[#allocation5 + $0x670] sm:$0xf0]  ;;  %2347 = vmatpush.bf16.msra.mxu1 %v6769_v17  ;;  %v6965_v34 = vor.u32 %v9511_v30, %v6964_v28  ;;  %v9392_v36 = vld [vmem:[#allocation5 + $0xf8] sm:$0xf0] }
  0x28   :  { %2360 = vmatpush.bf16.msra.mxu2 %v6993_v21  ;;  %v6712_v37 = vld [vmem:[#allocation5 + $0x2a0] sm:$0xf]  ;;  %v7189_v38 = vor.u32 %v9567_v32, %v7188_v31  ;;  %v9448_v39 = vld [vmem:[#allocation5 + $0x2b8] sm:$0xf0]  ;;  %v6489_v44 = vor.u32 %v9392_v36, %v6488_v35  ;;  %v6460_v47 = vld [vmem:[#allocation5 + $0xa8] sm:$0xf] }
  0x29   :  { %2373 = vmatpush.bf16.msra.mxu3 %v7217_v25  ;;  %v6936_v40 = vld [vmem:[#allocation5 + $0x460] sm:$0xf]  ;;  %v9504_v41 = vld [vmem:[#allocation5 + $0x478] sm:$0xf0]  ;;  %v6713_v45 = vor.u32 %v9448_v39, %v6712_v37  ;;  %v9385_v48 = vld [vmem:[#allocation5 + $0xc0] sm:$0xf0] }
  0x2a   :  { %v7160_v42 = vld [vmem:[#allocation5 + $0x620] sm:$0xf]  ;;  %v9560_v43 = vld [vmem:[#allocation5 + $0x638] sm:$0xf0]  ;;  %2335 = vmatpush.bf16.msra.mxu0 %v6517_v29  ;;  %v6937_v46 = vor.u32 %v9504_v41, %v6936_v40  ;;  %v6684_v49 = vld [vmem:[#allocation5 + $0x268] sm:$0xf]  ;;  %v6461_v56 = vor.u32 %v9385_v48, %v6460_v47 }
  0x2b   :  { %2348 = vmatpush.bf16.msra.mxu1 %v6741_v33  ;;  %v7161_v50 = vor.u32 %v9560_v43, %v7160_v42  ;;  %v9441_v51 = vld [vmem:[#allocation5 + $0x280] sm:$0xf0]  ;;  %v6908_v52 = vld [vmem:[#allocation5 + $0x428] sm:$0xf]  ;;  %v6432_v59 = vld [vmem:[#allocation5 + $0x70] sm:$0xf] }
  0x2c   :  { %2361 = vmatpush.bf16.msra.mxu2 %v6965_v34  ;;  %v9497_v53 = vld [vmem:[#allocation5 + $0x440] sm:$0xf0]  ;;  %v7132_v54 = vld [vmem:[#allocation5 + $0x5e8] sm:$0xf]  ;;  %v6685_v57 = vor.u32 %v9441_v51, %v6684_v49  ;;  %v9378_v60 = vld [vmem:[#allocation5 + $0x88] sm:$0xf0] }
  0x2d   :  { %2374 = vmatpush.bf16.msra.mxu3 %v7189_v38  ;;  %v9553_v55 = vld [vmem:[#allocation5 + $0x600] sm:$0xf0]  ;;  %v6909_v58 = vor.u32 %v9497_v53, %v6908_v52  ;;  %v6656_v61 = vld [vmem:[#allocation5 + $0x230] sm:$0xf]  ;;  %v9434_v63 = vld [vmem:[#allocation5 + $0x248] sm:$0xf0]  ;;  %v6433_v4 = vor.u32 %v9378_v60, %v6432_v59 }
  0x2e   :  { %2336 = vmatpush.bf16.msra.mxu0 %v6489_v44  ;;  %v7133_v62 = vor.u32 %v9553_v55, %v7132_v54  ;;  %v6880_v0 = vld [vmem:[#allocation5 + $0x3f0] sm:$0xf]  ;;  %v9490_v1 = vld [vmem:[#allocation5 + $0x408] sm:$0xf0]  ;;  %v6657_v5 = vor.u32 %v9434_v63, %v6656_v61  ;;  %v6404_v7 = vld [vmem:[#allocation5 + $0x38] sm:$0xf] }
  0x2f   :  { %2349 = vmatpush.bf16.msra.mxu1 %v6713_v45  ;;  %v7104_v2 = vld [vmem:[#allocation5 + $0x5b0] sm:$0xf]  ;;  %v9546_v3 = vld [vmem:[#allocation5 + $0x5c8] sm:$0xf0]  ;;  %v6881_v6 = vor.u32 %v9490_v1, %v6880_v0  ;;  %v9371_v8 = vld [vmem:[#allocation5 + $0x50] sm:$0xf0] }
  0x30   :  { %2362 = vmatpush.bf16.msra.mxu2 %v6937_v46  ;;  %v6628_v9 = vld [vmem:[#allocation5 + $0x1f8] sm:$0xf]  ;;  %v7105_v10 = vor.u32 %v9546_v3, %v7104_v2  ;;  %v9427_v11 = vld [vmem:[#allocation5 + $0x210] sm:$0xf0]  ;;  %v6405_v16 = vor.u32 %v9371_v8, %v6404_v7  ;;  %v6376_v17 = vld [vmem:[#allocation5] sm:$0xf] }
  0x31   :  { %2375 = vmatpush.bf16.msra.mxu3 %v7161_v50  ;;  %v6852_v12 = vld [vmem:[#allocation5 + $0x3b8] sm:$0xf]  ;;  %v9483_v13 = vld [vmem:[#allocation5 + $0x3d0] sm:$0xf0]  ;;  %v9364_v18 = vld [vmem:[#allocation5 + $0x18] sm:$0xf0]  ;;  %v6629_v20 = vor.u32 %v9427_v11, %v6628_v9 }
  0x32   :  { %2337 = vmatpush.bf16.msra.mxu0 %v6461_v56  ;;  %v7076_v14 = vld [vmem:[#allocation5 + $0x578] sm:$0xf]  ;;  %v9539_v15 = vld [vmem:[#allocation5 + $0x590] sm:$0xf0]  ;;  %v6600_v19 = vld [vmem:[#allocation5 + $0x1c0] sm:$0xf]  ;;  %v6853_v21 = vor.u32 %v9483_v13, %v6852_v12  ;;  %v6377_v32 = vor.u32 %v9364_v18, %v6376_v17 }
  0x33   :  { %2350 = vmatpush.bf16.msra.mxu1 %v6685_v57  ;;  %v9420_v22 = vld [vmem:[#allocation5 + $0x1d8] sm:$0xf0]  ;;  %v6824_v23 = vld [vmem:[#allocation5 + $0x380] sm:$0xf]  ;;  %v7077_v25 = vor.u32 %v9539_v15, %v7076_v14  ;;  %v130_v28 = vld [vmem:[#allocation2 + $0x8] sm:$0xff]  ;;  %vm2329_vm0 = vcmask 130048  }
  0x34   :  { %2363 = vmatpush.bf16.msra.mxu2 %v6909_v58  ;;  %v9476_v24 = vld [vmem:[#allocation5 + $0x398] sm:$0xf0]  ;;  %v7048_v26 = vld [vmem:[#allocation5 + $0x540] sm:$0xf]  ;;  %v7468_v29 = vld [vmem:[#allocation5 + $0x888] sm:$0xf]  ;;  %v6601_v36 = vor.u32 %v9420_v22, %v6600_v19  ;;  %v547_v40 = vunpack.c.l.b16 %v130_v28  ;;  %v548_v41 = vunpack.c.h.b16 %v130_v28 }
  0x35   :  { %2376 = vmatpush.bf16.msra.mxu3 %v7133_v62  ;;  %v9532_v27 = vld [vmem:[#allocation5 + $0x558] sm:$0xf0]  ;;  %v9637_v30 = vld [vmem:[#allocation5 + $0x8a0] sm:$0xf0]  ;;  %v7692_v31 = vld [vmem:[#allocation5 + $0xa48] sm:$0xf]  ;;  %v6825_v37 = vor.u32 %v9476_v24, %v6824_v23 }
  0x36   :  { %2338 = vmatpush.bf16.msra.mxu0 %v6433_v4  ;;  %v9693_v33 = vld [vmem:[#allocation5 + $0xa60] sm:$0xf0]  ;;  %v9410_v34 = vld [vmem:[#allocation5 + $0x18c] sm:$0xf]  ;;  %v6574_v35 = vld [vmem:[#allocation5 + $0x1a4] sm:$0xf0]  ;;  %v7049_v42 = vor.u32 %v9532_v27, %v7048_v26  ;;  %v7469_v43 = vor.u32 %v9637_v30, %v7468_v29  ;;  %v10394_v55 = vpack.c.b16 %v547_v40, %v547_v40  ;;  %v10396_v56 = vpack.c.b16 %v548_v41, %v548_v41 }
  0x37   :  { %2351 = vmatpush.bf16.msra.mxu1 %v6657_v5  ;;  %v7720_v38 = vld [vmem:[#allocation5 + $0xa80] sm:$0xf]  ;;  %v9700_v39 = vld [vmem:[#allocation5 + $0xa98] sm:$0xf0]  ;;  %v9466_v44 = vld [vmem:[#allocation5 + $0x34c] sm:$0xf]  ;;  %v7693_v46 = vor.u32 %v9693_v33, %v7692_v31  ;;  %v6577_v47 = vor.u32 %v9410_v34, %v6574_v35 }
  0x38   :  { %2364 = vmatpush.bf16.msra.mxu2 %v6881_v6  ;;  %v6798_v45 = vld [vmem:[#allocation5 + $0x364] sm:$0xf0]  ;;  %v7440_v48 = vld [vmem:[#allocation5 + $0x850] sm:$0xf]  ;;  %v9630_v49 = vld [vmem:[#allocation5 + $0x868] sm:$0xf0]  ;;  %v7721_v51 = vor.u32 %v9700_v39, %v7720_v38 }
  0x39   :  { %2377 = vmatpush.bf16.msra.mxu3 %v7105_v10  ;;  %v7664_v50 = vld [vmem:[#allocation5 + $0xa10] sm:$0xf]  ;;  %v9686_v52 = vld [vmem:[#allocation5 + $0xa28] sm:$0xf0]  ;;  %v9403_v53 = vld [vmem:[#allocation5 + $0x154] sm:$0xf]  ;;  %v6801_v57 = vor.u32 %v9466_v44, %v6798_v45  ;;  %v7441_v58 = vor.u32 %v9630_v49, %v7440_v48 }
  0x3a   :  { %2339 = vmatpush.bf16.msra.mxu0 %v6405_v16  ;;  %v6546_v54 = vld [vmem:[#allocation5 + $0x16c] sm:$0xf0]  ;;  %v9459_v59 = vld [vmem:[#allocation5 + $0x314] sm:$0xf]  ;;  %v7412_v61 = vld [vmem:[#allocation5 + $0x818] sm:$0xf]  ;;  %v7665_v62 = vor.u32 %v9686_v52, %v7664_v50 }
  0x3b   :  { %2352 = vmatpush.bf16.msra.mxu1 %v6629_v20  ;;  %v6770_v60 = vld [vmem:[#allocation5 + $0x32c] sm:$0xf0]  ;;  %v6549_v63 = vor.u32 %v9403_v53, %v6546_v54  ;;  %v9623_v0 = vld [vmem:[#allocation5 + $0x830] sm:$0xf0]  ;;  %v7636_v1 = vld [vmem:[#allocation5 + $0x9d8] sm:$0xf] }
  0x3c   :  { %2365 = vmatpush.bf16.msra.mxu2 %v6853_v21  ;;  %v9679_v2 = vld [vmem:[#allocation5 + $0x9f0] sm:$0xf0]  ;;  %v9396_v3 = vld [vmem:[#allocation5 + $0x11c] sm:$0xf]  ;;  %v6518_v4 = vld [vmem:[#allocation5 + $0x134] sm:$0xf0]  ;;  %v6773_v8 = vor.u32 %v9459_v59, %v6770_v60  ;;  %v7413_v9 = vor.u32 %v9623_v0, %v7412_v61 }
  0x3d   :  { %2378 = vmatpush.bf16.msra.mxu3 %v7077_v25  ;;  %v129_v5 = vld [vmem:[#allocation2] sm:$0xff]  ;;  %v9452_v10 = vld [vmem:[#allocation5 + $0x2dc] sm:$0xf]  ;;  %v6742_v11 = vld [vmem:[#allocation5 + $0x2f4] sm:$0xf0]  ;;  %v7637_v12 = vor.u32 %v9679_v2, %v7636_v1  ;;  %v6521_v13 = vor.u32 %v9396_v3, %v6518_v4  ;;  %vm5200_vm1 = vcmask 261120  }
  0x3e   :  { %2340 = vmatpush.bf16.msra.mxu0 %v6377_v32  ;;  %v545_v6 = vunpack.c.l.b16 %v129_v5  ;;  %v546_v7 = vunpack.c.h.b16 %v129_v5  ;;  %v7384_v14 = vld [vmem:[#allocation5 + $0x7e0] sm:$0xf]  ;;  %v9616_v15 = vld [vmem:[#allocation5 + $0x7f8] sm:$0xf0]  ;;  %v9389_v19 = vld [vmem:[#allocation5 + $0xe4] sm:$0xf]  ;;  %v6745_v22 = vor.u32 %v9452_v10, %v6742_v11 }
  0x3f   :  { %2353 = vmatpush.bf16.msra.mxu1 %v6601_v36  ;;  %v7608_v16 = vld [vmem:[#allocation5 + $0x9a0] sm:$0xf]  ;;  %v9672_v18 = vld [vmem:[#allocation5 + $0x9b8] sm:$0xf0]  ;;  %v7385_v23 = vor.u32 %v9616_v15, %v7384_v14  ;;  %v9445_v24 = vld [vmem:[#allocation5 + $0x2a4] sm:$0xf] }
  0x40   :  { %2366 = vmatpush.bf16.msra.mxu2 %v6825_v37  ;;  %v10400_v17 = vpack.c.b16 %v545_v6, %v545_v6  ;;  %v6490_v20 = vld [vmem:[#allocation5 + $0xfc] sm:$0xf0]  ;;  %v10402_v21 = vpack.c.b16 %v546_v7, %v546_v7  ;;  %v7609_v26 = vor.u32 %v9672_v18, %v7608_v16  ;;  %v7356_v28 = vld [vmem:[#allocation5 + $0x7a8] sm:$0xf]  ;;  %v9609_v29 = vld [vmem:[#allocation5 + $0x7c0] sm:$0xf0] }
  0x41   :  { %2379 = vmatpush.bf16.msra.mxu3 %v7049_v42  ;;  %v6714_v25 = vld [vmem:[#allocation5 + $0x2bc] sm:$0xf0]  ;;  %v6493_v27 = vor.u32 %v9389_v19, %v6490_v20  ;;  %v7580_v30 = vld [vmem:[#allocation5 + $0x968] sm:$0xf]  ;;  %v9665_v31 = vld [vmem:[#allocation5 + $0x980] sm:$0xf0]  ;;  %v7357_v35 = vor.u32 %v9609_v29, %v7356_v28 }
  0x42   :  { %2385 = vmatpush.bf16.msrb.mxu0 %v7469_v43  ;;  %v9382_v32 = vld [vmem:[#allocation5 + $0xac] sm:$0xf]  ;;  %v6462_v33 = vld [vmem:[#allocation5 + $0xc4] sm:$0xf0]  ;;  %2354 = vmatmul.bf16.vlgmr.msra.gmra.mxu1 %v10402_v21  ;;  %v6717_v34 = vor.u32 %v9445_v24, %v6714_v25  ;;  %v7328_v38 = vld [vmem:[#allocation5 + $0x770] sm:$0xf]  ;;  %v7581_v39 = vor.u32 %v9665_v31, %v7580_v30 }
  0x43   :  { %2398 = vmatpush.bf16.msrb.mxu1 %v7693_v46  ;;  %2367 = vmatmul.bf16.vlgmr.msra.gmra.mxu2 %v10394_v55  ;;  %v9438_v36 = vld [vmem:[#allocation5 + $0x26c] sm:$0xf]  ;;  %v6686_v37 = vld [vmem:[#allocation5 + $0x284] sm:$0xf0]  ;;  %v6465_v40 = vor.u32 %v9382_v32, %v6462_v33  ;;  %v7552_v42 = vld [vmem:[#allocation5 + $0x930] sm:$0xf] }
  0x44   :  { %2418 = vmatpush.bf16.msrb.mxu2 %v7721_v51  ;;  %2380 = vmatmul.bf16.vlgmr.msra.gmra.mxu3 %v10396_v56  ;;  %v9602_v41 = vld [vmem:[#allocation5 + $0x788] sm:$0xf0]  ;;  %v132_v43 = vld [vmem:[#allocation2 + $0x18] sm:$0xf]  ;;  %v9375_v45 = vld [vmem:[#allocation5 + $0x74] sm:$0xf]  ;;  %v6689_v48 = vor.u32 %v9438_v36, %v6686_v37 }
  0x45   :  { %2424 = vmatpush.bf16.msrb.mxu3 %v6577_v47  ;;  %2341 = vmatmul.bf16.vlgmr.msra.gmra.mxu0 %v10400_v17  ;;  %v9658_v44 = vld [vmem:[#allocation5 + $0x948] sm:$0xf0]  ;;  %v6434_v46 = vld [vmem:[#allocation5 + $0x8c] sm:$0xf0]  ;;  %v551_v47 = vunpack.c.l.b16 %v132_v43  ;;  %v7329_v49 = vor.u32 %v9602_v41, %v7328_v38  ;;  %v9431_v50 = vld [vmem:[#allocation5 + $0x234] sm:$0xf] }
  0x46   :  { %2386 = vmatpush.bf16.msrb.mxu0 %v7441_v58  ;;  %v6658_v51 = vld [vmem:[#allocation5 + $0x24c] sm:$0xf0]  ;;  %v7553_v53 = vor.u32 %v9658_v44, %v7552_v42  ;;  %v6437_v54 = vor.u32 %v9375_v45, %v6434_v46  ;;  %v9595_v58 = vld [vmem:[#allocation5 + $0x750] sm:$0xf0]  ;;  %v7524_v59 = vld [vmem:[#allocation5 + $0x8f8] sm:$0xf] }
  0x47   :  { %2399 = vmatpush.bf16.msrb.mxu1 %v7665_v62  ;;  %v10406_v52 = vpack.c.b16 %v551_v47, %v551_v47  ;;  %v9651_v60 = vld [vmem:[#allocation5 + $0x910] sm:$0xf0]  ;;  %v9368_v61 = vld [vmem:[#allocation5 + $0x3c] sm:$0xf]  ;;  %v6406_v62 = vld [vmem:[#allocation5 + $0x54] sm:$0xf0]  ;;  %v6661_v0 = vor.u32 %v9431_v50, %v6658_v51 }
  0x48   :  { %2437 = vmatpush.bf16.msra.mxu2 %v6801_v57  ;;  %v7300_v57 = vld [vmem:[#allocation5 + $0x738] sm:$0xf]  ;;  %v7272_v3 = vld [vmem:[#allocation5 + $0x700] sm:$0xf]  ;;  %v7525_v5 = vor.u32 %v9651_v60, %v7524_v59  ;;  %v6409_v6 = vor.u32 %v9368_v61, %v6406_v62  ;;  %v9588_v7 = vld [vmem:[#allocation5 + $0x718] sm:$0xf0] }
  0x49   :  { %2425 = vmatpush.bf16.msrb.mxu3 %v6549_v63  ;;  %v9424_v63 = vld [vmem:[#allocation5 + $0x1fc] sm:$0xf]  ;;  %v7301_v1 = vor.u32 %v9595_v58, %v7300_v57  ;;  %v6630_v2 = vld [vmem:[#allocation5 + $0x214] sm:$0xf0]  ;;  %v9361_v10 = vld [vmem:[#allocation5 + $0x4] sm:$0xf]  ;;  %v7273_v19 = vor.u32 %v9588_v7, %v7272_v3 }
  0x4a   :  { %2387 = vmatpush.bf16.msrb.mxu0 %v7413_v9  ;;  %v131_v4 = vld [vmem:[#allocation2 + $0x10] sm:$0xff]  ;;  %v9644_v9 = vld [vmem:[#allocation5 + $0x8d8] sm:$0xf0]  ;;  %v6378_v11 = vld [vmem:[#allocation5 + $0x1c] sm:$0xf0]  ;;  %v6633_v18 = vor.u32 %v9424_v63, %v6630_v2  ;;  %s10332_s4 = smov [#allocation14]  }
  0x4b   :  { %2400 = vmatpush.bf16.msrb.mxu1 %v7637_v12  ;;  %v9522_v12 = vld [vmem:[#allocation5 + $0x50c] sm:$0xf]  ;;  %v7246_v15 = vld [vmem:[#allocation5 + $0x6e4] sm:$0xf0]  ;;  %v549_v16 = vunpack.c.l.b16 %v131_v4  ;;  %v6381_v25 = vor.u32 %v9361_v10, %v6378_v11  ;;  %v9515_v32 = vld [vmem:[#allocation5 + $0x4d4] sm:$0xf] }
  0x4c   :  { %2438 = vmatpush.bf16.msra.mxu2 %v6773_v8  ;;  %v7496_v8 = vld [vmem:[#allocation5 + $0x8c0] sm:$0xf]  ;;  %v9578_v14 = vld [vmem:[#allocation5 + $0x6cc] sm:$0xf]  ;;  %v7694_v31 = vld [vmem:[#allocation5 + $0xa64] sm:$0xf0] }
  0x4d   :  { %2426 = vmatpush.bf16.msrb.mxu3 %v6521_v13  ;;  %v7022_v13 = vld [vmem:[#allocation5 + $0x524] sm:$0xf0]  ;;  %v9634_v20 = vld [vmem:[#allocation5 + $0x88c] sm:$0xf]  ;;  %v7497_v24 = vor.u32 %v9644_v9, %v7496_v8  ;;  %v7249_v29 = vor.u32 %v9578_v14, %v7246_v15  ;;  %v7218_v36 = vld [vmem:[#allocation5 + $0x6ac] sm:$0xf0]  ;;  %v10410_v37 = vpack.c.b16 %v549_v16, %v549_v16 }
  0x4e   :  { %2388 = vmatpush.bf16.msrb.mxu0 %v7385_v23  ;;  %v550_v23 = vunpack.c.h.b16 %v131_v4  ;;  %v7025_v28 = vor.u32 %v9522_v12, %v7022_v13  ;;  %v9690_v30 = vld [vmem:[#allocation5 + $0xa4c] sm:$0xf]  ;;  %v9683_v45 = vld [vmem:[#allocation5 + $0xa14] sm:$0xf]  ;;  %v7666_v46 = vld [vmem:[#allocation5 + $0xa2c] sm:$0xf0] }
  0x4f   :  { %2401 = vmatpush.bf16.msrb.mxu1 %v7609_v26  ;;  %v9417_v26 = vld [vmem:[#allocation5 + $0x1c4] sm:$0xf]  ;;  %v7697_v42 = vor.u32 %v9690_v30, %v7694_v31  ;;  %v9508_v47 = vld [vmem:[#allocation5 + $0x49c] sm:$0xf]  ;;  %v7190_v51 = vld [vmem:[#allocation5 + $0x674] sm:$0xf0]  ;;  %v7669_v57 = vor.u32 %v9683_v45, %v7666_v46 }
  0x50   :  { %2439 = vmatpush.bf16.msra.mxu2 %v6745_v22  ;;  %v7470_v22 = vld [vmem:[#allocation5 + $0x8a4] sm:$0xf0]  ;;  %v10412_v41 = vpack.c.b16 %v550_v23, %v550_v23  ;;  %v9564_v50 = vld [vmem:[#allocation5 + $0x65c] sm:$0xf]  ;;  %v7638_v61 = vld [vmem:[#allocation5 + $0x9f4] sm:$0xf0] }
  0x51   :  { %2427 = vmatpush.bf16.msrb.mxu3 %v6493_v27  ;;  %v6602_v27 = vld [vmem:[#allocation5 + $0x1dc] sm:$0xf0]  ;;  %v7473_v33 = vor.u32 %v9634_v20, %v7470_v22  ;;  %v7193_v59 = vor.u32 %v9564_v50, %v7190_v51  ;;  %v9676_v60 = vld [vmem:[#allocation5 + $0x9dc] sm:$0xf]  ;;  %v9501_v62 = vld [vmem:[#allocation5 + $0x464] sm:$0xf] }
  0x52   :  { %2389 = vmatpush.bf16.msrb.mxu0 %v7357_v35  ;;  %v9571_v35 = vld [vmem:[#allocation5 + $0x694] sm:$0xf]  ;;  %v6605_v38 = vor.u32 %v9417_v26, %v6602_v27  ;;  %v7162_v2 = vld [vmem:[#allocation5 + $0x63c] sm:$0xf0]  ;;  %v9613_v3 = vld [vmem:[#allocation5 + $0x7e4] sm:$0xf] }
  0x53   :  { %2402 = vmatpush.bf16.msrb.mxu1 %v7581_v39  ;;  %7746 = vmatmul.msk.bf16.vlgmr.msrb.gmra.mxu2 %vm2329_vm0, %v10406_v52  ;;  %v9627_v39 = vld [vmem:[#allocation5 + $0x854] sm:$0xf]  ;;  %v7221_v44 = vor.u32 %v9571_v35, %v7218_v36  ;;  %v7386_v4 = vld [vmem:[#allocation5 + $0x7fc] sm:$0xf0]  ;;  %v9669_v8 = vld [vmem:[#allocation5 + $0x9a4] sm:$0xf] }
  0x54   :  { %2440 = vmatpush.bf16.msra.mxu2 %v6717_v34  ;;  %v6994_v34 = vld [vmem:[#allocation5 + $0x4ec] sm:$0xf0]  ;;  %v7610_v9 = vld [vmem:[#allocation5 + $0x9bc] sm:$0xf0]  ;;  %v9494_v10 = vld [vmem:[#allocation5 + $0x42c] sm:$0xf]  ;;  %v7389_v11 = vor.u32 %v9613_v3, %v7386_v4 }
  0x55   :  { %2428 = vmatpush.bf16.msrb.mxu3 %v6465_v40  ;;  %v7442_v40 = vld [vmem:[#allocation5 + $0x86c] sm:$0xf0]  ;;  %v6997_v43 = vor.u32 %v9515_v32, %v6994_v34  ;;  %v6910_v12 = vld [vmem:[#allocation5 + $0x444] sm:$0xf0]  ;;  %v9550_v13 = vld [vmem:[#allocation5 + $0x5ec] sm:$0xf] }
  0x56   :  { %2390 = vmatpush.bf16.msrb.mxu0 %v7329_v49  ;;  %v6966_v49 = vld [vmem:[#allocation5 + $0x4b4] sm:$0xf0]  ;;  %v7134_v14 = vld [vmem:[#allocation5 + $0x604] sm:$0xf0]  ;;  %v9606_v15 = vld [vmem:[#allocation5 + $0x7ac] sm:$0xf] }
  0x57   :  { %2403 = vmatpush.bf16.msrb.mxu1 %v7553_v53  ;;  %v9620_v53 = vld [vmem:[#allocation5 + $0x81c] sm:$0xf]  ;;  %v6969_v58 = vor.u32 %v9508_v47, %v6966_v49  ;;  %v7358_v16 = vld [vmem:[#allocation5 + $0x7c4] sm:$0xf0]  ;;  %v7137_v20 = vor.u32 %v9550_v13, %v7134_v14  ;;  %v9662_v22 = vld [vmem:[#allocation5 + $0x96c] sm:$0xf] }
  0x58   :  { %2441 = vmatpush.bf16.msra.mxu2 %v6689_v48  ;;  %v7445_v48 = vor.u32 %v9627_v39, %v7442_v40  ;;  %v7582_v23 = vld [vmem:[#allocation5 + $0x984] sm:$0xf0]  ;;  %v6882_v26 = vld [vmem:[#allocation5 + $0x40c] sm:$0xf0]  ;;  %v9543_v27 = vld [vmem:[#allocation5 + $0x5b4] sm:$0xf] }
  0x59   :  { %2429 = vmatpush.bf16.msrb.mxu3 %v6437_v54  ;;  %v7414_v54 = vld [vmem:[#allocation5 + $0x834] sm:$0xf0]  ;;  %v7330_v30 = vld [vmem:[#allocation5 + $0x78c] sm:$0xf0]  ;;  %v7585_v31 = vor.u32 %v9662_v22, %v7582_v23  ;;  %v9655_v34 = vld [vmem:[#allocation5 + $0x934] sm:$0xf] }
  0x5a   :  { %2391 = vmatpush.bf16.msrb.mxu0 %v7301_v1  ;;  %v7417_v63 = vor.u32 %v9620_v53, %v7414_v54  ;;  %v9557_v1 = vld [vmem:[#allocation5 + $0x624] sm:$0xf]  ;;  %v7554_v35 = vld [vmem:[#allocation5 + $0x94c] sm:$0xf0]  ;;  %v9480_v36 = vld [vmem:[#allocation5 + $0x3bc] sm:$0xf] }
  0x5b   :  { %2404 = vmatpush.bf16.msrb.mxu1 %v7525_v5  ;;  %v7641_v5 = vor.u32 %v9676_v60, %v7638_v61  ;;  %v7165_v7 = vor.u32 %v9557_v1, %v7162_v2  ;;  %v6854_v39 = vld [vmem:[#allocation5 + $0x3d4] sm:$0xf0]  ;;  %v9536_v40 = vld [vmem:[#allocation5 + $0x57c] sm:$0xf]  ;;  %v7557_v45 = vor.u32 %v9655_v34, %v7554_v35  ;;  %v6826_v51 = vld [vmem:[#allocation5 + $0x39c] sm:$0xf0] }
  0x5c   :  { %2442 = vmatpush.bf16.msra.mxu2 %v6661_v0  ;;  %v6938_v0 = vld [vmem:[#allocation5 + $0x47c] sm:$0xf0]  ;;  %v9648_v46 = vld [vmem:[#allocation5 + $0x8fc] sm:$0xf]  ;;  %v7526_v47 = vld [vmem:[#allocation5 + $0x914] sm:$0xf0]  ;;  %v6857_v49 = vor.u32 %v9480_v36, %v6854_v39 }
  0x5d   :  { %2430 = vmatpush.bf16.msrb.mxu3 %v6409_v6  ;;  %v6941_v6 = vor.u32 %v9501_v62, %v6938_v0  ;;  %v9529_v53 = vld [vmem:[#allocation5 + $0x544] sm:$0xf]  ;;  %v7050_v54 = vld [vmem:[#allocation5 + $0x55c] sm:$0xf0]  ;;  %v6580_v60 = vld [vmem:[#allocation5 + $0x190] sm:$0xf] }
  0x5e   :  { %2392 = vmatpush.bf16.msrb.mxu0 %v7273_v19  ;;  %v6913_v19 = vor.u32 %v9494_v10, %v6910_v12  ;;  %v9414_v61 = vld [vmem:[#allocation5 + $0x1a8] sm:$0xf0]  ;;  %v6804_v62 = vld [vmem:[#allocation5 + $0x350] sm:$0xf]  ;;  %v9697_v1 = vld [vmem:[#allocation5 + $0xa84] sm:$0xf]  ;;  %v7053_v4 = vor.u32 %v9529_v53, %v7050_v54 }
  0x5f   :  { %2405 = vmatpush.bf16.msrb.mxu1 %v7497_v24  ;;  %v9487_v24 = vld [vmem:[#allocation5 + $0x3f4] sm:$0xf]  ;;  %v9470_v0 = vld [vmem:[#allocation5 + $0x368] sm:$0xf0]  ;;  %v7722_v2 = vld [vmem:[#allocation5 + $0xa9c] sm:$0xf0] }
  0x60   :  { %2443 = vmatpush.bf16.msra.mxu2 %v6633_v18  ;;  %v7613_v18 = vor.u32 %v9669_v8, %v7610_v9  ;;  %v6885_v32 = vor.u32 %v9487_v24, %v6882_v26  ;;  %v6581_v9 = vor.u32 %v9414_v61, %v6580_v60  ;;  %v9526_v10 = vld [vmem:[#allocation5 + $0x528] sm:$0xf0]  ;;  %v6805_v13 = vor.u32 %v9470_v0, %v6804_v62  ;;  %v7000_v24 = vld [vmem:[#allocation5 + $0x4d8] sm:$0xf]  ;;  %v9519_v26 = vld [vmem:[#allocation5 + $0x4f0] sm:$0xf0] }
  0x61   :  { %2431 = vmatpush.bf16.msrb.mxu3 %v6381_v25  ;;  %2393 = vmatmul.bf16.vlgmr.msrb.gmra.mxu0 %v10410_v37  ;;  %v7361_v25 = vor.u32 %v9606_v15, %v7358_v16  ;;  %v9582_v12 = vld [vmem:[#allocation5 + $0x6e8] sm:$0xf0]  ;;  %v7725_v14 = vor.u32 %v9697_v1, %v7722_v2  ;;  %v6552_v15 = vld [vmem:[#allocation5 + $0x158] sm:$0xf]  ;;  %v9407_v16 = vld [vmem:[#allocation5 + $0x170] sm:$0xf0]  ;;  %v7001_v34 = vor.u32 %v9519_v26, %v7000_v24 }
  0x62   :  { %2450 = vmatpush.bf16.msra.mxu0 %v7025_v28  ;;  %2406 = vmatmul.bf16.vlgmr.msrb.gmra.mxu1 %v10412_v41  ;;  %v7106_v28 = vld [vmem:[#allocation5 + $0x5cc] sm:$0xf0]  ;;  %v6972_v36 = vld [vmem:[#allocation5 + $0x4a0] sm:$0xf]  ;;  %v9512_v39 = vld [vmem:[#allocation5 + $0x4b8] sm:$0xf0] }
  0x63   :  { %2463 = vmatpush.bf16.msra.mxu1 %v7249_v29  ;;  %v9599_v29 = vld [vmem:[#allocation5 + $0x774] sm:$0xf]  ;;  %v9505_v53 = vld [vmem:[#allocation5 + $0x480] sm:$0xf0]  ;;  %v7168_v54 = vld [vmem:[#allocation5 + $0x628] sm:$0xf] }
  0x64   :  { %2444 = vmatpush.bf16.msra.mxu2 %v6605_v38  ;;  %2432 = vmatmul.bf16.vlgmr.msrb.gmra.mxu3 %v10400_v17  ;;  %v7333_v38 = vor.u32 %v9599_v29, %v7330_v30  ;;  %v6524_v30 = vld [vmem:[#allocation5 + $0x120] sm:$0xf]  ;;  %v9386_v60 = vld [vmem:[#allocation5 + $0xc8] sm:$0xf0]  ;;  %v6692_v61 = vld [vmem:[#allocation5 + $0x270] sm:$0xf] }
  0x65   :  { %2476 = vmatpush.bf16.msra.mxu3 %v7473_v33  ;;  %v7109_v33 = vor.u32 %v9543_v27, %v7106_v28  ;;  %v7224_v27 = vld [vmem:[#allocation5 + $0x698] sm:$0xf]  ;;  %v9575_v28 = vld [vmem:[#allocation5 + $0x6b0] sm:$0xf0]  ;;  %v9442_v62 = vld [vmem:[#allocation5 + $0x288] sm:$0xf0] }
  0x66   :  { %2451 = vmatpush.bf16.msra.mxu0 %v6997_v43  ;;  %v9592_v43 = vld [vmem:[#allocation5 + $0x73c] sm:$0xf]  ;;  %v7225_v35 = vor.u32 %v9575_v28, %v7224_v27  ;;  %v6916_v1 = vld [vmem:[#allocation5 + $0x430] sm:$0xf]  ;;  %v6860_v27 = vld [vmem:[#allocation5 + $0x3c0] sm:$0xf] }
  0x67   :  { %2464 = vmatpush.bf16.msra.mxu1 %v7221_v44  ;;  %2445 = vmatmul.bf16.vlgmr.msra.gmra.mxu2 %v10402_v21  ;;  %v7302_v44 = vld [vmem:[#allocation5 + $0x754] sm:$0xf0]  ;;  %v9428_v24 = vld [vmem:[#allocation5 + $0x218] sm:$0xf0]  ;;  %s6359_s6 = sshll.u32 %s10332_s4, 4  ;;  %s6361_s14 = sshll.u32 %s10723_s7, 4  ;;  %s6360_s6 = int_to_ptr.vmem [resolvable:$true] %s6359_s6  ;;  %s6362_s14 = int_to_ptr.hbm [resolvable:$true] %s6361_s14 }
  0x68   :  { %2489 = vmatpush.bf16.msrb.mxu2 %v7697_v42  ;;  %v7078_v42 = vld [vmem:[#allocation5 + $0x594] sm:$0xf0]  ;;  %v9484_v28 = vld [vmem:[#allocation5 + $0x3d8] sm:$0xf0] }
  0x69   :  { %2477 = vmatpush.bf16.msra.mxu3 %v7445_v48  ;;  %v9473_v48 = vld [vmem:[#allocation5 + $0x384] sm:$0xf]  ;;  %v7081_v50 = vor.u32 %v9536_v40, %v7078_v42  ;;  %v7196_v40 = vld [vmem:[#allocation5 + $0x660] sm:$0xf]  ;;  %v9568_v42 = vld [vmem:[#allocation5 + $0x678] sm:$0xf0] }
  0x6a   :  { %2452 = vmatpush.bf16.msra.mxu0 %v6969_v58  ;;  %v9585_v58 = vld [vmem:[#allocation5 + $0x704] sm:$0xf]  ;;  %v6829_v3 = vor.u32 %v9473_v48, %v6826_v51  ;;  %v6973_v48 = vor.u32 %v9512_v39, %v6972_v36  ;;  %v9638_v39 = vld [vmem:[#allocation5 + $0x8a8] sm:$0xf0] }
  0x6b   :  { %2465 = vmatpush.bf16.msra.mxu1 %v7193_v59  ;;  %v7274_v59 = vld [vmem:[#allocation5 + $0x71c] sm:$0xf0]  ;;  %v9421_v36 = vld [vmem:[#allocation5 + $0x1e0] sm:$0xf0] }
  0x6c   :  { %2490 = vmatpush.bf16.msrb.mxu2 %v7669_v57  ;;  %v7305_v57 = vor.u32 %v9592_v43, %v7302_v44  ;;  %v7277_v8 = vor.u32 %v9585_v58, %v7274_v59  ;;  %v6496_v44 = vld [vmem:[#allocation5 + $0xe8] sm:$0xf]  ;;  %v6468_v59 = vld [vmem:[#allocation5 + $0xb0] sm:$0xf] }
  0x6d   :  { %2478 = vmatpush.bf16.msra.mxu3 %v7417_v63  ;;  %v7529_v63 = vor.u32 %v9648_v46, %v7526_v47  ;;  %v6720_v46 = vld [vmem:[#allocation5 + $0x2a8] sm:$0xf]  ;;  %v9449_v47 = vld [vmem:[#allocation5 + $0x2c0] sm:$0xf0]  ;;  %v6469_v2 = vor.u32 %v9386_v60, %v6468_v59  ;;  %v7448_v60 = vld [vmem:[#allocation5 + $0x858] sm:$0xf] }
  0x6e   :  { %2453 = vmatpush.bf16.msra.mxu0 %v6941_v6  ;;  %v7498_v6 = vld [vmem:[#allocation5 + $0x8dc] sm:$0xf0]  ;;  %v6721_v58 = vor.u32 %v9449_v47, %v6720_v46  ;;  %v9477_v46 = vld [vmem:[#allocation5 + $0x3a0] sm:$0xf0] }
  0x6f   :  { %2466 = vmatpush.bf16.msra.mxu1 %v7165_v7  ;;  %v7028_v7 = vld [vmem:[#allocation5 + $0x510] sm:$0xf] }
  0x70   :  { %2491 = vmatpush.bf16.msrb.mxu2 %v7641_v5  ;;  %v9641_v5 = vld [vmem:[#allocation5 + $0x8c4] sm:$0xf]  ;;  %v7029_v22 = vor.u32 %v9526_v10, %v7028_v7  ;;  %v6440_v7 = vld [vmem:[#allocation5 + $0x78] sm:$0xf]  ;;  %v9435_v10 = vld [vmem:[#allocation5 + $0x250] sm:$0xf0] }
  0x71   :  { %2479 = vmatpush.bf16.msra.mxu3 %v7389_v11  ;;  %v7252_v11 = vld [vmem:[#allocation5 + $0x6d0] sm:$0xf] }
  0x72   :  { %2454 = vmatpush.bf16.msra.mxu0 %v6913_v19  ;;  %v6776_v19 = vld [vmem:[#allocation5 + $0x318] sm:$0xf]  ;;  %v7253_v23 = vor.u32 %v9582_v12, %v7252_v11 }
  0x73   :  { %2467 = vmatpush.bf16.msra.mxu1 %v7137_v20  ;;  %v9463_v20 = vld [vmem:[#allocation5 + $0x330] sm:$0xf0] }
  0x74   :  { %2492 = vmatpush.bf16.msrb.mxu2 %v7613_v18  ;;  %v7501_v18 = vor.u32 %v9641_v5, %v7498_v6  ;;  %v6777_v29 = vor.u32 %v9463_v20, %v6776_v19  ;;  %v9554_v5 = vld [vmem:[#allocation5 + $0x608] sm:$0xf0]  ;;  %v6693_v6 = vor.u32 %v9442_v62, %v6692_v61  ;;  %v6412_v20 = vld [vmem:[#allocation5 + $0x40] sm:$0xf]  ;;  %v9631_v61 = vld [vmem:[#allocation5 + $0x870] sm:$0xf0] }
  0x75   :  { %2480 = vmatpush.bf16.msra.mxu3 %v7361_v25  ;;  %v6553_v25 = vor.u32 %v9407_v16, %v6552_v15  ;;  %v9491_v15 = vld [vmem:[#allocation5 + $0x410] sm:$0xf0]  ;;  %v7112_v16 = vld [vmem:[#allocation5 + $0x5b8] sm:$0xf] }
  0x76   :  { %2455 = vmatpush.bf16.msra.mxu0 %v6885_v32  ;;  %v6748_v32 = vld [vmem:[#allocation5 + $0x2e0] sm:$0xf] }
  0x77   :  { %2468 = vmatpush.bf16.msra.mxu1 %v7109_v33  ;;  %v9456_v33 = vld [vmem:[#allocation5 + $0x2f8] sm:$0xf0] }
  0x78   :  { %2493 = vmatpush.bf16.msrb.mxu2 %v7585_v31  ;;  %v9400_v31 = vld [vmem:[#allocation5 + $0x138] sm:$0xf0]  ;;  %v6749_v43 = vor.u32 %v9456_v33, %v6748_v32  ;;  %v6384_v32 = vld [vmem:[#allocation5 + $0x8] sm:$0xf] }
  0x79   :  { %2481 = vmatpush.bf16.msra.mxu3 %v7333_v38  ;;  %v6525_v38 = vor.u32 %v9400_v31, %v6524_v30  ;;  %v7084_v30 = vld [vmem:[#allocation5 + $0x580] sm:$0xf]  ;;  %v9540_v31 = vld [vmem:[#allocation5 + $0x598] sm:$0xf0] }
  0x7a   :  { %2456 = vmatpush.bf16.msra.mxu0 %v6857_v49  ;;  %v7197_v49 = vor.u32 %v9568_v42, %v7196_v40  ;;  %v7700_v40 = vld [vmem:[#allocation5 + $0xa50] sm:$0xf]  ;;  %v6861_v42 = vor.u32 %v9484_v28, %v6860_v27  ;;  %v7616_v27 = vld [vmem:[#allocation5 + $0x9a8] sm:$0xf]  ;;  %v9673_v28 = vld [vmem:[#allocation5 + $0x9c0] sm:$0xf0] }
  0x7b   :  { %2469 = vmatpush.bf16.msra.mxu1 %v7081_v50  ;;  %v6944_v50 = vld [vmem:[#allocation5 + $0x468] sm:$0xf] }
  0x7c   :  { %2494 = vmatpush.bf16.msrb.mxu2 %v7557_v45  ;;  %v9393_v45 = vld [vmem:[#allocation5 + $0x100] sm:$0xf0] }
  0x7d   :  { %2482 = vmatpush.bf16.msra.mxu3 %v7305_v57  ;;  %v6497_v51 = vor.u32 %v9393_v45, %v6496_v44  ;;  %v9561_v57 = vld [vmem:[#allocation5 + $0x640] sm:$0xf0]  ;;  %v9694_v44 = vld [vmem:[#allocation5 + $0xa68] sm:$0xf0]  ;;  %v6832_v45 = vld [vmem:[#allocation5 + $0x388] sm:$0xf] }
  0x7e   :  { %2457 = vmatpush.bf16.msra.mxu0 %v6829_v3  ;;  %v7169_v0 = vor.u32 %v9561_v57, %v7168_v54  ;;  %v9498_v3 = vld [vmem:[#allocation5 + $0x448] sm:$0xf0]  ;;  %v6582_v54 = vld [vmem:[#allocation5 + $0x1ac] sm:$0xf0]  ;;  %v7728_v57 = vld [vmem:[#allocation5 + $0xa88] sm:$0xf]  ;;  %v7701_v59 = vor.u32 %v9694_v44, %v7700_v40  ;;  %v6833_v62 = vor.u32 %v9477_v46, %v6832_v45 }
  0x7f   :  { %2470 = vmatpush.bf16.msra.mxu1 %v7053_v4  ;;  %v7140_v4 = vld [vmem:[#allocation5 + $0x5f0] sm:$0xf]  ;;  %v6917_v11 = vor.u32 %v9498_v3, %v6916_v1  ;;  %v9687_v1 = vld [vmem:[#allocation5 + $0xa30] sm:$0xf0]  ;;  %v9446_v44 = vld [vmem:[#allocation5 + $0x2ac] sm:$0xf] }
  0x80   :  { %2495 = vmatpush.bf16.msrb.mxu2 %v7529_v63  ;;  %v6945_v63 = vor.u32 %v9505_v53, %v6944_v50  ;;  %v7141_v12 = vor.u32 %v9554_v5, %v7140_v4  ;;  %v9411_v50 = vld [vmem:[#allocation5 + $0x194] sm:$0xf]  ;;  %v6806_v5 = vld [vmem:[#allocation5 + $0x36c] sm:$0xf0]  ;;  %v6722_v45 = vld [vmem:[#allocation5 + $0x2c4] sm:$0xf0] }
  0x81   :  { %2483 = vmatpush.bf16.msra.mxu3 %v7277_v8  ;;  %2458 = vmatmul.bf16.vlgmr.msra.gmra.mxu0 %v10394_v55  ;;  %v9379_v8 = vld [vmem:[#allocation5 + $0x90] sm:$0xf0]  ;;  %v7588_v40 = vld [vmem:[#allocation5 + $0x970] sm:$0xf] }
  0x82   :  { %2509 = vmatpush.bf16.msrb.mxu0 %v7725_v14  ;;  %2471 = vmatmul.bf16.vlgmr.msra.gmra.mxu1 %v10396_v56  ;;  %v6441_v14 = vor.u32 %v9379_v8, %v6440_v7  ;;  %v9467_v4 = vld [vmem:[#allocation5 + $0x354] sm:$0xf]  ;;  %v9404_v7 = vld [vmem:[#allocation5 + $0x15c] sm:$0xf]  ;;  %v6554_v8 = vld [vmem:[#allocation5 + $0x174] sm:$0xf0] }
  0x83   :  { %2515 = vmatpush.bf16.msrb.mxu1 %v6581_v9  ;;  %v6664_v9 = vld [vmem:[#allocation5 + $0x238] sm:$0xf] }
  0x84   :  { %2496 = vmatpush.bf16.msrb.mxu2 %v7501_v18  ;;  %2484 = vmatmul.bf16.vlgmr.msra.gmra.mxu3 %v10410_v37  ;;  %v9547_v18 = vld [vmem:[#allocation5 + $0x5d0] sm:$0xf0]  ;;  %v6665_v19 = vor.u32 %v9435_v10, %v6664_v9  ;;  %v7420_v10 = vld [vmem:[#allocation5 + $0x820] sm:$0xf] }
  0x85   :  { %2528 = vmatpush.bf16.msrb.mxu3 %v6805_v13  ;;  %v6888_v13 = vld [vmem:[#allocation5 + $0x3f8] sm:$0xf]  ;;  %v7113_v26 = vor.u32 %v9547_v18, %v7112_v16  ;;  %v9460_v16 = vld [vmem:[#allocation5 + $0x31c] sm:$0xf] }
  0x86   :  { %2541 = vmatpush.bf16.msra.mxu0 %v7029_v22  ;;  %v9372_v22 = vld [vmem:[#allocation5 + $0x58] sm:$0xf0]  ;;  %v6778_v18 = vld [vmem:[#allocation5 + $0x334] sm:$0xf0] }
  0x87   :  { %2516 = vmatpush.bf16.msrb.mxu1 %v6553_v25  ;;  %2497 = vmatmul.bf16.vlgmr.msrb.gmra.mxu2 %v10412_v41  ;;  %v6889_v25 = vor.u32 %v9491_v15, %v6888_v13  ;;  %v7644_v13 = vld [vmem:[#allocation5 + $0x9e0] sm:$0xf]  ;;  %v6557_v15 = vor.u32 %v9404_v7, %v6554_v8  ;;  %v9432_v7 = vld [vmem:[#allocation5 + $0x23c] sm:$0xf]  ;;  %v6666_v8 = vld [vmem:[#allocation5 + $0x254] sm:$0xf0] }
  0x88   :  { %2554 = vmatpush.bf16.msra.mxu2 %v7253_v23  ;;  %v6636_v23 = vld [vmem:[#allocation5 + $0x200] sm:$0xf] }
  0x89   :  { %2529 = vmatpush.bf16.msrb.mxu3 %v6777_v29  ;;  %v6413_v29 = vor.u32 %v9372_v22, %v6412_v20  ;;  %v6637_v33 = vor.u32 %v9428_v24, %v6636_v23  ;;  %v9397_v20 = vld [vmem:[#allocation5 + $0x124] sm:$0xf]  ;;  %v6526_v22 = vld [vmem:[#allocation5 + $0x13c] sm:$0xf0]  ;;  %v7392_v24 = vld [vmem:[#allocation5 + $0x7e8] sm:$0xf] }
  0x8a   :  { %2542 = vmatpush.bf16.msra.mxu0 %v7001_v34  ;;  %v9365_v34 = vld [vmem:[#allocation5 + $0x20] sm:$0xf0] }
  0x8b   :  { %2517 = vmatpush.bf16.msrb.mxu1 %v6525_v38  ;;  %v7476_v38 = vld [vmem:[#allocation5 + $0x890] sm:$0xf]  ;;  %v6385_v47 = vor.u32 %v9365_v34, %v6384_v32  ;;  %v6498_v34 = vld [vmem:[#allocation5 + $0x104] sm:$0xf0] }
  0x8c   :  { %2555 = vmatpush.bf16.msra.mxu2 %v7225_v35  ;;  %v6608_v35 = vld [vmem:[#allocation5 + $0x1c8] sm:$0xf]  ;;  %v7477_v53 = vor.u32 %v9638_v39, %v7476_v38  ;;  %v9610_v38 = vld [vmem:[#allocation5 + $0x7c8] sm:$0xf0] }
  0x8d   :  { %2530 = vmatpush.bf16.msrb.mxu3 %v6749_v43  ;;  %v7085_v43 = vor.u32 %v9540_v31, %v7084_v30  ;;  %v9453_v30 = vld [vmem:[#allocation5 + $0x2e4] sm:$0xf]  ;;  %v6750_v31 = vld [vmem:[#allocation5 + $0x2fc] sm:$0xf0] }
  0x8e   :  { %2543 = vmatpush.bf16.msra.mxu0 %v6973_v48  ;;  %v7056_v48 = vld [vmem:[#allocation5 + $0x548] sm:$0xf]  ;;  %v6753_v39 = vor.u32 %v9453_v30, %v6750_v31 }
  0x8f   :  { %2518 = vmatpush.bf16.msrb.mxu1 %v6497_v51  ;;  %v6609_v51 = vor.u32 %v9421_v36, %v6608_v35  ;;  %v7617_v35 = vor.u32 %v9673_v28, %v7616_v27  ;;  %v7364_v36 = vld [vmem:[#allocation5 + $0x7b0] sm:$0xf]  ;;  %v9362_v28 = vld [vmem:[#allocation5 + $0xc] sm:$0xf] }
  0x90   :  { %2556 = vmatpush.bf16.msra.mxu2 %v7197_v49  ;;  %v9533_v49 = vld [vmem:[#allocation5 + $0x560] sm:$0xf0]  ;;  %v7365_v46 = vor.u32 %v9610_v38, %v7364_v36  ;;  %v9516_v36 = vld [vmem:[#allocation5 + $0x4dc] sm:$0xf]  ;;  %v7002_v38 = vld [vmem:[#allocation5 + $0x4f4] sm:$0xf0] }
  0x91   :  { %2531 = vmatpush.bf16.msrb.mxu3 %v6721_v58  ;;  %7747 = vmatmul.msk.bf16.vlgmr.msrb.gmra.mxu0 %vm2329_vm0, %v10406_v52  ;;  %v9701_v58 = vld [vmem:[#allocation5 + $0xaa0] sm:$0xf0] }
  0x92   :  { %2544 = vmatpush.bf16.msra.mxu0 %v6945_v63  ;;  %v7057_v63 = vor.u32 %v9533_v49, %v7056_v48  ;;  %v7729_v3 = vor.u32 %v9701_v58, %v7728_v57  ;;  %v6470_v48 = vld [vmem:[#allocation5 + $0xcc] sm:$0xf0]  ;;  %v9659_v57 = vld [vmem:[#allocation5 + $0x950] sm:$0xf0] }
  0x93   :  { %2519 = vmatpush.bf16.msrb.mxu1 %v6469_v2  ;;  %v6585_v2 = vor.u32 %v9411_v50, %v6582_v54  ;;  %v7336_v50 = vld [vmem:[#allocation5 + $0x778] sm:$0xf] }
  0x94   :  { %2557 = vmatpush.bf16.msra.mxu2 %v7169_v0  ;;  %v7672_v0 = vld [vmem:[#allocation5 + $0xa18] sm:$0xf] }
  0x95   :  { %2532 = vmatpush.bf16.msrb.mxu3 %v6693_v6  ;;  %v7449_v6 = vor.u32 %v9631_v61, %v7448_v60  ;;  %v7673_v9 = vor.u32 %v9687_v1, %v7672_v0  ;;  %v7560_v54 = vld [vmem:[#allocation5 + $0x938] sm:$0xf]  ;;  %v6694_v60 = vld [vmem:[#allocation5 + $0x28c] sm:$0xf0]  ;;  %v7308_v1 = vld [vmem:[#allocation5 + $0x740] sm:$0xf] }
  0x96   :  { %2545 = vmatpush.bf16.msra.mxu0 %v6917_v11  ;;  %v9624_v11 = vld [vmem:[#allocation5 + $0x838] sm:$0xf0]  ;;  %v7561_v0 = vor.u32 %v9659_v57, %v7560_v54  ;;  %v9509_v54 = vld [vmem:[#allocation5 + $0x4a4] sm:$0xf]  ;;  %v6974_v57 = vld [vmem:[#allocation5 + $0x4bc] sm:$0xf0] }
  0x97   :  { %2520 = vmatpush.bf16.msrb.mxu1 %v6441_v14  ;;  %v9680_v14 = vld [vmem:[#allocation5 + $0x9f8] sm:$0xf0] }
  0x98   :  { %2558 = vmatpush.bf16.msra.mxu2 %v7141_v12  ;;  %v6809_v12 = vor.u32 %v9467_v4, %v6806_v5  ;;  %v7645_v23 = vor.u32 %v9680_v14, %v7644_v13  ;;  %v7532_v4 = vld [vmem:[#allocation5 + $0x900] sm:$0xf]  ;;  %v9652_v5 = vld [vmem:[#allocation5 + $0x918] sm:$0xf0]  ;;  %v9589_v14 = vld [vmem:[#allocation5 + $0x720] sm:$0xf0] }
  0x99   :  { %2533 = vmatpush.bf16.msrb.mxu3 %v6665_v19  ;;  %v7421_v19 = vor.u32 %v9624_v11, %v7420_v10  ;;  %v9369_v10 = vld [vmem:[#allocation5 + $0x44] sm:$0xf]  ;;  %v6414_v11 = vld [vmem:[#allocation5 + $0x5c] sm:$0xf0]  ;;  %v7533_v13 = vor.u32 %v9652_v5, %v7532_v4  ;;  %v9502_v4 = vld [vmem:[#allocation5 + $0x46c] sm:$0xf] }
  0x9a   :  { %2546 = vmatpush.bf16.msra.mxu0 %v6889_v25  ;;  %v9617_v25 = vld [vmem:[#allocation5 + $0x800] sm:$0xf0]  ;;  %v6946_v5 = vld [vmem:[#allocation5 + $0x484] sm:$0xf0] }
  0x9b   :  { %2521 = vmatpush.bf16.msrb.mxu1 %v6413_v29  ;;  %v6529_v29 = vor.u32 %v9397_v20, %v6526_v22  ;;  %v7393_v32 = vor.u32 %v9617_v25, %v7392_v24  ;;  %v7030_v20 = vld [vmem:[#allocation5 + $0x52c] sm:$0xf0]  ;;  %v9579_v22 = vld [vmem:[#allocation5 + $0x6d4] sm:$0xf]  ;;  %v9425_v25 = vld [vmem:[#allocation5 + $0x204] sm:$0xf] }
  0x9c   :  { %2559 = vmatpush.bf16.msra.mxu2 %v7113_v26  ;;  %v6781_v26 = vor.u32 %v9460_v16, %v6778_v18  ;;  %v9645_v16 = vld [vmem:[#allocation5 + $0x8e0] sm:$0xf0]  ;;  %v6669_v18 = vor.u32 %v9432_v7, %v6666_v8  ;;  %v7254_v24 = vld [vmem:[#allocation5 + $0x6ec] sm:$0xf0]  ;;  %v9558_v7 = vld [vmem:[#allocation5 + $0x62c] sm:$0xf] }
  0x9d   :  { %2534 = vmatpush.bf16.msrb.mxu3 %v6637_v33  ;;  %v9390_v33 = vld [vmem:[#allocation5 + $0xec] sm:$0xf]  ;;  %v7170_v8 = vld [vmem:[#allocation5 + $0x644] sm:$0xf0] }
  0x9e   :  { %2547 = vmatpush.bf16.msra.mxu0 %v6861_v42  ;;  %v9666_v42 = vld [vmem:[#allocation5 + $0x988] sm:$0xf0] }
  0x9f   :  { %2522 = vmatpush.bf16.msrb.mxu1 %v6385_v47  ;;  %v9383_v47 = vld [vmem:[#allocation5 + $0xb4] sm:$0xf]  ;;  %v7589_v49 = vor.u32 %v9666_v42, %v7588_v40  ;;  %v7226_v42 = vld [vmem:[#allocation5 + $0x6b4] sm:$0xf0] }
  0xa0   :  { %2560 = vmatpush.bf16.msra.mxu2 %v7085_v43  ;;  %v6501_v43 = vor.u32 %v9390_v33, %v6498_v34  ;;  %v6473_v58 = vor.u32 %v9383_v47, %v6470_v48  ;;  %v7478_v33 = vld [vmem:[#allocation5 + $0x8ac] sm:$0xf0]  ;;  %v7257_v34 = vor.u32 %v9579_v22, %v7254_v24  ;;  %v7005_v48 = vor.u32 %v9516_v36, %v7002_v38  ;;  %v9551_v22 = vld [vmem:[#allocation5 + $0x5f4] sm:$0xf]  ;;  %v7114_v36 = vld [vmem:[#allocation5 + $0x5d4] sm:$0xf0] }
  0xa1   :  { %2535 = vmatpush.bf16.msrb.mxu3 %v6609_v51  ;;  %v9603_v51 = vld [vmem:[#allocation5 + $0x790] sm:$0xf0]  ;;  %v7702_v47 = vld [vmem:[#allocation5 + $0xa6c] sm:$0xf0] }
  0xa2   :  { %2548 = vmatpush.bf16.msra.mxu0 %v6833_v62  ;;  %2523 = vmatmul.bf16.vlgmr.msrb.gmra.mxu1 %v10400_v17  ;;  %v7337_v61 = vor.u32 %v9603_v51, %v7336_v50  ;;  %v9376_v62 = vld [vmem:[#allocation5 + $0x7c] sm:$0xf]  ;;  %v7450_v50 = vld [vmem:[#allocation5 + $0x874] sm:$0xf0] }
  0xa3   :  { %2567 = vmatpush.bf16.msra.mxu1 %v7477_v53  ;;  %v6725_v53 = vor.u32 %v9446_v44, %v6722_v45  ;;  %v6610_v44 = vld [vmem:[#allocation5 + $0x1e4] sm:$0xf0] }
  0xa4   :  { %2561 = vmatpush.bf16.msra.mxu2 %v7057_v63  ;;  %2536 = vmatmul.bf16.vlgmr.msrb.gmra.mxu3 %v10402_v21  ;;  %v6442_v63 = vld [vmem:[#allocation5 + $0x94] sm:$0xf0] }
  0xa5   :  { %2580 = vmatpush.bf16.msra.mxu3 %v7701_v59  ;;  %2549 = vmatmul.bf16.vlgmr.msra.gmra.mxu0 %v10394_v55  ;;  %v9439_v59 = vld [vmem:[#allocation5 + $0x274] sm:$0xf] }
  0xa6   :  { %2600 = vmatpush.bf16.msrb.mxu0 %v7729_v3  ;;  %v6697_v3 = vor.u32 %v9439_v59, %v6694_v60  ;;  %v9565_v59 = vld [vmem:[#allocation5 + $0x664] sm:$0xf]  ;;  %v7198_v60 = vld [vmem:[#allocation5 + $0x67c] sm:$0xf0] }
  0xa7   :  { %2568 = vmatpush.bf16.msra.mxu1 %v7449_v6  ;;  %2562 = vmatmul.bf16.vlgmr.msra.gmra.mxu2 %v10396_v56  ;;  %v6445_v6 = vor.u32 %v9376_v62, %v6442_v63  ;;  %v9684_v62 = vld [vmem:[#allocation5 + $0xa1c] sm:$0xf]  ;;  %v7674_v63 = vld [vmem:[#allocation5 + $0xa34] sm:$0xf0] }
  0xa8   :  { %2606 = vmatpush.bf16.msrb.mxu2 %v6585_v2  ;;  %v9596_v2 = vld [vmem:[#allocation5 + $0x758] sm:$0xf0] }
  0xa9   :  { %2581 = vmatpush.bf16.msra.mxu3 %v7673_v9  ;;  %v7309_v9 = vor.u32 %v9596_v2, %v7308_v1  ;;  %v9621_v1 = vld [vmem:[#allocation5 + $0x824] sm:$0xf]  ;;  %v7422_v2 = vld [vmem:[#allocation5 + $0x83c] sm:$0xf0] }
  0xaa   :  { %2619 = vmatpush.bf16.msra.mxu0 %v6809_v12  ;;  %v7280_v12 = vld [vmem:[#allocation5 + $0x708] sm:$0xf] }
  0xab   :  { %2569 = vmatpush.bf16.msra.mxu1 %v7421_v19  ;;  %v9523_v19 = vld [vmem:[#allocation5 + $0x514] sm:$0xf]  ;;  %v7281_v27 = vor.u32 %v9589_v14, %v7280_v12  ;;  %v6949_v12 = vor.u32 %v9502_v4, %v6946_v5  ;;  %v7394_v14 = vld [vmem:[#allocation5 + $0x804] sm:$0xf0]  ;;  %v9530_v5 = vld [vmem:[#allocation5 + $0x54c] sm:$0xf] }
  0xac   :  { %2607 = vmatpush.bf16.msrb.mxu2 %v6557_v15  ;;  %v7504_v15 = vld [vmem:[#allocation5 + $0x8c8] sm:$0xf]  ;;  %v7033_v31 = vor.u32 %v9523_v19, %v7030_v20  ;;  %v10434_v19 = vld [vmem:[#allocation7] sm:$0x7f] }
  0xad   :  { %2582 = vmatpush.bf16.msra.mxu3 %v7645_v23  ;;  %v6417_v23 = vor.u32 %v9369_v10, %v6414_v11  ;;  %v7505_v30 = vor.u32 %v9645_v16, %v7504_v15  ;;  %v9677_v10 = vld [vmem:[#allocation5 + $0x9e4] sm:$0xf]  ;;  %v7646_v11 = vld [vmem:[#allocation5 + $0x9fc] sm:$0xf0]  ;;  %v7173_v15 = vor.u32 %v9558_v7, %v7170_v8  ;;  %v9495_v16 = vld [vmem:[#allocation5 + $0x434] sm:$0xf] }
  0xae   :  { %2620 = vmatpush.bf16.msra.mxu0 %v6781_v26  ;;  %v6638_v26 = vld [vmem:[#allocation5 + $0x21c] sm:$0xf0]  ;;  %v7649_v20 = vor.u32 %v9677_v10, %v7646_v11  ;;  %v6834_v4 = vld [vmem:[#allocation5 + $0x3a4] sm:$0xf0]  ;;  %v9698_v10 = vld [vmem:[#allocation5 + $0xa8c] sm:$0xf] }
  0xaf   :  { %2570 = vmatpush.bf16.msra.mxu1 %v7393_v32  ;;  %v9635_v32 = vld [vmem:[#allocation5 + $0x894] sm:$0xf]  ;;  %v7730_v11 = vld [vmem:[#allocation5 + $0xaa4] sm:$0xf0] }
  0xb0   :  { %2608 = vmatpush.bf16.msrb.mxu2 %v6529_v29  ;;  %v6386_v29 = vld [vmem:[#allocation5 + $0x24] sm:$0xf0]  ;;  %v7481_v45 = vor.u32 %v9635_v32, %v7478_v33  ;;  %v9488_v32 = vld [vmem:[#allocation5 + $0x3fc] sm:$0xf]  ;;  %v6890_v33 = vld [vmem:[#allocation5 + $0x414] sm:$0xf0] }
  0xb1   :  { %2583 = vmatpush.bf16.msra.mxu3 %v7617_v35  ;;  %v6641_v35 = vor.u32 %v9425_v25, %v6638_v26  ;;  %v6389_v40 = vor.u32 %v9362_v28, %v6386_v29  ;;  %v9670_v25 = vld [vmem:[#allocation5 + $0x9ac] sm:$0xf]  ;;  %v7618_v26 = vld [vmem:[#allocation5 + $0x9c4] sm:$0xf0]  ;;  %v9607_v28 = vld [vmem:[#allocation5 + $0x7b4] sm:$0xf] }
  0xb2   :  { %2621 = vmatpush.bf16.msra.mxu0 %v6753_v39  ;;  %v9572_v39 = vld [vmem:[#allocation5 + $0x69c] sm:$0xf]  ;;  %v7366_v29 = vld [vmem:[#allocation5 + $0x7cc] sm:$0xf0] }
  0xb3   :  { %2571 = vmatpush.bf16.msra.mxu1 %v7365_v46  ;;  %v9691_v46 = vld [vmem:[#allocation5 + $0xa54] sm:$0xf]  ;;  %v7229_v51 = vor.u32 %v9572_v39, %v7226_v42  ;;  %v7369_v38 = vor.u32 %v9607_v28, %v7366_v29 }
  0xb4   :  { %2609 = vmatpush.bf16.msrb.mxu2 %v6501_v43  ;;  %v9418_v43 = vld [vmem:[#allocation5 + $0x1cc] sm:$0xf]  ;;  %v9663_v39 = vld [vmem:[#allocation5 + $0x974] sm:$0xf] }
  0xb5   :  { %2584 = vmatpush.bf16.msra.mxu3 %v7589_v49  ;;  %7748 = vmatmul.msk.bf16.vlgmr.msrb.gmra.mxu0 %vm2329_vm0, %v10406_v52  ;;  %v9628_v49 = vld [vmem:[#allocation5 + $0x85c] sm:$0xf] }
  0xb6   :  { %2622 = vmatpush.bf16.msra.mxu0 %v6725_v53  ;;  %v6613_v53 = vor.u32 %v9418_v43, %v6610_v44  ;;  %v6893_v43 = vor.u32 %v9488_v32, %v6890_v33  ;;  %v9600_v44 = vld [vmem:[#allocation5 + $0x77c] sm:$0xf]  ;;  %v7036_v32 = vld [vmem:[#allocation5 + $0x518] sm:$0xf]  ;;  %v9527_v33 = vld [vmem:[#allocation5 + $0x530] sm:$0xf0] }
  0xb7   :  { %2572 = vmatpush.bf16.msra.mxu1 %v7337_v61  ;;  %v7453_v61 = vor.u32 %v9628_v49, %v7450_v50  ;;  %v6862_v49 = vld [vmem:[#allocation5 + $0x3dc] sm:$0xf0] }
  0xb8   :  { %2610 = vmatpush.bf16.msrb.mxu2 %v6473_v58  ;;  %v7705_v58 = vor.u32 %v9691_v46, %v7702_v47 }
  0xb9   :  { %2585 = vmatpush.bf16.msra.mxu3 %v7561_v0  ;;  %v6977_v0 = vor.u32 %v9509_v54, %v6974_v57  ;;  %v9537_v54 = vld [vmem:[#allocation5 + $0x584] sm:$0xf]  ;;  %v7086_v57 = vld [vmem:[#allocation5 + $0x59c] sm:$0xf0] }
  0xba   :  { %2623 = vmatpush.bf16.msra.mxu0 %v6697_v3  ;;  %v7201_v3 = vor.u32 %v9565_v59, %v7198_v60  ;;  %v9656_v60 = vld [vmem:[#allocation5 + $0x93c] sm:$0xf] }
  0xbb   :  { %2573 = vmatpush.bf16.msra.mxu1 %v7309_v9  ;;  %v7425_v9 = vor.u32 %v9621_v1, %v7422_v2  ;;  %v7310_v1 = vld [vmem:[#allocation5 + $0x75c] sm:$0xf0]  ;;  %v9474_v2 = vld [vmem:[#allocation5 + $0x38c] sm:$0xf] }
  0xbc   :  { %2611 = vmatpush.bf16.msrb.mxu2 %v6445_v6  ;;  %v7677_v6 = vor.u32 %v9684_v62, %v7674_v63 }
  0xbd   :  { %2586 = vmatpush.bf16.msra.mxu3 %v7533_v13  ;;  %v9614_v13 = vld [vmem:[#allocation5 + $0x7ec] sm:$0xf] }
  0xbe   :  { %2624 = vmatpush.bf16.msra.mxu0 %v6669_v18  ;;  %v6918_v18 = vld [vmem:[#allocation5 + $0x44c] sm:$0xf0]  ;;  %v7397_v24 = vor.u32 %v9614_v13, %v7394_v14  ;;  %v9415_v13 = vld [vmem:[#allocation5 + $0x1b0] sm:$0xf0]  ;;  %v9649_v14 = vld [vmem:[#allocation5 + $0x904] sm:$0xf] }
  0xbf   :  { %2574 = vmatpush.bf16.msra.mxu1 %v7281_v27  ;;  %v6921_v27 = vor.u32 %v9495_v16, %v6918_v18 }
  0xc0   :  { %2612 = vmatpush.bf16.msrb.mxu2 %v6417_v23  ;;  %v7142_v23 = vld [vmem:[#allocation5 + $0x60c] sm:$0xf0] }
  0xc1   :  { %2587 = vmatpush.bf16.msra.mxu3 %v7505_v30  ;;  %v527_v30 = vperm.slane %v10434_v19, 0 }
  0xc2   :  { %2625 = vmatpush.bf16.msra.mxu0 %v6641_v35  ;;  %2575 = vmatmul.bf16.vlgmr.msra.gmra.mxu1 %v10410_v37  ;;  %v9544_v35 = vld [vmem:[#allocation5 + $0x5bc] sm:$0xf]  ;;  %v2342_v42 = vpop.f32.mrf.mxu0 }
  0xc3   :  { %2632 = vmatpush.bf16.msrb.mxu1 %v7033_v31  ;;  %v7145_v31 = vor.u32 %v9551_v22, %v7142_v23  ;;  %v2343_v46 = vadd.f32 %v2342_v42, %v527_v30  ;;  %v7117_v47 = vor.u32 %v9544_v35, %v7114_v36  ;;  %v9586_v22 = vld [vmem:[#allocation5 + $0x70c] sm:$0xf]  ;;  %v7282_v23 = vld [vmem:[#allocation5 + $0x724] sm:$0xf0]  ;;  %v6560_v36 = vld [vmem:[#allocation5 + $0x160] sm:$0xf] }
  0xc4   :  { %2613 = vmatpush.bf16.msrb.mxu2 %v6389_v40  ;;  %2588 = vmatmul.bf16.vlgmr.msra.gmra.mxu3 %v10412_v41  ;;  %v7590_v40 = vld [vmem:[#allocation5 + $0x98c] sm:$0xf0]  ;;  %v7285_v35 = vor.u32 %v9586_v22, %v7282_v23  ;;  %v7506_v42 = vld [vmem:[#allocation5 + $0x8e4] sm:$0xf0]  ;;  %v9387_v22 = vld [vmem:[#allocation5 + $0xd0] sm:$0xf0] }
  0xc5   :  { %2645 = vmatpush.bf16.msrb.mxu3 %v7257_v34  ;;  %v7621_v34 = vor.u32 %v9670_v25, %v7618_v26  ;;  %v7733_v25 = vor.u32 %v9698_v10, %v7730_v11  ;;  %v6812_v26 = vld [vmem:[#allocation5 + $0x358] sm:$0xf]  ;;  %v9569_v10 = vld [vmem:[#allocation5 + $0x680] sm:$0xf0]  ;;  %v6728_v11 = vld [vmem:[#allocation5 + $0x2b0] sm:$0xf] }
  0xc6   :  { %2626 = vmatpush.bf16.msra.mxu0 %v6613_v53  ;;  %v2368_v50 = vpop.f32.mrf.mxu2  ;;  %v7593_v53 = vor.u32 %v9663_v39, %v7590_v40  ;;  %v9642_v40 = vld [vmem:[#allocation5 + $0x8cc] sm:$0xf] }
  0xc7   :  { %2633 = vmatpush.bf16.msrb.mxu1 %v7005_v48  ;;  %2614 = vmatmul.bf16.vlgmr.msrb.gmra.mxu2 %v10400_v17  ;;  %v9481_v48 = vld [vmem:[#allocation5 + $0x3c4] sm:$0xf] }
  0xc8   :  { %2658 = vmatpush.bf16.msra.mxu2 %v7481_v45  ;;  %v7338_v45 = vld [vmem:[#allocation5 + $0x794] sm:$0xf0]  ;;  %v6865_v63 = vor.u32 %v9481_v48, %v6862_v49  ;;  %v7008_v49 = vld [vmem:[#allocation5 + $0x4e0] sm:$0xf] }
  0xc9   :  { %2646 = vmatpush.bf16.msrb.mxu3 %v7229_v51  ;;  %2627 = vmatmul.bf16.vlgmr.msra.gmra.mxu0 %v10402_v21  ;;  %v2381_v51 = vpop.f32.mrf.mxu3  ;;  %v7341_v59 = vor.u32 %v9600_v44, %v7338_v45  ;;  %v7037_v44 = vor.u32 %v9527_v33, %v7036_v32  ;;  %v9583_v45 = vld [vmem:[#allocation5 + $0x6f0] sm:$0xf0] }
  0xca   :  { %2671 = vmatpush.bf16.msrb.mxu0 %v7705_v58  ;;  %v2355_v58 = vpop.f32.mrf.mxu1  ;;  %v2344_v16 = vpop.f32.mrf.mxu0 }
  0xcb   :  { %2634 = vmatpush.bf16.msrb.mxu1 %v6977_v0  ;;  %v2356_v62 = vadd.f32 %v2355_v58, %v2343_v46  ;;  %v9593_v0 = vld [vmem:[#allocation5 + $0x744] sm:$0xf]  ;;  %v6784_v46 = vld [vmem:[#allocation5 + $0x320] sm:$0xf] }
  0xcc   :  { %2659 = vmatpush.bf16.msra.mxu2 %v7453_v61  ;;  %v7562_v61 = vld [vmem:[#allocation5 + $0x954] sm:$0xf0] }
  0xcd   :  { %2647 = vmatpush.bf16.msrb.mxu3 %v7201_v3  ;;  %v7089_v3 = vor.u32 %v9537_v54, %v7086_v57  ;;  %v2369_v7 = vadd.f32 %v2368_v50, %v2356_v62  ;;  %v7565_v8 = vor.u32 %v9656_v60, %v7562_v61  ;;  %v9520_v50 = vld [vmem:[#allocation5 + $0x4f8] sm:$0xf0]  ;;  %v9401_v54 = vld [vmem:[#allocation5 + $0x140] sm:$0xf0]  ;;  %v6756_v62 = vld [vmem:[#allocation5 + $0x2e8] sm:$0xf] }
  0xce   :  { %2672 = vmatpush.bf16.msrb.mxu0 %v7677_v6  ;;  %v7058_v6 = vld [vmem:[#allocation5 + $0x564] sm:$0xf0]  ;;  %v2370_v28 = vpop.f32.mrf.mxu2  ;;  %v7009_v60 = vor.u32 %v9520_v50, %v7008_v49  ;;  %v9576_v61 = vld [vmem:[#allocation5 + $0x6b8] sm:$0xf0]  ;;  %v6896_v50 = vld [vmem:[#allocation5 + $0x400] sm:$0xf] }
  0xcf   :  { %2635 = vmatpush.bf16.msrb.mxu1 %v6949_v12  ;;  %v7313_v12 = vor.u32 %v9593_v0, %v7310_v1  ;;  %v10437_v18 = vadd.f32 %v2381_v51, %v2369_v7  ;;  %v7509_v51 = vor.u32 %v9642_v40, %v7506_v42 }
  0xd0   :  { %2660 = vmatpush.bf16.msra.mxu2 %v7425_v9  ;;  %v6588_v9 = vld [vmem:[#allocation5 + $0x198] sm:$0xf] }
  0xd1   :  { %2648 = vmatpush.bf16.msrb.mxu3 %v7173_v15  ;;  %v7534_v15 = vld [vmem:[#allocation5 + $0x91c] sm:$0xf0]  ;;  %v2383_v29 = vpop.f32.mrf.mxu3  ;;  %v6589_v30 = vor.u32 %v9415_v13, %v6588_v9 }
  0xd2   :  { %2673 = vmatpush.bf16.msrb.mxu0 %v7649_v20  ;;  %v6837_v20 = vor.u32 %v9474_v2, %v6834_v4  ;;  %v6980_v2 = vld [vmem:[#allocation5 + $0x4a8] sm:$0xf]  ;;  %v6504_v4 = vld [vmem:[#allocation5 + $0xf0] sm:$0xf]  ;;  %v9562_v29 = vld [vmem:[#allocation5 + $0x648] sm:$0xf0] }
  0xd3   :  { %2636 = vmatpush.bf16.msrb.mxu1 %v6921_v27  ;;  %v9471_v27 = vld [vmem:[#allocation5 + $0x370] sm:$0xf0] }
  0xd4   :  { %2661 = vmatpush.bf16.msra.mxu2 %v7397_v24  ;;  %v7061_v24 = vor.u32 %v9530_v5, %v7058_v6  ;;  %v6813_v39 = vor.u32 %v9471_v27, %v6812_v26  ;;  %v9394_v5 = vld [vmem:[#allocation5 + $0x108] sm:$0xf0]  ;;  %v7176_v27 = vld [vmem:[#allocation5 + $0x630] sm:$0xf] }
  0xd5   :  { %2649 = vmatpush.bf16.msrb.mxu3 %v7145_v31  ;;  %v7537_v31 = vor.u32 %v9649_v14, %v7534_v15  ;;  %v6505_v13 = vor.u32 %v9394_v5, %v6504_v4  ;;  %v6952_v14 = vld [vmem:[#allocation5 + $0x470] sm:$0xf]  ;;  %v9506_v15 = vld [vmem:[#allocation5 + $0x488] sm:$0xf0]  ;;  %v7177_v40 = vor.u32 %v9562_v29, %v7176_v27  ;;  %v7708_v27 = vld [vmem:[#allocation5 + $0xa58] sm:$0xf] }
  0xd6   :  { %2674 = vmatpush.bf16.msrb.mxu0 %v7621_v34  ;;  %v2357_v34 = vpop.f32.mrf.mxu1  ;;  %v2420_v0 = vpop.f32.mrf.mxu2  ;;  %v6953_v28 = vor.u32 %v9506_v15, %v6952_v14  ;;  %v9639_v14 = vld [vmem:[#allocation5 + $0x8b0] sm:$0xf0]  ;;  %v7092_v15 = vld [vmem:[#allocation5 + $0x588] sm:$0xf] }
  0xd7   :  { %2637 = vmatpush.bf16.msrb.mxu1 %v6893_v43  ;;  %v7260_v43 = vld [vmem:[#allocation5 + $0x6d8] sm:$0xf] }
  0xd8   :  { %2662 = vmatpush.bf16.msra.mxu2 %v7369_v38  ;;  %v9408_v38 = vld [vmem:[#allocation5 + $0x178] sm:$0xf0]  ;;  %v7261_v57 = vor.u32 %v9583_v45, %v7260_v43  ;;  %v7148_v43 = vld [vmem:[#allocation5 + $0x5f8] sm:$0xf] }
  0xd9   :  { %2650 = vmatpush.bf16.msrb.mxu3 %v7117_v47  ;;  %v9464_v47 = vld [vmem:[#allocation5 + $0x338] sm:$0xf0]  ;;  %v6561_v48 = vor.u32 %v9408_v38, %v6560_v36  ;;  %v9499_v36 = vld [vmem:[#allocation5 + $0x450] sm:$0xf0]  ;;  %v6448_v38 = vld [vmem:[#allocation5 + $0x80] sm:$0xf] }
  0xda   :  { %2675 = vmatpush.bf16.msrb.mxu0 %v7593_v53  ;;  %v6532_v53 = vld [vmem:[#allocation5 + $0x128] sm:$0xf]  ;;  %v6785_v58 = vor.u32 %v9464_v47, %v6784_v46  ;;  %v9555_v46 = vld [vmem:[#allocation5 + $0x610] sm:$0xf0]  ;;  %v6672_v47 = vld [vmem:[#allocation5 + $0x240] sm:$0xf] }
  0xdb   :  { %2638 = vmatpush.bf16.msrb.mxu1 %v6865_v63  ;;  %v9457_v63 = vld [vmem:[#allocation5 + $0x300] sm:$0xf0]  ;;  %v6533_v1 = vor.u32 %v9401_v54, %v6532_v53  ;;  %v6420_v53 = vld [vmem:[#allocation5 + $0x48] sm:$0xf] }
  0xdc   :  { %2663 = vmatpush.bf16.msra.mxu2 %v7341_v59  ;;  %v7232_v59 = vld [vmem:[#allocation5 + $0x6a0] sm:$0xf]  ;;  %v6757_v7 = vor.u32 %v9457_v63, %v6756_v62  ;;  %v9373_v54 = vld [vmem:[#allocation5 + $0x60] sm:$0xf0] }
  0xdd   :  { %2651 = vmatpush.bf16.msrb.mxu3 %v7089_v3  ;;  %v9513_v3 = vld [vmem:[#allocation5 + $0x4c0] sm:$0xf0]  ;;  %v7233_v6 = vor.u32 %v9576_v61, %v7232_v59  ;;  %v7149_v59 = vor.u32 %v9555_v46, %v7148_v43  ;;  %v7120_v61 = vld [vmem:[#allocation5 + $0x5c0] sm:$0xf]  ;;  %v6421_v5 = vor.u32 %v9373_v54, %v6420_v53  ;;  %v9412_v43 = vld [vmem:[#allocation5 + $0x19c] sm:$0xf] }
  0xde   :  { %2676 = vmatpush.bf16.msrb.mxu0 %v7565_v8  ;;  %v7204_v8 = vld [vmem:[#allocation5 + $0x668] sm:$0xf]  ;;  %v6981_v9 = vor.u32 %v9513_v3, %v6980_v2  ;;  %v2394_v16 = vpop.f32.mrf.mxu0  ;;  %v2422_v32 = vpop.f32.mrf.mxu2  ;;  %v9429_v3 = vld [vmem:[#allocation5 + $0x220] sm:$0xf0]  ;;  %v6590_v46 = vld [vmem:[#allocation5 + $0x1b4] sm:$0xf0] }
  0xdf   :  { %2639 = vmatpush.bf16.msrb.mxu1 %v6837_v20  ;;  %v6476_v20 = vld [vmem:[#allocation5 + $0xb8] sm:$0xf]  ;;  %v7205_v23 = vor.u32 %v9569_v10, %v7204_v8  ;;  %v2407_v26 = vpop.f32.mrf.mxu1  ;;  %v6644_v2 = vld [vmem:[#allocation5 + $0x208] sm:$0xf]  ;;  %v9366_v10 = vld [vmem:[#allocation5 + $0x28] sm:$0xf0] }
  0xe0   :  { %2664 = vmatpush.bf16.msra.mxu2 %v7313_v12  ;;  %v9450_v12 = vld [vmem:[#allocation5 + $0x2c8] sm:$0xf0]  ;;  %v6477_v33 = vor.u32 %v9387_v22, %v6476_v20  ;;  %v6616_v22 = vld [vmem:[#allocation5 + $0x1d0] sm:$0xf]  ;;  %v7428_v54 = vld [vmem:[#allocation5 + $0x828] sm:$0xf] }
  0xe1   :  { %2652 = vmatpush.bf16.msrb.mxu3 %v7061_v24  ;;  %v2395_v24 = vadd.f32 %v2394_v16, %v10437_v18  ;;  %v9541_v16 = vld [vmem:[#allocation5 + $0x5a0] sm:$0xf0] }
  0xe2   :  { %2677 = vmatpush.bf16.msrb.mxu0 %v7537_v31  ;;  %2640 = vmatmul.bf16.vlgmr.msrb.gmra.mxu1 %v10394_v55  ;;  %v9443_v31 = vld [vmem:[#allocation5 + $0x290] sm:$0xf0] }
  0xe3   :  { %2691 = vmatpush.bf16.msra.mxu1 %v7733_v25  ;;  %v6729_v25 = vor.u32 %v9450_v12, %v6728_v11  ;;  %v2408_v34 = vadd.f32 %v2407_v26, %v2395_v24  ;;  %v7484_v11 = vld [vmem:[#allocation5 + $0x898] sm:$0xf]  ;;  %v6840_v24 = vld [vmem:[#allocation5 + $0x390] sm:$0xf]  ;;  %v9478_v26 = vld [vmem:[#allocation5 + $0x3a8] sm:$0xf0] }
  0xe4   :  { %2665 = vmatpush.bf16.msra.mxu2 %v7285_v35  ;;  %2653 = vmatmul.bf16.vlgmr.msrb.gmra.mxu3 %v10396_v56  ;;  %v6924_v35 = vld [vmem:[#allocation5 + $0x438] sm:$0xf]  ;;  %v7485_v29 = vor.u32 %v9639_v14, %v7484_v11  ;;  %v6534_v11 = vld [vmem:[#allocation5 + $0x144] sm:$0xf0] }
  0xe5   :  { %2697 = vmatpush.bf16.msra.mxu3 %v6589_v30  ;;  %v6700_v30 = vld [vmem:[#allocation5 + $0x278] sm:$0xf]  ;;  %v10444_v18 = vadd.f32 %v2420_v0, %v2408_v34  ;;  %v6925_v45 = vor.u32 %v9499_v36, %v6924_v35  ;;  %v7456_v35 = vld [vmem:[#allocation5 + $0x860] sm:$0xf]  ;;  %v9632_v36 = vld [vmem:[#allocation5 + $0x878] sm:$0xf0] }
  0xe6   :  { %2678 = vmatpush.bf16.msrb.mxu0 %v7509_v51  ;;  %v6701_v42 = vor.u32 %v9443_v31, %v6700_v30  ;;  %v9492_v51 = vld [vmem:[#allocation5 + $0x418] sm:$0xf0]  ;;  %v7736_v30 = vld [vmem:[#allocation5 + $0xa90] sm:$0xf]  ;;  %v9702_v31 = vld [vmem:[#allocation5 + $0xaa8] sm:$0xf0] }
  0xe7   :  { %2710 = vmatpush.bf16.msrb.mxu1 %v6813_v39  ;;  %2666 = vmatmul.bf16.vlgmr.msra.gmra.mxu2 %v10410_v37  ;;  %v9380_v39 = vld [vmem:[#allocation5 + $0x98] sm:$0xf0]  ;;  %v2409_v63 = vpop.f32.mrf.mxu1  ;;  %v6897_v0 = vor.u32 %v9492_v51, %v6896_v50  ;;  %v7680_v50 = vld [vmem:[#allocation5 + $0xa20] sm:$0xf] }
  0xe8   :  { %2723 = vmatpush.bf16.msrb.mxu2 %v7037_v44  ;;  %v528_v44 = vperm.slane %v10434_v19, 1  ;;  %v6449_v49 = vor.u32 %v9380_v39, %v6448_v38  ;;  %v6841_v38 = vor.u32 %v9478_v26, %v6840_v24  ;;  %v9688_v51 = vld [vmem:[#allocation5 + $0xa38] sm:$0xf0]  ;;  %v9461_v63 = vld [vmem:[#allocation5 + $0x324] sm:$0xf] }
  0xe9   :  { %2698 = vmatpush.bf16.msra.mxu3 %v6561_v48  ;;  %2679 = vmatmul.bf16.vlgmr.msrb.gmra.mxu0 %v10412_v41  ;;  %v9436_v48 = vld [vmem:[#allocation5 + $0x258] sm:$0xf0]  ;;  %v9391_v26 = vld [vmem:[#allocation5 + $0xf4] sm:$0xf] }
  0xea   :  { %2736 = vmatpush.bf16.msra.mxu0 %v7261_v57  ;;  %v2396_v57 = vpop.f32.mrf.mxu0  ;;  %v2446_v4 = vpop.f32.mrf.mxu2 }
  0xeb   :  { %2711 = vmatpush.bf16.msrb.mxu1 %v6785_v58  ;;  %v2433_v58 = vpop.f32.mrf.mxu3  ;;  %v9625_v57 = vld [vmem:[#allocation5 + $0x840] sm:$0xf0] }
  0xec   :  { %2724 = vmatpush.bf16.msrb.mxu2 %v7009_v60  ;;  %v6673_v60 = vor.u32 %v9436_v48, %v6672_v47  ;;  %v2434_v62 = vadd.f32 %v2433_v58, %v528_v44  ;;  %v9468_v47 = vld [vmem:[#allocation5 + $0x35c] sm:$0xf]  ;;  %v6814_v48 = vld [vmem:[#allocation5 + $0x374] sm:$0xf0]  ;;  %v6593_v58 = vor.u32 %v9412_v43, %v6590_v46 }
  0xed   :  { %2699 = vmatpush.bf16.msra.mxu3 %v6533_v1  ;;  %v9548_v1 = vld [vmem:[#allocation5 + $0x5d8] sm:$0xf0]  ;;  %v6702_v46 = vld [vmem:[#allocation5 + $0x294] sm:$0xf0] }
  0xee   :  { %2737 = vmatpush.bf16.msra.mxu0 %v7233_v6  ;;  %v6868_v6 = vld [vmem:[#allocation5 + $0x3c8] sm:$0xf]  ;;  %v10449_v8 = vadd.f32 %v2446_v4, %v2434_v62  ;;  %v7121_v12 = vor.u32 %v9548_v1, %v7120_v61  ;;  %v7681_v61 = vor.u32 %v9688_v51, %v7680_v50  ;;  %v6562_v62 = vld [vmem:[#allocation5 + $0x17c] sm:$0xf0]  ;;  %v7429_v1 = vor.u32 %v9625_v57, %v7428_v54  ;;  %v7400_v4 = vld [vmem:[#allocation5 + $0x7f0] sm:$0xf] }
  0xef   :  { %2712 = vmatpush.bf16.msrb.mxu1 %v6757_v7  ;;  %v9485_v7 = vld [vmem:[#allocation5 + $0x3e0] sm:$0xf0]  ;;  %v7316_v50 = vld [vmem:[#allocation5 + $0x748] sm:$0xf] }
  0xf0   :  { %2725 = vmatpush.bf16.msrb.mxu2 %v6981_v9  ;;  %v6392_v9 = vld [vmem:[#allocation5 + $0x10] sm:$0xf]  ;;  %v6869_v20 = vor.u32 %v9485_v7, %v6868_v6  ;;  %v9597_v51 = vld [vmem:[#allocation5 + $0x760] sm:$0xf0] }
  0xf1   :  { %2700 = vmatpush.bf16.msra.mxu3 %v6505_v13  ;;  %v6645_v13 = vor.u32 %v9429_v3, %v6644_v2  ;;  %v7652_v2 = vld [vmem:[#allocation5 + $0x9e8] sm:$0xf]  ;;  %v9681_v3 = vld [vmem:[#allocation5 + $0xa00] sm:$0xf0] }
  0xf2   :  { %2738 = vmatpush.bf16.msra.mxu0 %v7205_v23  ;;  %7749 = vmatmul.msk.bf16.vlgmr.msra.gmra.mxu1 %vm2329_vm0, %v10406_v52  ;;  %v9422_v23 = vld [vmem:[#allocation5 + $0x1e8] sm:$0xf0]  ;;  %v2448_v44 = vpop.f32.mrf.mxu2 }
  0xf3   :  { %2713 = vmatpush.bf16.msrb.mxu1 %v6729_v25  ;;  %v6393_v25 = vor.u32 %v9366_v10, %v6392_v9  ;;  %v2435_v32 = vpop.f32.mrf.mxu3  ;;  %v6617_v34 = vor.u32 %v9422_v23, %v6616_v22  ;;  %v9398_v9 = vld [vmem:[#allocation5 + $0x12c] sm:$0xf]  ;;  %v7653_v10 = vor.u32 %v9681_v3, %v7652_v2  ;;  %v9611_v22 = vld [vmem:[#allocation5 + $0x7d0] sm:$0xf0]  ;;  %v6478_v44 = vld [vmem:[#allocation5 + $0xd4] sm:$0xf0]  ;;  %v7317_v2 = vor.u32 %v9597_v51, %v7316_v50 }
  0xf4   :  { %2726 = vmatpush.bf16.msrb.mxu2 %v6953_v28  ;;  %v9695_v28 = vld [vmem:[#allocation5 + $0xa70] sm:$0xf0]  ;;  %v6537_v24 = vor.u32 %v9398_v9, %v6534_v11  ;;  %v7540_v3 = vld [vmem:[#allocation5 + $0x908] sm:$0xf]  ;;  %v9524_v11 = vld [vmem:[#allocation5 + $0x51c] sm:$0xf] }
  0xf5   :  { %2701 = vmatpush.bf16.msra.mxu3 %v6477_v33  ;;  %v7093_v33 = vor.u32 %v9541_v16, %v7092_v15  ;;  %v7709_v39 = vor.u32 %v9695_v28, %v7708_v27  ;;  %v7624_v15 = vld [vmem:[#allocation5 + $0x9b0] sm:$0xf]  ;;  %v9674_v16 = vld [vmem:[#allocation5 + $0x9c8] sm:$0xf0]  ;;  %v7234_v50 = vld [vmem:[#allocation5 + $0x6bc] sm:$0xf0] }
  0xf6   :  { %2739 = vmatpush.bf16.msra.mxu0 %v7177_v40  ;;  %v7064_v40 = vld [vmem:[#allocation5 + $0x550] sm:$0xf]  ;;  %v7625_v28 = vor.u32 %v9674_v16, %v7624_v15  ;;  %v6422_v16 = vld [vmem:[#allocation5 + $0x64] sm:$0xf0] }
  0xf7   :  { %2714 = vmatpush.bf16.msrb.mxu1 %v6701_v42  ;;  %v9534_v42 = vld [vmem:[#allocation5 + $0x568] sm:$0xf0] }
  0xf8   :  { %2727 = vmatpush.bf16.msrb.mxu2 %v6925_v45  ;;  %v7737_v45 = vor.u32 %v9702_v31, %v7736_v30  ;;  %v7065_v53 = vor.u32 %v9534_v42, %v7064_v40  ;;  %v9447_v30 = vld [vmem:[#allocation5 + $0x2b4] sm:$0xf]  ;;  %v6730_v31 = vld [vmem:[#allocation5 + $0x2cc] sm:$0xf0]  ;;  %v9384_v42 = vld [vmem:[#allocation5 + $0xbc] sm:$0xf] }
  0xf9   :  { %2702 = vmatpush.bf16.msra.mxu3 %v6449_v49  ;;  %v7457_v49 = vor.u32 %v9632_v36, %v7456_v35  ;;  %v7344_v35 = vld [vmem:[#allocation5 + $0x780] sm:$0xf]  ;;  %v9604_v36 = vld [vmem:[#allocation5 + $0x798] sm:$0xf0]  ;;  %v6481_v54 = vor.u32 %v9384_v42, %v6478_v44  ;;  %v6618_v42 = vld [vmem:[#allocation5 + $0x1ec] sm:$0xf0] }
  0xfa   :  { %2740 = vmatpush.bf16.msra.mxu0 %v7149_v59  ;;  %v6817_v59 = vor.u32 %v9468_v47, %v6814_v48  ;;  %v7345_v47 = vor.u32 %v9604_v36, %v7344_v35  ;;  %v7568_v48 = vld [vmem:[#allocation5 + $0x940] sm:$0xf]  ;;  %v6394_v35 = vld [vmem:[#allocation5 + $0x2c] sm:$0xf0] }
  0xfb   :  { %2715 = vmatpush.bf16.msrb.mxu1 %v6673_v60  ;;  %v9405_v60 = vld [vmem:[#allocation5 + $0x164] sm:$0xf] }
  0xfc   :  { %2728 = vmatpush.bf16.msrb.mxu2 %v6897_v0  ;;  %v6786_v0 = vld [vmem:[#allocation5 + $0x33c] sm:$0xf0]  ;;  %v6565_v6 = vor.u32 %v9405_v60, %v6562_v62 }
  0xfd   :  { %2703 = vmatpush.bf16.msra.mxu3 %v6421_v5  ;;  %v9618_v5 = vld [vmem:[#allocation5 + $0x808] sm:$0xf0]  ;;  %v6789_v7 = vor.u32 %v9461_v63, %v6786_v0  ;;  %v6450_v63 = vld [vmem:[#allocation5 + $0x9c] sm:$0xf0]  ;;  %v9433_v0 = vld [vmem:[#allocation5 + $0x244] sm:$0xf] }
  0xfe   :  { %2741 = vmatpush.bf16.msra.mxu0 %v7121_v12  ;;  %v9454_v12 = vld [vmem:[#allocation5 + $0x2ec] sm:$0xf]  ;;  %v7401_v14 = vor.u32 %v9618_v5, %v7400_v4  ;;  %v2459_v23 = vpop.f32.mrf.mxu0  ;;  %v9653_v4 = vld [vmem:[#allocation5 + $0x920] sm:$0xf0] }
  0xff   :  { %2716 = vmatpush.bf16.msrb.mxu1 %v6645_v13  ;;  %v6758_v13 = vld [vmem:[#allocation5 + $0x304] sm:$0xf0]  ;;  %v2460_v27 = vadd.f32 %v2459_v23, %v10449_v8  ;;  %v2472_v40 = vpop.f32.mrf.mxu1  ;;  %v7541_v15 = vor.u32 %v9653_v4, %v7540_v3  ;;  %v9503_v4 = vld [vmem:[#allocation5 + $0x474] sm:$0xf] }
 0x100   :  { %2729 = vmatpush.bf16.msrb.mxu2 %v6869_v20  ;;  %v7372_v20 = vld [vmem:[#allocation5 + $0x7b8] sm:$0xf]  ;;  %v7206_v3 = vld [vmem:[#allocation5 + $0x684] sm:$0xf0] }
 0x101   :  { %2704 = vmatpush.bf16.msra.mxu3 %v6393_v25  ;;  %v6761_v25 = vor.u32 %v9454_v12, %v6758_v13  ;;  %v7373_v32 = vor.u32 %v9611_v22, %v7372_v20  ;;  %v2473_v8 = vadd.f32 %v2472_v40, %v2460_v27  ;;  %v7038_v12 = vld [vmem:[#allocation5 + $0x534] sm:$0xf0]  ;;  %v9370_v13 = vld [vmem:[#allocation5 + $0x4c] sm:$0xf]  ;;  %v6646_v22 = vld [vmem:[#allocation5 + $0x224] sm:$0xf0] }
 0x102   :  { %2742 = vmatpush.bf16.msra.mxu0 %v7093_v33  ;;  %v7596_v33 = vld [vmem:[#allocation5 + $0x978] sm:$0xf]  ;;  %v9426_v20 = vld [vmem:[#allocation5 + $0x20c] sm:$0xf]  ;;  %v9580_v27 = vld [vmem:[#allocation5 + $0x6dc] sm:$0xf] }
 0x103   :  { %2717 = vmatpush.bf16.msrb.mxu1 %v6617_v34  ;;  %v9667_v34 = vld [vmem:[#allocation5 + $0x990] sm:$0xf0] }
 0x104   :  { %2730 = vmatpush.bf16.msrb.mxu2 %v6841_v38  ;;  %2705 = vmatmul.bf16.vlgmr.msra.gmra.mxu3 %v10400_v17  ;;  %v7597_v43 = vor.u32 %v9667_v34, %v7596_v33  ;;  %v7010_v33 = vld [vmem:[#allocation5 + $0x4fc] sm:$0xf0]  ;;  %v9363_v34 = vld [vmem:[#allocation5 + $0x14] sm:$0xf] }
 0x105   :  { %2749 = vmatpush.bf16.msrb.mxu3 %v7485_v29  ;;  %v6506_v29 = vld [vmem:[#allocation5 + $0x10c] sm:$0xf0]  ;;  %v9419_v40 = vld [vmem:[#allocation5 + $0x1d4] sm:$0xf]  ;;  %v6397_v51 = vor.u32 %v9363_v34, %v6394_v35  ;;  %v7150_v34 = vld [vmem:[#allocation5 + $0x614] sm:$0xf0] }
 0x106   :  { %2718 = vmatmul.bf16.vlgmr.msrb.gmra.mxu1 %v10402_v21  ;;  %2743 = vmatpush.bf16.msra.mxu0 %v7065_v53  ;;  %v6509_v38 = vor.u32 %v9391_v26, %v6506_v29  ;;  %v2461_v53 = vpop.f32.mrf.mxu0  ;;  %v7041_v26 = vor.u32 %v9524_v11, %v7038_v12  ;;  %v9517_v29 = vld [vmem:[#allocation5 + $0x4e4] sm:$0xf]  ;;  %v7430_v12 = vld [vmem:[#allocation5 + $0x844] sm:$0xf0] }
 0x107   :  { %2762 = vmatpush.bf16.msra.mxu1 %v7709_v39  ;;  %2731 = vmatmul.bf16.vlgmr.msrb.gmra.mxu2 %v10394_v55  ;;  %v6733_v39 = vor.u32 %v9447_v30, %v6730_v31  ;;  %v6425_v31 = vor.u32 %v9370_v13, %v6422_v16  ;;  %v6621_v53 = vor.u32 %v9419_v40, %v6618_v42  ;;  %v9678_v13 = vld [vmem:[#allocation5 + $0x9ec] sm:$0xf]  ;;  %v9559_v16 = vld [vmem:[#allocation5 + $0x634] sm:$0xf]  ;;  %v9489_v35 = vld [vmem:[#allocation5 + $0x404] sm:$0xf] }
 0x108   :  { %2782 = vmatpush.bf16.msra.mxu2 %v7737_v45  ;;  %v9440_v45 = vld [vmem:[#allocation5 + $0x27c] sm:$0xf] }
 0x109   :  { %2750 = vmatpush.bf16.msrb.mxu3 %v7457_v49  ;;  %2744 = vmatmul.bf16.vlgmr.msra.gmra.mxu0 %v10396_v56  ;;  %v9660_v49 = vld [vmem:[#allocation5 + $0x958] sm:$0xf0]  ;;  %v6705_v57 = vor.u32 %v9440_v45, %v6702_v46  ;;  %v7486_v45 = vld [vmem:[#allocation5 + $0x8b4] sm:$0xf0] }
 0x10a   :  { %2788 = vmatpush.bf16.msrb.mxu0 %v6593_v58  ;;  %v2485_v58 = vpop.f32.mrf.mxu3  ;;  %v2498_v62 = vpop.f32.mrf.mxu2  ;;  %v9692_v46 = vld [vmem:[#allocation5 + $0xa5c] sm:$0xf] }
 0x10b   :  { %2763 = vmatpush.bf16.msra.mxu1 %v7681_v61  ;;  %v2486_v60 = vadd.f32 %v2485_v58, %v2473_v8  ;;  %v7569_v61 = vor.u32 %v9660_v49, %v7568_v48  ;;  %v7013_v48 = vor.u32 %v9517_v29, %v7010_v33  ;;  %v9573_v49 = vld [vmem:[#allocation5 + $0x6a4] sm:$0xf]  ;;  %v9671_v29 = vld [vmem:[#allocation5 + $0x9b4] sm:$0xf]  ;;  %v9552_v33 = vld [vmem:[#allocation5 + $0x5fc] sm:$0xf] }
 0x10c   :  { %2801 = vmatpush.bf16.msrb.mxu2 %v6817_v59  ;;  %v9377_v59 = vld [vmem:[#allocation5 + $0x84] sm:$0xf] }
 0x10d   :  { %2751 = vmatpush.bf16.msrb.mxu3 %v7429_v1  ;;  %v6674_v1 = vld [vmem:[#allocation5 + $0x25c] sm:$0xf0]  ;;  %v2499_v5 = vadd.f32 %v2498_v62, %v2486_v60  ;;  %v6453_v9 = vor.u32 %v9377_v59, %v6450_v63  ;;  %v9629_v60 = vld [vmem:[#allocation5 + $0x864] sm:$0xf] }
 0x10e   :  { %2789 = vmatpush.bf16.msrb.mxu0 %v6565_v6  ;;  %v7288_v6 = vld [vmem:[#allocation5 + $0x710] sm:$0xf]  ;;  %v2511_v30 = vpop.f32.mrf.mxu0  ;;  %v7458_v62 = vld [vmem:[#allocation5 + $0x87c] sm:$0xf0]  ;;  %v9685_v63 = vld [vmem:[#allocation5 + $0xa24] sm:$0xf] }
 0x10f   :  { %2764 = vmatpush.bf16.msra.mxu1 %v7653_v10  ;;  %v6677_v10 = vor.u32 %v9433_v0, %v6674_v1  ;;  %v7682_v0 = vld [vmem:[#allocation5 + $0xa3c] sm:$0xf0] }
 0x110   :  { %2802 = vmatpush.bf16.msrb.mxu2 %v6789_v7  ;;  %v9590_v7 = vld [vmem:[#allocation5 + $0x728] sm:$0xf0] }
 0x111   :  { %2752 = vmatpush.bf16.msrb.mxu3 %v7401_v14  ;;  %v2474_v14 = vpop.f32.mrf.mxu1  ;;  %v7289_v23 = vor.u32 %v9590_v7, %v7288_v6  ;;  %v7461_v7 = vor.u32 %v9629_v60, %v7458_v62  ;;  %v9657_v62 = vld [vmem:[#allocation5 + $0x944] sm:$0xf] }
 0x112   :  { %2790 = vmatpush.bf16.msrb.mxu0 %v6537_v24  ;;  %v7512_v24 = vld [vmem:[#allocation5 + $0x8d0] sm:$0xf]  ;;  %v2487_v36 = vpop.f32.mrf.mxu3  ;;  %v2500_v8 = vpop.f32.mrf.mxu2  ;;  %v7654_v14 = vld [vmem:[#allocation5 + $0xa04] sm:$0xf0] }
 0x113   :  { %2765 = vmatpush.bf16.msra.mxu1 %v7625_v28  ;;  %v7262_v28 = vld [vmem:[#allocation5 + $0x6f4] sm:$0xf0]  ;;  %v6898_v36 = vld [vmem:[#allocation5 + $0x41c] sm:$0xf0] }
 0x114   :  { %2803 = vmatpush.bf16.msrb.mxu2 %v6761_v25  ;;  %v9646_v25 = vld [vmem:[#allocation5 + $0x8e8] sm:$0xf0]  ;;  %v7265_v44 = vor.u32 %v9580_v27, %v7262_v28  ;;  %v7402_v27 = vld [vmem:[#allocation5 + $0x80c] sm:$0xf0] }
 0x115   :  { %2753 = vmatpush.bf16.msrb.mxu3 %v7373_v32  ;;  %v6649_v32 = vor.u32 %v9426_v20, %v6646_v22  ;;  %v7178_v20 = vld [vmem:[#allocation5 + $0x64c] sm:$0xf0]  ;;  %v9496_v22 = vld [vmem:[#allocation5 + $0x43c] sm:$0xf] }
 0x116   :  { %2791 = vmatpush.bf16.msrb.mxu0 %v6509_v38  ;;  %v10458_v38 = vadd.f32 %v2511_v30, %v2499_v5  ;;  %v6954_v5 = vld [vmem:[#allocation5 + $0x48c] sm:$0xf0]  ;;  %v2513_v6 = vpop.f32.mrf.mxu0  ;;  %v7181_v28 = vor.u32 %v9559_v16, %v7178_v20  ;;  %v7318_v20 = vld [vmem:[#allocation5 + $0x764] sm:$0xf0] }
 0x117   :  { %2766 = vmatpush.bf16.msra.mxu1 %v7597_v43  ;;  %7750 = vmatmul.msk.bf16.vlgmr.msra.gmra.mxu2 %vm2329_vm0, %v10406_v52  ;;  %v9636_v43 = vld [vmem:[#allocation5 + $0x89c] sm:$0xf]  ;;  %v7626_v30 = vld [vmem:[#allocation5 + $0x9cc] sm:$0xf0] }
 0x118   :  { %2804 = vmatpush.bf16.msrb.mxu2 %v6733_v39  ;;  %v7513_v39 = vor.u32 %v9646_v25, %v7512_v24  ;;  %v7489_v58 = vor.u32 %v9636_v43, %v7486_v45  ;;  %v7657_v25 = vor.u32 %v9678_v13, %v7654_v14  ;;  %v7629_v42 = vor.u32 %v9671_v29, %v7626_v30  ;;  %v9608_v43 = vld [vmem:[#allocation5 + $0x7bc] sm:$0xf]  ;;  %v7374_v45 = vld [vmem:[#allocation5 + $0x7d4] sm:$0xf0]  ;;  %v7738_v13 = vld [vmem:[#allocation5 + $0xaac] sm:$0xf0] }
 0x119   :  { %2754 = vmatpush.bf16.msrb.mxu3 %v7345_v47  ;;  %v7710_v47 = vld [vmem:[#allocation5 + $0xa74] sm:$0xf0]  ;;  %v9416_v30 = vld [vmem:[#allocation5 + $0x1b8] sm:$0xf0] }
 0x11a   :  { %2792 = vmatpush.bf16.msrb.mxu0 %v6481_v54  ;;  %v9510_v54 = vld [vmem:[#allocation5 + $0x4ac] sm:$0xf]  ;;  %v7713_v59 = vor.u32 %v9692_v46, %v7710_v47  ;;  %v9664_v46 = vld [vmem:[#allocation5 + $0x97c] sm:$0xf]  ;;  %v7598_v47 = vld [vmem:[#allocation5 + $0x994] sm:$0xf0] }
 0x11b   :  { %2767 = vmatpush.bf16.msra.mxu1 %v7569_v61  ;;  %v7237_v61 = vor.u32 %v9573_v49, %v7234_v50  ;;  %v9545_v49 = vld [vmem:[#allocation5 + $0x5c4] sm:$0xf]  ;;  %v7122_v50 = vld [vmem:[#allocation5 + $0x5dc] sm:$0xf0] }
 0x11c   :  { %2805 = vmatpush.bf16.msrb.mxu2 %v6705_v57  ;;  %v6982_v57 = vld [vmem:[#allocation5 + $0x4c4] sm:$0xf0]  ;;  %v7125_v60 = vor.u32 %v9545_v49, %v7122_v50  ;;  %v9409_v49 = vld [vmem:[#allocation5 + $0x180] sm:$0xf0] }
 0x11d   :  { %2755 = vmatpush.bf16.msrb.mxu3 %v7317_v2  ;;  %v6985_v1 = vor.u32 %v9510_v54, %v6982_v57  ;;  %v9566_v2 = vld [vmem:[#allocation5 + $0x66c] sm:$0xf]  ;;  %v7377_v54 = vor.u32 %v9608_v43, %v7374_v45  ;;  %v7601_v57 = vor.u32 %v9664_v46, %v7598_v47  ;;  %v7514_v43 = vld [vmem:[#allocation5 + $0x8ec] sm:$0xf0]  ;;  %v7268_v47 = vld [vmem:[#allocation5 + $0x6e0] sm:$0xf] }
 0x11e   :  { %2793 = vmatpush.bf16.msrb.mxu0 %v6453_v9  ;;  %v7685_v9 = vor.u32 %v9685_v63, %v7682_v0  ;;  %v7209_v11 = vor.u32 %v9566_v2, %v7206_v3  ;;  %v7570_v63 = vld [vmem:[#allocation5 + $0x95c] sm:$0xf0]  ;;  %v9538_v2 = vld [vmem:[#allocation5 + $0x58c] sm:$0xf]  ;;  %v7094_v3 = vld [vmem:[#allocation5 + $0x5a4] sm:$0xf0] }
 0x11f   :  { %2768 = vmatpush.bf16.msra.mxu1 %v7541_v15  ;;  %v6957_v15 = vor.u32 %v9503_v4, %v6954_v5  ;;  %v2524_v8 = vpop.f32.mrf.mxu1  ;;  %v9475_v4 = vld [vmem:[#allocation5 + $0x394] sm:$0xf]  ;;  %v6842_v5 = vld [vmem:[#allocation5 + $0x3ac] sm:$0xf0]  ;;  %v7097_v16 = vor.u32 %v9538_v2, %v7094_v3  ;;  %v6792_v50 = vld [vmem:[#allocation5 + $0x328] sm:$0xf] }
 0x120   :  { %2806 = vmatpush.bf16.msrb.mxu2 %v6677_v10  ;;  %v9622_v10 = vld [vmem:[#allocation5 + $0x82c] sm:$0xf]  ;;  %v9577_v2 = vld [vmem:[#allocation5 + $0x6c0] sm:$0xf0]  ;;  %v6540_v3 = vld [vmem:[#allocation5 + $0x130] sm:$0xf] }
 0x121   :  { %2756 = vmatpush.bf16.msrb.mxu3 %v7289_v23  ;;  %v6926_v23 = vld [vmem:[#allocation5 + $0x454] sm:$0xf0]  ;;  %v7433_v24 = vor.u32 %v9622_v10, %v7430_v12  ;;  %v7573_v10 = vor.u32 %v9657_v62, %v7570_v63  ;;  %v9699_v12 = vld [vmem:[#allocation5 + $0xa94] sm:$0xf]  ;;  %v9521_v62 = vld [vmem:[#allocation5 + $0x500] sm:$0xf0] }
 0x122   :  { %2794 = vmatpush.bf16.msrb.mxu0 %v6425_v31  ;;  %v529_v31 = vperm.slane %v10434_v19, 2  ;;  %v6901_v19 = vor.u32 %v9489_v35, %v6898_v36  ;;  %v7741_v29 = vor.u32 %v9699_v12, %v7738_v13  ;;  %v9587_v35 = vld [vmem:[#allocation5 + $0x714] sm:$0xf]  ;;  %v7290_v36 = vld [vmem:[#allocation5 + $0x72c] sm:$0xf0] }
 0x123   :  { %2769 = vmatpush.bf16.msra.mxu1 %v7513_v39  ;;  %v2550_v39 = vpop.f32.mrf.mxu0 }
 0x124   :  { %2807 = vmatpush.bf16.msrb.mxu2 %v6649_v32  ;;  %2757 = vmatmul.bf16.vlgmr.msrb.gmra.mxu3 %v10410_v37  ;;  %v6929_v32 = vor.u32 %v9496_v22, %v6926_v23  ;;  %v9650_v22 = vld [vmem:[#allocation5 + $0x90c] sm:$0xf]  ;;  %v7542_v23 = vld [vmem:[#allocation5 + $0x924] sm:$0xf0] }
 0x125   :  { %2814 = vmatpush.bf16.msra.mxu3 %v7041_v26  ;;  %v9615_v26 = vld [vmem:[#allocation5 + $0x7f4] sm:$0xf] }
 0x126   :  { %2795 = vmatpush.bf16.msrb.mxu0 %v6397_v51  ;;  %2770 = vmatmul.bf16.vlgmr.msra.gmra.mxu1 %v10412_v41  ;;  %v7405_v40 = vor.u32 %v9615_v26, %v7402_v27  ;;  %v9482_v51 = vld [vmem:[#allocation5 + $0x3cc] sm:$0xf]  ;;  %v9531_v26 = vld [vmem:[#allocation5 + $0x554] sm:$0xf]  ;;  %v7066_v27 = vld [vmem:[#allocation5 + $0x56c] sm:$0xf0] }
 0x127   :  { %2827 = vmatpush.bf16.msrb.mxu1 %v7265_v44  ;;  %v7153_v44 = vor.u32 %v9552_v33, %v7150_v34  ;;  %v2526_v14 = vpop.f32.mrf.mxu1  ;;  %v7545_v34 = vor.u32 %v9650_v22, %v7542_v23  ;;  %v6736_v22 = vld [vmem:[#allocation5 + $0x2b8] sm:$0xf]  ;;  %v9451_v23 = vld [vmem:[#allocation5 + $0x2d0] sm:$0xf0] }
 0x128   :  { %2808 = vmatpush.bf16.msrb.mxu2 %v6621_v53  ;;  %v6870_v53 = vld [vmem:[#allocation5 + $0x3e4] sm:$0xf0]  ;;  %v7212_v14 = vld [vmem:[#allocation5 + $0x670] sm:$0xf] }
 0x129   :  { %2815 = vmatpush.bf16.msra.mxu3 %v7013_v48  ;;  %2796 = vmatmul.bf16.vlgmr.msrb.gmra.mxu0 %v10400_v17  ;;  %v2525_v48 = vadd.f32 %v2524_v8, %v529_v31  ;;  %v6820_v31 = vld [vmem:[#allocation5 + $0x360] sm:$0xf] }
 0x12a   :  { %2840 = vmatpush.bf16.msra.mxu0 %v7489_v58  ;;  %v9601_v58 = vld [vmem:[#allocation5 + $0x784] sm:$0xf]  ;;  %v7044_v8 = vld [vmem:[#allocation5 + $0x520] sm:$0xf] }
 0x12b   :  { %2828 = vmatpush.bf16.msrb.mxu1 %v7237_v61  ;;  %2809 = vmatmul.bf16.vlgmr.msrb.gmra.mxu2 %v10402_v21  ;;  %v7346_v61 = vld [vmem:[#allocation5 + $0x79c] sm:$0xf0]  ;;  %v2552_v6 = vpop.f32.mrf.mxu0 }
 0x12c   :  { %2853 = vmatpush.bf16.msra.mxu2 %v7713_v59  ;;  %v2537_v59 = vpop.f32.mrf.mxu3  ;;  %v9458_v6 = vld [vmem:[#allocation5 + $0x308] sm:$0xf0] }
 0x12d   :  { %2816 = vmatpush.bf16.msra.mxu3 %v6985_v1  ;;  %v2538_v0 = vadd.f32 %v2537_v59, %v2525_v48  ;;  %v6873_v1 = vor.u32 %v9482_v51, %v6870_v53  ;;  %v9584_v48 = vld [vmem:[#allocation5 + $0x6f8] sm:$0xf0]  ;;  %v9465_v51 = vld [vmem:[#allocation5 + $0x340] sm:$0xf0] }
 0x12e   :  { %2841 = vmatpush.bf16.msra.mxu0 %v7461_v7 }
 0x12f   :  { %2829 = vmatpush.bf16.msrb.mxu1 %v7209_v11  ;;  %v2551_v7 = vadd.f32 %v2550_v39, %v2538_v0  ;;  %v9594_v11 = vld [vmem:[#allocation5 + $0x74c] sm:$0xf]  ;;  %v9643_v39 = vld [vmem:[#allocation5 + $0x8d4] sm:$0xf]  ;;  %v6793_v0 = vor.u32 %v9465_v51, %v6792_v50 }
 0x130   :  { %2854 = vmatpush.bf16.msra.mxu2 %v7685_v9  ;;  %v7349_v9 = vor.u32 %v9601_v58, %v7346_v61  ;;  %v7321_v33 = vor.u32 %v9594_v11, %v7318_v20  ;;  %v7016_v61 = vld [vmem:[#allocation5 + $0x4e8] sm:$0xf]  ;;  %v9514_v11 = vld [vmem:[#allocation5 + $0x4c8] sm:$0xf0]  ;;  %v9395_v20 = vld [vmem:[#allocation5 + $0x110] sm:$0xf0] }
 0x131   :  { %2817 = vmatpush.bf16.msra.mxu3 %v6957_v15  ;;  %v2563_v15 = vpop.f32.mrf.mxu2 }
 0x132   :  { %2842 = vmatpush.bf16.msra.mxu0 %v7433_v24  ;;  %v10465_v24 = vadd.f32 %v2563_v15, %v2551_v7  ;;  %v7017_v7 = vor.u32 %v9521_v62, %v7016_v61  ;;  %v9570_v15 = vld [vmem:[#allocation5 + $0x688] sm:$0xf0] }
 0x133   :  { %2830 = vmatpush.bf16.msrb.mxu1 %v7181_v28  ;;  %v6596_v28 = vld [vmem:[#allocation5 + $0x1a0] sm:$0xf]  ;;  %v10467_v53 = vpop.f32.mrf.mxu0 }
 0x134   :  { %2855 = vmatpush.bf16.msra.mxu2 %v7657_v25  ;;  %v6845_v25 = vor.u32 %v9475_v4, %v6842_v5  ;;  %v6597_v45 = vor.u32 %v9416_v30, %v6596_v28  ;;  %v9402_v4 = vld [vmem:[#allocation5 + $0x148] sm:$0xf0]  ;;  %v6764_v5 = vld [vmem:[#allocation5 + $0x2f0] sm:$0xf]  ;;  %v7213_v28 = vor.u32 %v9570_v15, %v7212_v14 }
 0x135   :  { %2818 = vmatpush.bf16.msra.mxu3 %v6929_v32  ;;  %v9472_v32 = vld [vmem:[#allocation5 + $0x378] sm:$0xf0]  ;;  %v6541_v12 = vor.u32 %v9402_v4, %v6540_v3  ;;  %v6765_v13 = vor.u32 %v9458_v6, %v6764_v5  ;;  %v9549_v4 = vld [vmem:[#allocation5 + $0x5e0] sm:$0xf0]  ;;  %v6428_v5 = vld [vmem:[#allocation5 + $0x50] sm:$0xf] }
 0x136   :  { %2843 = vmatpush.bf16.msra.mxu0 %v7405_v40  ;;  %v2539_v40 = vpop.f32.mrf.mxu3  ;;  %v6821_v46 = vor.u32 %v9472_v32, %v6820_v31  ;;  %v6737_v31 = vor.u32 %v9451_v23, %v6736_v22  ;;  %v6960_v32 = vld [vmem:[#allocation5 + $0x478] sm:$0xf]  ;;  %v9374_v6 = vld [vmem:[#allocation5 + $0x68] sm:$0xf0]  ;;  %v9367_v23 = vld [vmem:[#allocation5 + $0x30] sm:$0xf0] }
 0x137   :  { %2831 = vmatpush.bf16.msrb.mxu1 %v7153_v44  ;;  %v9528_v44 = vld [vmem:[#allocation5 + $0x538] sm:$0xf0]  ;;  %v6708_v40 = vld [vmem:[#allocation5 + $0x280] sm:$0xf]  ;;  %v6429_v14 = vor.u32 %v9374_v6, %v6428_v5  ;;  %v9486_v15 = vld [vmem:[#allocation5 + $0x3e8] sm:$0xf0] }
 0x138   :  { %2856 = vmatpush.bf16.msra.mxu2 %v7629_v42  ;;  %v7069_v42 = vor.u32 %v9531_v26, %v7066_v27  ;;  %v7045_v59 = vor.u32 %v9528_v44, %v7044_v8  ;;  %v6400_v22 = vld [vmem:[#allocation5 + $0x18] sm:$0xf]  ;;  %v9626_v5 = vld [vmem:[#allocation5 + $0x848] sm:$0xf0] }
 0x139   :  { %2819 = vmatpush.bf16.msra.mxu3 %v6901_v19  ;;  %v6568_v19 = vld [vmem:[#allocation5 + $0x168] sm:$0xf]  ;;  %v2565_v58 = vpop.f32.mrf.mxu2 }
 0x13a   :  { %2844 = vmatpush.bf16.msra.mxu0 %v7377_v54  ;;  %v7293_v54 = vor.u32 %v9587_v35, %v7290_v36  ;;  %v6569_v63 = vor.u32 %v9409_v49, %v6568_v19  ;;  %v9563_v35 = vld [vmem:[#allocation5 + $0x650] sm:$0xf0]  ;;  %v6484_v36 = vld [vmem:[#allocation5 + $0xc0] sm:$0xf]  ;;  %v6456_v19 = vld [vmem:[#allocation5 + $0x88] sm:$0xf] }
 0x13b   :  { %2832 = vmatpush.bf16.msrb.mxu1 %v7125_v60  ;;  %v7269_v60 = vor.u32 %v9584_v48, %v7268_v47  ;;  %v9556_v48 = vld [vmem:[#allocation5 + $0x618] sm:$0xf0]  ;;  %v9381_v49 = vld [vmem:[#allocation5 + $0xa0] sm:$0xf0] }
 0x13c   :  { %2857 = vmatpush.bf16.msra.mxu2 %v7601_v57  ;;  %v7517_v57 = vor.u32 %v9643_v39, %v7514_v43  ;;  %v9388_v39 = vld [vmem:[#allocation5 + $0xd8] sm:$0xf0]  ;;  %v6457_v62 = vor.u32 %v9381_v49, %v6456_v19  ;;  %v7464_v19 = vld [vmem:[#allocation5 + $0x868] sm:$0xf]  ;;  %v9633_v49 = vld [vmem:[#allocation5 + $0x880] sm:$0xf0] }
 0x13d   :  { %2820 = vmatpush.bf16.msra.mxu3 %v6873_v1  ;;  %v7240_v1 = vld [vmem:[#allocation5 + $0x6a8] sm:$0xf]  ;;  %v6485_v44 = vor.u32 %v9388_v39, %v6484_v36  ;;  %v6401_v36 = vor.u32 %v9367_v23, %v6400_v22  ;;  %v9479_v39 = vld [vmem:[#allocation5 + $0x3b0] sm:$0xf0]  ;;  %v7632_v23 = vld [vmem:[#allocation5 + $0x9b8] sm:$0xf] }
 0x13e   :  { %2845 = vmatpush.bf16.msra.mxu0 %v7349_v9  ;;  %v7241_v9 = vor.u32 %v9577_v2, %v7240_v1  ;;  %v7128_v1 = vld [vmem:[#allocation5 + $0x5c8] sm:$0xf]  ;;  %v9619_v22 = vld [vmem:[#allocation5 + $0x810] sm:$0xf0] }
 0x13f   :  { %2833 = vmatpush.bf16.msrb.mxu1 %v7097_v16  ;;  %v6512_v16 = vld [vmem:[#allocation5 + $0xf8] sm:$0xf]  ;;  %v2576_v26 = vpop.f32.mrf.mxu1 }
 0x140   :  { %2858 = vmatpush.bf16.msra.mxu2 %v7573_v10  ;;  %v6988_v10 = vld [vmem:[#allocation5 + $0x4b0] sm:$0xf]  ;;  %v6513_v30 = vor.u32 %v9395_v20, %v6512_v16 }
 0x141   :  { %2821 = vmatpush.bf16.msra.mxu3 %v6845_v25  ;;  %v2604_v25 = vpop.f32.mrf.mxu0  ;;  %v6989_v27 = vor.u32 %v9514_v11, %v6988_v10  ;;  %v9430_v10 = vld [vmem:[#allocation5 + $0x228] sm:$0xf0]  ;;  %v7100_v16 = vld [vmem:[#allocation5 + $0x590] sm:$0xf] }
 0x142   :  { %2846 = vmatpush.bf16.msra.mxu0 %v7321_v33  ;;  %v9507_v33 = vld [vmem:[#allocation5 + $0x490] sm:$0xf0]  ;;  %v6624_v25 = vld [vmem:[#allocation5 + $0x1d8] sm:$0xf] }
 0x143   :  { %2834 = vmatpush.bf16.msrb.mxu1 %v7069_v42  ;;  %v9444_v42 = vld [vmem:[#allocation5 + $0x298] sm:$0xf0]  ;;  %v6961_v43 = vor.u32 %v9507_v33, %v6960_v32  ;;  %v7716_v32 = vld [vmem:[#allocation5 + $0xa60] sm:$0xf] }
 0x144   :  { %2859 = vmatpush.bf16.msra.mxu2 %v7545_v34  ;;  %2822 = vmatmul.bf16.vlgmr.msra.gmra.mxu3 %v10394_v55  ;;  %v7184_v34 = vld [vmem:[#allocation5 + $0x638] sm:$0xf]  ;;  %v6709_v47 = vor.u32 %v9444_v42, %v6708_v40  ;;  %v9696_v33 = vld [vmem:[#allocation5 + $0xa78] sm:$0xf0]  ;;  %v9535_v42 = vld [vmem:[#allocation5 + $0x570] sm:$0xf0] }
 0x145   :  { %2873 = vmatpush.bf16.msrb.mxu3 %v7741_v29  ;;  %v2577_v29 = vadd.f32 %v2576_v26, %v10465_v24  ;;  %v7185_v8 = vor.u32 %v9563_v35, %v7184_v34  ;;  %v6932_v24 = vld [vmem:[#allocation5 + $0x440] sm:$0xf]  ;;  %v6848_v34 = vld [vmem:[#allocation5 + $0x398] sm:$0xf] }
 0x146   :  { %2847 = vmatpush.bf16.msra.mxu0 %v7293_v54  ;;  %2835 = vmatmul.bf16.vlgmr.msrb.gmra.mxu1 %v10396_v56  ;;  %v6680_v54 = vld [vmem:[#allocation5 + $0x248] sm:$0xf]  ;;  %v7072_v40 = vld [vmem:[#allocation5 + $0x558] sm:$0xf] }
 0x147   :  { %2879 = vmatpush.bf16.msra.mxu1 %v6597_v45  ;;  %v9500_v45 = vld [vmem:[#allocation5 + $0x458] sm:$0xf0]  ;;  %v2589_v51 = vpop.f32.mrf.mxu3 }
 0x148   :  { %2860 = vmatpush.bf16.msra.mxu2 %v7517_v57  ;;  %v9437_v57 = vld [vmem:[#allocation5 + $0x260] sm:$0xf0]  ;;  %v2590_v58 = vadd.f32 %v2589_v51, %v2577_v29  ;;  %v9640_v29 = vld [vmem:[#allocation5 + $0x8b8] sm:$0xf0]  ;;  %v6849_v51 = vor.u32 %v9479_v39, %v6848_v34  ;;  %v8091_v39 = vld [vmem:[#allocation8 + $0x2a0] sm:$0xf] }
 0x149   :  { %2892 = vmatpush.bf16.msra.mxu3 %v6821_v46  ;;  %2848 = vmatmul.bf16.vlgmr.msra.gmra.mxu0 %v10410_v37  ;;  %v7156_v46 = vld [vmem:[#allocation5 + $0x600] sm:$0xf]  ;;  %v10474_v50 = vpop.f32.mrf.mxu0  ;;  %v6681_v3 = vor.u32 %v9437_v57, %v6680_v54  ;;  %v7688_v54 = vld [vmem:[#allocation5 + $0xa28] sm:$0xf]  ;;  %v9689_v57 = vld [vmem:[#allocation5 + $0xa40] sm:$0xf0] }
 0x14a   :  { %2905 = vmatpush.bf16.msrb.mxu0 %v7045_v59  ;;  %v6933_v59 = vor.u32 %v9500_v45, %v6932_v24  ;;  %v7157_v61 = vor.u32 %v9556_v48, %v7156_v46  ;;  %v10479_v2 = vadd.f32 %v10467_v53, %v2590_v58  ;;  %v9542_v53 = vld [vmem:[#allocation5 + $0x5a8] sm:$0xf0]  ;;  %v7744_v24 = vld [vmem:[#allocation5 + $0xa98] sm:$0xf]  ;;  %v9703_v45 = vld [vmem:[#allocation5 + $0xab0] sm:$0xf0]  ;;  %v7073_v58 = vor.u32 %v9535_v42, %v7072_v40 }
 0x14b   :  { %2880 = vmatpush.bf16.msra.mxu1 %v6569_v63  ;;  %2861 = vmatmul.bf16.vlgmr.msra.gmra.mxu2 %v10412_v41  ;;  %v6904_v63 = vld [vmem:[#allocation5 + $0x408] sm:$0xf]  ;;  %v7101_v35 = vor.u32 %v9542_v53, %v7100_v16  ;;  %v9756_v48 = vld [vmem:[#allocation8 + $0x1a0] sm:$0xf0]  ;;  %v9742_v53 = vld [vmem:[#allocation8 + $0x130] sm:$0xf0] }
 0x14c   :  { %2918 = vmatpush.bf16.msrb.mxu2 %v7269_v60  ;;  %v2578_v60 = vpop.f32.mrf.mxu1  ;;  %v9612_v34 = vld [vmem:[#allocation5 + $0x7d8] sm:$0xf0] }
 0x14d   :  { %2893 = vmatpush.bf16.msra.mxu3 %v6793_v0  ;;  %v9493_v0 = vld [vmem:[#allocation5 + $0x420] sm:$0xf0]  ;;  %v8175_v60 = vld [vmem:[#allocation8 + $0x348] sm:$0xf]  ;;  %v9791_v40 = vld [vmem:[#allocation8 + $0x2b8] sm:$0xf0] }
 0x14e   :  { %2906 = vmatpush.bf16.msrb.mxu0 %v7017_v7  ;;  %v10481_v7 = vpop.f32.mrf.mxu2  ;;  %v6905_v11 = vor.u32 %v9493_v0, %v6904_v63  ;;  %v7465_v63 = vor.u32 %v9633_v49, %v7464_v19  ;;  %v7923_v0 = vld [vmem:[#allocation8 + $0x150] sm:$0xf]  ;;  %v7576_v19 = vld [vmem:[#allocation5 + $0x948] sm:$0xf]  ;;  %v9661_v49 = vld [vmem:[#allocation5 + $0x960] sm:$0xf0] }
 0x14f   :  { %2881 = vmatpush.bf16.msra.mxu1 %v6541_v12  ;;  %v6876_v12 = vld [vmem:[#allocation5 + $0x3d0] sm:$0xf] }
 0x150   :  { %2919 = vmatpush.bf16.msrb.mxu2 %v7241_v9  ;;  %v6652_v9 = vld [vmem:[#allocation5 + $0x210] sm:$0xf] }
 0x151   :  { %2894 = vmatpush.bf16.msra.mxu3 %v6765_v13  ;;  %v7129_v13 = vor.u32 %v9549_v4, %v7128_v1  ;;  %v6653_v20 = vor.u32 %v9430_v10, %v6652_v9  ;;  %v2630_v26 = vpop.f32.mrf.mxu0  ;;  %v7689_v1 = vor.u32 %v9689_v57, %v7688_v54  ;;  %v7436_v4 = vld [vmem:[#allocation5 + $0x830] sm:$0xf]  ;;  %v9682_v10 = vld [vmem:[#allocation5 + $0xa08] sm:$0xf0]  ;;  %v8063_v54 = vld [vmem:[#allocation8 + $0x268] sm:$0xf] }
 0x152   :  { %2907 = vmatpush.bf16.msrb.mxu0 %v6989_v27  ;;  %v9423_v27 = vld [vmem:[#allocation5 + $0x1f0] sm:$0xf0]  ;;  %v7660_v9 = vld [vmem:[#allocation5 + $0x9f0] sm:$0xf]  ;;  %v9784_v57 = vld [vmem:[#allocation8 + $0x280] sm:$0xf0] }
 0x153   :  { %2882 = vmatpush.bf16.msra.mxu1 %v6513_v30  ;;  %v2591_v30 = vpop.f32.mrf.mxu3  ;;  %v7661_v16 = vor.u32 %v9682_v10, %v7660_v9  ;;  %v9777_v9 = vld [vmem:[#allocation8 + $0x248] sm:$0xf0] }
 0x154   :  { %2920 = vmatpush.bf16.msrb.mxu2 %v7213_v28  ;;  %7751 = vmatmul.msk.bf16.vlgmr.msrb.gmra.mxu3 %vm2329_vm0, %v10406_v52  ;;  %v7492_v28 = vld [vmem:[#allocation5 + $0x8a0] sm:$0xf] }
 0x155   :  { %2895 = vmatpush.bf16.msra.mxu3 %v6737_v31  ;;  %v6877_v31 = vor.u32 %v9486_v15, %v6876_v12  ;;  %v9805_v12 = vld [vmem:[#allocation8 + $0x328] sm:$0xf0]  ;;  %v7895_v15 = vld [vmem:[#allocation8 + $0x118] sm:$0xf]  ;;  %v7867_v30 = vld [vmem:[#allocation8 + $0xe0] sm:$0xf] }
 0x156   :  { %2908 = vmatpush.bf16.msrb.mxu0 %v6961_v43  ;;  %v6625_v43 = vor.u32 %v9423_v27, %v6624_v25  ;;  %v2617_v46 = vpop.f32.mrf.mxu2  ;;  %v9675_v25 = vld [vmem:[#allocation5 + $0x9d0] sm:$0xf0]  ;;  %v8119_v27 = vld [vmem:[#allocation8 + $0x2d8] sm:$0xf] }
 0x157   :  { %2883 = vmatpush.bf16.msra.mxu1 %v6485_v44  ;;  %v7951_v44 = vld [vmem:[#allocation8 + $0x188] sm:$0xf] }
 0x158   :  { %2921 = vmatpush.bf16.msrb.mxu2 %v7185_v8  ;;  %v7493_v8 = vor.u32 %v9640_v29, %v7492_v28  ;;  %v9798_v28 = vld [vmem:[#allocation8 + $0x2f0] sm:$0xf0]  ;;  %v7896_v29 = vor.u32 %v9742_v53, %v7895_v15  ;;  %v7520_v53 = vld [vmem:[#allocation5 + $0x8d8] sm:$0xf] }
 0x159   :  { %2896 = vmatpush.bf16.msra.mxu3 %v6709_v47  ;;  %v7717_v47 = vor.u32 %v9696_v33, %v7716_v32  ;;  %v9735_v32 = vld [vmem:[#allocation8 + $0xf8] sm:$0xf0]  ;;  %v7380_v33 = vld [vmem:[#allocation5 + $0x7c0] sm:$0xf] }
 0x15a   :  { %2909 = vmatpush.bf16.msrb.mxu0 %v6933_v59  ;;  %v7745_v59 = vor.u32 %v9703_v45, %v7744_v24  ;;  %v7868_v42 = vor.u32 %v9735_v32, %v7867_v30  ;;  %v7352_v24 = vld [vmem:[#allocation5 + $0x788] sm:$0xf]  ;;  %v9605_v45 = vld [vmem:[#allocation5 + $0x7a0] sm:$0xf0]  ;;  %v8007_v30 = vld [vmem:[#allocation8 + $0x1f8] sm:$0xf] }
 0x15b   :  { %2884 = vmatpush.bf16.msra.mxu1 %v6457_v62  ;;  %v7952_v62 = vor.u32 %v9756_v48, %v7951_v44  ;;  %v9728_v44 = vld [vmem:[#allocation8 + $0xc0] sm:$0xf0]  ;;  %v10499_v32 = vld [vmem:[#allocation7] sm:$0x7f] }
 0x15c   :  { %2922 = vmatpush.bf16.msrb.mxu2 %v7157_v61  ;;  %v9812_v61 = vld [vmem:[#allocation8 + $0x360] sm:$0xf0] }
 0x15d   :  { %2897 = vmatpush.bf16.msra.mxu3 %v6681_v3  ;;  %v9749_v3 = vld [vmem:[#allocation8 + $0x168] sm:$0xf0]  ;;  %v8176_v6 = vor.u32 %v9812_v61, %v8175_v60  ;;  %v7353_v60 = vor.u32 %v9605_v45, %v7352_v24  ;;  %v7811_v61 = vld [vmem:[#allocation8 + $0x70] sm:$0xf]  ;;  %v8847_v24 = vld [vmem:[#allocation8 + $0x888] sm:$0xf] }
 0x15e   :  { %2910 = vmatpush.bf16.msrb.mxu0 %v6905_v11  ;;  %v8147_v11 = vld [vmem:[#allocation8 + $0x310] sm:$0xf]  ;;  %v9980_v45 = vld [vmem:[#allocation8 + $0x8a0] sm:$0xf0] }
 0x15f   :  { %2885 = vmatpush.bf16.msra.mxu1 %v6429_v14  ;;  %v7437_v14 = vor.u32 %v9626_v5, %v7436_v4  ;;  %v10486_v26 = vpop.f32.mrf.mxu1  ;;  %v7548_v4 = vld [vmem:[#allocation5 + $0x910] sm:$0xf]  ;;  %v9654_v5 = vld [vmem:[#allocation5 + $0x928] sm:$0xf0] }
 0x160   :  { %2923 = vmatpush.bf16.msrb.mxu2 %v7129_v13  ;;  %v7924_v13 = vor.u32 %v9749_v3, %v7923_v0  ;;  %v7324_v0 = vld [vmem:[#allocation5 + $0x750] sm:$0xf]  ;;  %v8064_v3 = vor.u32 %v9784_v57, %v8063_v54  ;;  %v7549_v15 = vor.u32 %v9654_v5, %v7548_v4  ;;  %v2970_v57 = vmax.f32 %v10444_v18, 0.0  ;;  %v9910_v4 = vld [vmem:[#allocation8 + $0x670] sm:$0xf0] }
 0x161   :  { %2898 = vmatpush.bf16.msra.mxu3 %v6653_v20  ;;  %v7408_v20 = vld [vmem:[#allocation5 + $0x7f8] sm:$0xf]  ;;  %v9071_v18 = vld [vmem:[#allocation8 + $0xa48] sm:$0xf] }
 0x162   :  { %2911 = vmatpush.bf16.msrb.mxu0 %v6877_v31  ;;  %v7633_v31 = vor.u32 %v9675_v25, %v7632_v23  ;;  %v9868_v23 = vld [vmem:[#allocation8 + $0x520] sm:$0xf0]  ;;  %v8623_v25 = vld [vmem:[#allocation8 + $0x6c8] sm:$0xf] }
 0x163   :  { %2886 = vmatpush.bf16.msra.mxu1 %v6401_v36  ;;  %v9668_v36 = vld [vmem:[#allocation5 + $0x998] sm:$0xf0] }
 0x164   :  { %2924 = vmatpush.bf16.msrb.mxu2 %v7101_v35  ;;  %v7604_v35 = vld [vmem:[#allocation5 + $0x980] sm:$0xf] }
 0x165   :  { %2899 = vmatpush.bf16.msra.mxu3 %v6625_v43  ;;  %v7839_v43 = vld [vmem:[#allocation8 + $0xa8] sm:$0xf] }
 0x166   :  { %2912 = vmatpush.bf16.msrb.mxu0 %v6849_v51  ;;  %2887 = vmatmul.bf16.vlgmr.msra.gmra.mxu1 %v10400_v17  ;;  %v8148_v17 = vor.u32 %v9805_v12, %v8147_v11  ;;  %v10491_v48 = vpop.f32.mrf.mxu0  ;;  %v7783_v12 = vld [vmem:[#allocation8 + $0x38] sm:$0xf] }
 0x167   :  { %2931 = vmatpush.bf16.msrb.mxu1 %v7493_v8  ;;  %v7605_v8 = vor.u32 %v9668_v36, %v7604_v35  ;;  %v10489_v46 = vpop.f32.mrf.mxu3  ;;  %v2643_v51 = vpop.f32.mrf.mxu1 }
 0x168   :  { %2925 = vmatpush.bf16.msrb.mxu2 %v7073_v58  ;;  %2900 = vmatmul.bf16.vlgmr.msra.gmra.mxu3 %v10402_v21  ;;  %v8120_v21 = vor.u32 %v9798_v28, %v8119_v27 }
 0x169   :  { %2944 = vmatpush.bf16.msrb.mxu3 %v7717_v47  ;;  %2913 = vmatmul.bf16.vlgmr.msrb.gmra.mxu0 %v10394_v55  ;;  %v7409_v55 = vor.u32 %v9619_v22, %v7408_v20  ;;  %v8092_v47 = vor.u32 %v9791_v40, %v8091_v39  ;;  %v9647_v20 = vld [vmem:[#allocation5 + $0x8f0] sm:$0xf0]  ;;  %v9707_v40 = vld [vmem:[#allocation8 + $0x18] sm:$0xf0] }
 0x16a   :  { %2964 = vmatpush.bf16.msra.mxu0 %v7745_v59  ;;  %v10493_v58 = vpop.f32.mrf.mxu2  ;;  %v7840_v59 = vor.u32 %v9728_v44, %v7839_v43  ;;  %v7521_v36 = vor.u32 %v9647_v20, %v7520_v53  ;;  %v8595_v44 = vld [vmem:[#allocation8 + $0x690] sm:$0xf]  ;;  %v8791_v20 = vld [vmem:[#allocation8 + $0x818] sm:$0xf] }
 0x16b   :  { %2932 = vmatpush.bf16.msrb.mxu1 %v7465_v63  ;;  %2926 = vmatmul.bf16.vlgmr.msrb.gmra.mxu2 %v10396_v56  ;;  %v7381_v56 = vor.u32 %v9612_v34, %v7380_v33  ;;  %v9721_v63 = vld [vmem:[#allocation8 + $0x88] sm:$0xf0] }
 0x16c   :  { %5204 = vmatpush.bf16.msra.mxu2 %v7952_v62  ;;  %v7577_v62 = vor.u32 %v9661_v49, %v7576_v19  ;;  %v7812_v10 = vor.u32 %v9721_v63, %v7811_v61  ;;  %v7979_v19 = vld [vmem:[#allocation8 + $0x1c0] sm:$0xf]  ;;  %v9763_v49 = vld [vmem:[#allocation8 + $0x1d8] sm:$0xf0]  ;;  %v8343_v61 = vld [vmem:[#allocation8 + $0x498] sm:$0xf]  ;;  %v8848_v63 = vor.u32 %v9980_v45, %v8847_v24 }
 0x16d   :  { %2945 = vmatpush.bf16.msrb.mxu3 %v7689_v1  ;;  %v9598_v1 = vld [vmem:[#allocation5 + $0x768] sm:$0xf0] }
 0x16e   :  { %5217 = vmatpush.bf16.msrb.mxu0 %v8176_v6  ;;  %v8035_v6 = vld [vmem:[#allocation8 + $0x230] sm:$0xf]  ;;  %v7325_v11 = vor.u32 %v9598_v1, %v7324_v0  ;;  %v2682_v28 = vpop.f32.mrf.mxu0  ;;  %v7980_v1 = vor.u32 %v9763_v49, %v7979_v19  ;;  %v9889_v45 = vld [vmem:[#allocation8 + $0x5c8] sm:$0xf0]  ;;  %v9952_v19 = vld [vmem:[#allocation8 + $0x7c0] sm:$0xf0] }
 0x16f   :  { %2933 = vmatpush.bf16.msrb.mxu1 %v7437_v14  ;;  %v7296_v14 = vld [vmem:[#allocation5 + $0x718] sm:$0xf]  ;;  %v8036_v22 = vor.u32 %v9777_v9, %v8035_v6  ;;  %v2656_v27 = vpop.f32.mrf.mxu3  ;;  %v9973_v6 = vld [vmem:[#allocation8 + $0x868] sm:$0xf0]  ;;  %v10036_v9 = vld [vmem:[#allocation8 + $0xa60] sm:$0xf0] }
 0x170   :  { %5205 = vmatpush.bf16.msra.mxu2 %v7924_v13  ;;  %v9714_v13 = vld [vmem:[#allocation8 + $0x50] sm:$0xf0] }
 0x171   :  { %2946 = vmatpush.bf16.msrb.mxu3 %v7661_v16  ;;  %v9591_v16 = vld [vmem:[#allocation5 + $0x730] sm:$0xf0]  ;;  %v7784_v33 = vor.u32 %v9714_v13, %v7783_v12  ;;  %v8315_v13 = vld [vmem:[#allocation8 + $0x460] sm:$0xf] }
 0x172   :  { %5218 = vmatpush.bf16.msrb.mxu0 %v8148_v17  ;;  %v8399_v17 = vld [vmem:[#allocation8 + $0x508] sm:$0xf]  ;;  %v7297_v34 = vor.u32 %v9591_v16, %v7296_v14  ;;  %v2669_v35 = vpop.f32.mrf.mxu2  ;;  %v9847_v14 = vld [vmem:[#allocation8 + $0x478] sm:$0xf0] }
 0x173   :  { %2934 = vmatpush.bf16.msrb.mxu1 %v7409_v55  ;;  %v9924_v55 = vld [vmem:[#allocation8 + $0x6e0] sm:$0xf0]  ;;  %v8400_v39 = vor.u32 %v9868_v23, %v8399_v17  ;;  %v9903_v16 = vld [vmem:[#allocation8 + $0x638] sm:$0xf0]  ;;  %v10029_v17 = vld [vmem:[#allocation8 + $0xa28] sm:$0xf0]  ;;  %v8316_v27 = vor.u32 %v9847_v14, %v8315_v13 }
 0x174   :  { %5206 = vmatpush.bf16.msra.mxu2 %v7896_v29  ;;  %v10497_v29 = vpop.f32.mrf.mxu1  ;;  %v8624_v43 = vor.u32 %v9924_v55, %v8623_v25  ;;  %v8287_v55 = vld [vmem:[#allocation8 + $0x428] sm:$0xf] }
 0x175   :  { %2947 = vmatpush.bf16.msrb.mxu3 %v7633_v31  ;;  %v9770_v31 = vld [vmem:[#allocation8 + $0x210] sm:$0xf0] }
 0x176   :  { %5219 = vmatpush.bf16.msrb.mxu0 %v8120_v21  ;;  %v7755_v21 = vld [vmem:[#allocation8] sm:$0xf] }
 0x177   :  { %2935 = vmatpush.bf16.msrb.mxu1 %v7381_v56  ;;  %v9861_v56 = vld [vmem:[#allocation8 + $0x4e8] sm:$0xf0]  ;;  %v7756_v54 = vor.u32 %v9707_v40, %v7755_v21  ;;  %v9959_v21 = vld [vmem:[#allocation8 + $0x7f8] sm:$0xf0] }
 0x178   :  { %5207 = vmatpush.bf16.msra.mxu2 %v7868_v42  ;;  %v8371_v42 = vld [vmem:[#allocation8 + $0x4d0] sm:$0xf] }
 0x179   :  { %2948 = vmatpush.bf16.msrb.mxu3 %v7605_v8  ;;  %7752 = vmatmul.msk.bf16.vlgmr.msra.gmra.mxu0 %vm2329_vm0, %v10406_v52  ;;  %v530_v52 = vperm.slane %v10499_v32, 3  ;;  %v8008_v8 = vor.u32 %v9770_v31, %v8007_v30  ;;  %v9840_v30 = vld [vmem:[#allocation8 + $0x440] sm:$0xf0]  ;;  %v8511_v31 = vld [vmem:[#allocation8 + $0x5e8] sm:$0xf] }
 0x17a   :  { %5220 = vmatpush.bf16.msrb.mxu0 %v8092_v47  ;;  %v9917_v47 = vld [vmem:[#allocation8 + $0x6a8] sm:$0xf0]  ;;  %v8288_v40 = vor.u32 %v9840_v30, %v8287_v55  ;;  %v531_v55 = vperm.slane %v10499_v32, 4  ;;  %v2972_v30 = vmax.f32 %v10479_v2, 0.0 }
 0x17b   :  { %2936 = vmatpush.bf16.msrb.mxu1 %v7353_v60  ;;  %v2616_v51 = vadd.f32 %v10481_v7, %v530_v52  ;;  %v8372_v60 = vor.u32 %v9861_v56, %v8371_v42  ;;  %v8596_v0 = vor.u32 %v9917_v47, %v8595_v44  ;;  %v8819_v7 = vld [vmem:[#allocation8 + $0x850] sm:$0xf]  ;;  %v8735_v47 = vld [vmem:[#allocation8 + $0x7a8] sm:$0xf] }
 0x17c   :  { %5208 = vmatpush.bf16.msra.mxu2 %v7840_v59  ;;  %v2971_v59 = vmax.f32 %v10458_v38, 0.0  ;;  %v2695_v5 = vpop.f32.mrf.mxu1  ;;  %v8820_v53 = vor.u32 %v9973_v6, %v8819_v7  ;;  %v8483_v44 = vld [vmem:[#allocation8 + $0x5b0] sm:$0xf] }
 0x17d   :  { %2949 = vmatpush.bf16.msrb.mxu3 %v7577_v62  ;;  %v9854_v62 = vld [vmem:[#allocation8 + $0x4b0] sm:$0xf0]  ;;  %v2629_v38 = vadd.f32 %v10474_v50, %v2616_v51  ;;  %v9043_v50 = vld [vmem:[#allocation8 + $0xa10] sm:$0xf]  ;;  %v9945_v5 = vld [vmem:[#allocation8 + $0x788] sm:$0xf0] }
 0x17e   :  { %5221 = vmatpush.bf16.msrb.mxu0 %v8064_v3  ;;  %v8567_v3 = vld [vmem:[#allocation8 + $0x658] sm:$0xf]  ;;  %v8344_v12 = vor.u32 %v9854_v62, %v8343_v61  ;;  %v9044_v25 = vor.u32 %v10029_v17, %v9043_v50  ;;  %v8484_v61 = vor.u32 %v9889_v45, %v8483_v44  ;;  %v8707_v7 = vld [vmem:[#allocation8 + $0x770] sm:$0xf]  ;;  %v10001_v17 = vld [vmem:[#allocation8 + $0x948] sm:$0xf0] }
 0x17f   :  { %2937 = vmatpush.bf16.msrb.mxu1 %v7325_v11  ;;  %v10508_v11 = vpack.c.bf16 %v2970_v57, %v2970_v57  ;;  %v2642_v23 = vadd.f32 %v10486_v26, %v2629_v38  ;;  %v10015_v57 = vld [vmem:[#allocation8 + $0x9b8] sm:$0xf0]  ;;  %v8231_v62 = vld [vmem:[#allocation8 + $0x3b8] sm:$0xf] }
 0x180   :  { %5209 = vmatpush.bf16.msra.mxu2 %v7812_v10  ;;  %v9072_v10 = vor.u32 %v10036_v9, %v9071_v18  ;;  %v8959_v18 = vld [vmem:[#allocation8 + $0x968] sm:$0xf]  ;;  %v10008_v9 = vld [vmem:[#allocation8 + $0x980] sm:$0xf0]  ;;  %v9739_v45 = vld [vmem:[#allocation8 + $0x11c] sm:$0xf] }
 0x181   :  { %2950 = vmatpush.bf16.msrb.mxu3 %v7549_v15  ;;  %v8539_v15 = vld [vmem:[#allocation8 + $0x620] sm:$0xf]  ;;  %v2655_v26 = vadd.f32 %v10489_v46, %v2642_v23  ;;  %v8960_v13 = vor.u32 %v10008_v9, %v8959_v18  ;;  %v9753_v23 = vld [vmem:[#allocation8 + $0x18c] sm:$0xf]  ;;  %v9851_v9 = vld [vmem:[#allocation8 + $0x49c] sm:$0xf] }
 0x182   :  { %5222 = vmatpush.bf16.msrb.mxu0 %v8036_v22  ;;  %v10510_v22 = vpack.c.bf16 %v2971_v59, %v2971_v59  ;;  %v8540_v28 = vor.u32 %v9903_v16, %v8539_v15  ;;  %v8427_v15 = vld [vmem:[#allocation8 + $0x540] sm:$0xf]  ;;  %v9875_v16 = vld [vmem:[#allocation8 + $0x558] sm:$0xf0] }
 0x183   :  { %2938 = vmatpush.bf16.msrb.mxu1 %v7297_v34  ;;  %v8763_v34 = vld [vmem:[#allocation8 + $0x7e0] sm:$0xf]  ;;  %v2668_v46 = vadd.f32 %v10493_v58, %v2655_v26 }
 0x184   :  { %5210 = vmatpush.bf16.msra.mxu2 %v7784_v33  ;;  %v9896_v33 = vld [vmem:[#allocation8 + $0x600] sm:$0xf0]  ;;  %v10515_v35 = vpop.f32.mrf.mxu1  ;;  %v8764_v24 = vor.u32 %v9959_v21, %v8763_v34  ;;  %v7925_v34 = vld [vmem:[#allocation8 + $0x16c] sm:$0xf0]  ;;  %v7869_v18 = vld [vmem:[#allocation8 + $0xfc] sm:$0xf0] }
 0x185   :  { %2951 = vmatpush.bf16.msrb.mxu3 %v7521_v36  ;;  %v9015_v36 = vld [vmem:[#allocation8 + $0x9d8] sm:$0xf]  ;;  %v8512_v56 = vor.u32 %v9896_v33, %v8511_v31  ;;  %v2681_v6 = vadd.f32 %v10491_v48, %v2668_v46  ;;  %v8931_v48 = vld [vmem:[#allocation8 + $0x930] sm:$0xf]  ;;  %v9746_v33 = vld [vmem:[#allocation8 + $0x154] sm:$0xf] }
 0x186   :  { %5223 = vmatpush.bf16.msrb.mxu0 %v8008_v8  ;;  %2939 = vmatmul.bf16.vlgmr.msrb.gmra.mxu1 %v10410_v37  ;;  %v8568_v37 = vor.u32 %v9910_v4, %v8567_v3  ;;  %v9833_v8 = vld [vmem:[#allocation8 + $0x408] sm:$0xf0]  ;;  %v10518_v49 = vpop.f32.mrf.mxu0  ;;  %v9882_v4 = vld [vmem:[#allocation8 + $0x590] sm:$0xf0]  ;;  %v7928_v46 = vor.u32 %v9746_v33, %v7925_v34  ;;  %v8541_v34 = vld [vmem:[#allocation8 + $0x63c] sm:$0xf0] }
 0x187   :  { %5230 = vmatpush.bf16.msra.mxu1 %v8400_v39  ;;  %v10022_v39 = vld [vmem:[#allocation8 + $0x9f0] sm:$0xf0]  ;;  %v10521_v51 = vpop.f32.mrf.mxu3  ;;  %v2694_v14 = vadd.f32 %v10497_v29, %v2681_v6 }
 0x188   :  { %2952 = vmatmul.bf16.vlgmr.msrb.gmra.mxu3 %v10412_v41  ;;  %5211 = vmatpush.bf16.msra.mxu2 %v7756_v54  ;;  %v9966_v41 = vld [vmem:[#allocation8 + $0x830] sm:$0xf0]  ;;  %v9016_v42 = vor.u32 %v10022_v39, %v9015_v36  ;;  %v8987_v54 = vld [vmem:[#allocation8 + $0x9a0] sm:$0xf]  ;;  %v2707_v44 = vadd.f32 %v10521_v51, %v531_v55 }
 0x189   :  { %5243 = vmatpush.bf16.msra.mxu3 %v8624_v43  ;;  %v8792_v52 = vor.u32 %v9966_v41, %v8791_v20  ;;  %v8259_v43 = vld [vmem:[#allocation8 + $0x3f0] sm:$0xf]  ;;  %v8679_v20 = vld [vmem:[#allocation8 + $0x738] sm:$0xf]  ;;  %v9938_v41 = vld [vmem:[#allocation8 + $0x750] sm:$0xf0] }
 0x18a   :  { %5224 = vmatpush.bf16.msrb.mxu0 %v7980_v1  ;;  %v8260_v59 = vor.u32 %v9833_v8, %v8259_v43  ;;  %v8736_v1 = vor.u32 %v9952_v19, %v8735_v47  ;;  %v10523_v3 = vpop.f32.mrf.mxu2  ;;  %v2973_v31 = vmax.f32 %v2694_v14, 0.0  ;;  %v8680_v21 = vor.u32 %v9938_v41, %v8679_v20  ;;  %v8651_v39 = vld [vmem:[#allocation8 + $0x700] sm:$0xf]  ;;  %v8903_v43 = vld [vmem:[#allocation8 + $0x8f8] sm:$0xf] }
 0x18b   :  { %5231 = vmatpush.bf16.msra.mxu1 %v8372_v60  ;;  %5212 = vmatmul.bf16.vlgmr.msra.gmra.mxu2 %v10508_v11  ;;  %v8988_v60 = vor.u32 %v10015_v57, %v8987_v54  ;;  %v9994_v8 = vld [vmem:[#allocation8 + $0x910] sm:$0xf0]  ;;  %v7897_v54 = vld [vmem:[#allocation8 + $0x134] sm:$0xf0]  ;;  %v8875_v51 = vld [vmem:[#allocation8 + $0x8c0] sm:$0xf] }
 0x18c   :  { %5256 = vmatpush.bf16.msrb.mxu2 %v8848_v63  ;;  %v9826_v63 = vld [vmem:[#allocation8 + $0x3d0] sm:$0xf0]  ;;  %v2721_v58 = vpop.f32.mrf.mxu1  ;;  %v8904_v2 = vor.u32 %v9994_v8, %v8903_v43  ;;  %v10532_v19 = vpack.c.bf16 %v2973_v31, %v2973_v31  ;;  %v8317_v20 = vld [vmem:[#allocation8 + $0x47c] sm:$0xf0]  ;;  %v8289_v31 = vld [vmem:[#allocation8 + $0x444] sm:$0xf0] }
 0x18d   :  { %5244 = vmatpush.bf16.msra.mxu3 %v8596_v0  ;;  %5225 = vmatmul.bf16.vlgmr.msrb.gmra.mxu0 %v10510_v22  ;;  %v8455_v0 = vld [vmem:[#allocation8 + $0x578] sm:$0xf]  ;;  %v8232_v38 = vor.u32 %v9826_v63, %v8231_v62  ;;  %v9921_v62 = vld [vmem:[#allocation8 + $0x6cc] sm:$0xf]  ;;  %v2720_v63 = vadd.f32 %v10515_v35, %v2707_v44  ;;  %v9732_v58 = vld [vmem:[#allocation8 + $0xe4] sm:$0xf] }
 0x18e   :  { %5269 = vmatpush.bf16.msra.mxu0 %v9072_v10  ;;  %v8203_v10 = vld [vmem:[#allocation8 + $0x380] sm:$0xf]  ;;  %v2747_v50 = vpop.f32.mrf.mxu0  ;;  %v9914_v35 = vld [vmem:[#allocation8 + $0x694] sm:$0xf]  ;;  %v7872_v14 = vor.u32 %v9732_v58, %v7869_v18  ;;  %v8261_v8 = vld [vmem:[#allocation8 + $0x40c] sm:$0xf0] }
 0x18f   :  { %5232 = vmatpush.bf16.msra.mxu1 %v8344_v12  ;;  %v9819_v12 = vld [vmem:[#allocation8 + $0x398] sm:$0xf0]  ;;  %v9893_v44 = vld [vmem:[#allocation8 + $0x5ec] sm:$0xf] }
 0x190   :  { %5257 = vmatpush.bf16.msrb.mxu2 %v8820_v53  ;;  %v8708_v53 = vor.u32 %v9945_v5, %v8707_v7  ;;  %v8204_v29 = vor.u32 %v9819_v12, %v8203_v10  ;;  %v7900_v5 = vor.u32 %v9739_v45, %v7897_v54  ;;  %v2733_v10 = vadd.f32 %v10523_v3, %v2720_v63  ;;  %v8597_v12 = vld [vmem:[#allocation8 + $0x6ac] sm:$0xf0]  ;;  %v9907_v50 = vld [vmem:[#allocation8 + $0x65c] sm:$0xf]  ;;  %v9704_v54 = vld [vmem:[#allocation8 + $0x4] sm:$0xf] }
 0x191   :  { %5245 = vmatpush.bf16.msra.mxu3 %v8568_v37  ;;  %v8456_v37 = vor.u32 %v9882_v4, %v8455_v0  ;;  %v9886_v63 = vld [vmem:[#allocation8 + $0x5b4] sm:$0xf] }
 0x192   :  { %5270 = vmatpush.bf16.msra.mxu0 %v9044_v25  ;;  %v7953_v25 = vld [vmem:[#allocation8 + $0x1a4] sm:$0xf0]  ;;  %v2734_v26 = vpop.f32.mrf.mxu2  ;;  %v2746_v41 = vadd.f32 %v10518_v49, %v2733_v10  ;;  %v9900_v49 = vld [vmem:[#allocation8 + $0x624] sm:$0xf]  ;;  %v8821_v10 = vld [vmem:[#allocation8 + $0x86c] sm:$0xf0] }
 0x193   :  { %5233 = vmatpush.bf16.msra.mxu1 %v8316_v27  ;;  %v2708_v27 = vpop.f32.mrf.mxu3  ;;  %v7956_v36 = vor.u32 %v9753_v23, %v7953_v25  ;;  %v9718_v25 = vld [vmem:[#allocation8 + $0x74] sm:$0xf] }
 0x194   :  { %5258 = vmatpush.bf16.msrb.mxu2 %v8792_v52  ;;  %v8428_v52 = vor.u32 %v9875_v16, %v8427_v15  ;;  %v7841_v16 = vld [vmem:[#allocation8 + $0xc4] sm:$0xf0] }
 0x195   :  { %5246 = vmatpush.bf16.msra.mxu3 %v8540_v28  ;;  %v8932_v28 = vor.u32 %v10001_v17, %v8931_v48  ;;  %v8569_v48 = vld [vmem:[#allocation8 + $0x674] sm:$0xf0] }
 0x196   :  { %5271 = vmatpush.bf16.msra.mxu0 %v9016_v42  ;;  %v9865_v42 = vld [vmem:[#allocation8 + $0x50c] sm:$0xf]  ;;  %v8572_v23 = vor.u32 %v9907_v50, %v8569_v48  ;;  %v8793_v50 = vld [vmem:[#allocation8 + $0x834] sm:$0xf0]  ;;  %v9872_v48 = vld [vmem:[#allocation8 + $0x544] sm:$0xf] }
 0x197   :  { %5234 = vmatpush.bf16.msra.mxu1 %v8288_v40  ;;  %v9931_v40 = vld [vmem:[#allocation8 + $0x718] sm:$0xf0] }
 0x198   :  { %5259 = vmatpush.bf16.msrb.mxu2 %v8764_v24  ;;  %v10530_v24 = vpack.c.bf16 %v2972_v30, %v2972_v30  ;;  %v8652_v47 = vor.u32 %v9931_v40, %v8651_v39  ;;  %v9837_v30 = vld [vmem:[#allocation8 + $0x42c] sm:$0xf]  ;;  %v9711_v40 = vld [vmem:[#allocation8 + $0x3c] sm:$0xf] }
 0x199   :  { %5247 = vmatpush.bf16.msra.mxu3 %v8512_v56  ;;  %v8401_v56 = vld [vmem:[#allocation8 + $0x524] sm:$0xf0]  ;;  %v8292_v39 = vor.u32 %v9837_v30, %v8289_v31  ;;  %v9949_v30 = vld [vmem:[#allocation8 + $0x7ac] sm:$0xf] }
 0x19a   :  { %5272 = vmatpush.bf16.msra.mxu0 %v8988_v60  ;;  %v8404_v57 = vor.u32 %v9865_v42, %v8401_v56  ;;  %v8373_v60 = vld [vmem:[#allocation8 + $0x4ec] sm:$0xf0]  ;;  %v2784_v4 = vpop.f32.mrf.mxu2  ;;  %v7785_v42 = vld [vmem:[#allocation8 + $0x54] sm:$0xf0]  ;;  %v9830_v56 = vld [vmem:[#allocation8 + $0x3f4] sm:$0xf] }
 0x19b   :  { %5235 = vmatpush.bf16.msra.mxu1 %v8260_v59  ;;  %v9858_v59 = vld [vmem:[#allocation8 + $0x4d4] sm:$0xf]  ;;  %v8737_v31 = vld [vmem:[#allocation8 + $0x7c4] sm:$0xf0] }
 0x19c   :  { %5260 = vmatpush.bf16.msrb.mxu2 %v8736_v1  ;;  %v8625_v1 = vld [vmem:[#allocation8 + $0x6e4] sm:$0xf0]  ;;  %v8376_v6 = vor.u32 %v9858_v59, %v8373_v60 }
 0x19d   :  { %5248 = vmatpush.bf16.msra.mxu3 %v8484_v61  ;;  %v9987_v61 = vld [vmem:[#allocation8 + $0x8d8] sm:$0xf0]  ;;  %v8628_v7 = vor.u32 %v9921_v62, %v8625_v1 }
 0x19e   :  { %5273 = vmatpush.bf16.msra.mxu0 %v8960_v13  ;;  %v8876_v0 = vor.u32 %v9987_v61, %v8875_v51  ;;  %v8600_v13 = vor.u32 %v9914_v35, %v8597_v12  ;;  %v9977_v51 = vld [vmem:[#allocation8 + $0x88c] sm:$0xf]  ;;  %v8264_v61 = vor.u32 %v9830_v56, %v8261_v8  ;;  %v9816_v12 = vld [vmem:[#allocation8 + $0x384] sm:$0xf]  ;;  %v10047_v56 = vld [vmem:[#allocation8 + $0xabc] sm:$0xf] }
 0x19f   :  { %5236 = vmatpush.bf16.msra.mxu1 %v8232_v38  ;;  %v8345_v38 = vld [vmem:[#allocation8 + $0x4b4] sm:$0xf0] }
 0x1a0   :  { %5261 = vmatpush.bf16.msrb.mxu2 %v8708_v53  ;;  %v8348_v15 = vor.u32 %v9851_v9, %v8345_v38  ;;  %v9844_v53 = vld [vmem:[#allocation8 + $0x464] sm:$0xf]  ;;  %v9970_v38 = vld [vmem:[#allocation8 + $0x854] sm:$0xf] }
 0x1a1   :  { %5249 = vmatpush.bf16.msra.mxu3 %v8456_v37  ;;  %v9725_v37 = vld [vmem:[#allocation8 + $0xac] sm:$0xf]  ;;  %v8320_v27 = vor.u32 %v9844_v53, %v8317_v20  ;;  %v8824_v53 = vor.u32 %v9970_v38, %v8821_v10  ;;  %v9963_v20 = vld [vmem:[#allocation8 + $0x81c] sm:$0xf]  ;;  %v8407_v38 = vld [vmem:[#allocation8 + $0x510] sm:$0xf] }
 0x1a2   :  { %5274 = vmatpush.bf16.msra.mxu0 %v8932_v28  ;;  %v2786_v17 = vpop.f32.mrf.mxu2  ;;  %v7844_v3 = vor.u32 %v9725_v37, %v7841_v16  ;;  %v8457_v37 = vld [vmem:[#allocation8 + $0x594] sm:$0xf0]  ;;  %v9869_v10 = vld [vmem:[#allocation8 + $0x528] sm:$0xf0] }
 0x1a3   :  { %5237 = vmatpush.bf16.msra.mxu1 %v8204_v29  ;;  %v2771_v55 = vpop.f32.mrf.mxu1  ;;  %v7813_v29 = vld [vmem:[#allocation8 + $0x8c] sm:$0xf0]  ;;  %v8429_v17 = vld [vmem:[#allocation8 + $0x55c] sm:$0xf0] }
 0x1a4   :  { %5262 = vmatpush.bf16.msrb.mxu2 %v8680_v21  ;;  %v8544_v21 = vor.u32 %v9900_v49, %v8541_v34  ;;  %v8740_v49 = vor.u32 %v9949_v30, %v8737_v31  ;;  %v7959_v31 = vld [vmem:[#allocation8 + $0x190] sm:$0xf] }
 0x1a5   :  { %5250 = vmatpush.bf16.msra.mxu3 %v8428_v52 }
 0x1a6   :  { %5275 = vmatpush.bf16.msra.mxu0 %v8904_v2  ;;  %5238 = vmatmul.bf16.vlgmr.msra.gmra.mxu1 %v10530_v24  ;;  %v10539_v33 = vpop.f32.mrf.mxu0  ;;  %v8513_v2 = vld [vmem:[#allocation8 + $0x604] sm:$0xf0] }
 0x1a7   :  { %v2758_v28 = vpop.f32.mrf.mxu3  ;;  %v8516_v45 = vor.u32 %v9893_v44, %v8513_v2  ;;  %v9129_v44 = vld [vmem:[#allocation8 + $0xad4] sm:$0xf0]  ;;  %v9935_v2 = vld [vmem:[#allocation8 + $0x73c] sm:$0xf] }
 0x1a8   :  { %5251 = vmatmul.bf16.vlgmr.msra.gmra.mxu3 %v10532_v19  ;;  %5263 = vmatpush.bf16.msrb.mxu2 %v8652_v47  ;;  %v2759_v52 = vadd.f32 %v2758_v28, %v2746_v41  ;;  %v8765_v28 = vld [vmem:[#allocation8 + $0x7fc] sm:$0xf0] }
 0x1a9   :  { %5295 = vmatpush.bf16.msrb.mxu3 %v7956_v36  ;;  %v7816_v36 = vor.u32 %v9718_v25, %v7813_v29  ;;  %v8796_v25 = vor.u32 %v9963_v20, %v8793_v50  ;;  %v8408_v20 = vor.u32 %v9869_v10, %v8407_v38  ;;  %v9806_v50 = vld [vmem:[#allocation8 + $0x330] sm:$0xf0] }
 0x1aa   :  { %5276 = vmatpush.bf16.msra.mxu0 %v8876_v0  ;;  %v2772_v26 = vadd.f32 %v2771_v55, %v2759_v52  ;;  %v8485_v0 = vld [vmem:[#allocation8 + $0x5cc] sm:$0xf0]  ;;  %v9774_v10 = vld [vmem:[#allocation8 + $0x234] sm:$0xf] }
 0x1ab   :  { %v2773_v62 = vpop.f32.mrf.mxu1 }
 0x1ac   :  { %5321 = vmatpush.bf16.msra.mxu2 %v8404_v57  ;;  %v2785_v43 = vadd.f32 %v2784_v4, %v2772_v26  ;;  %v7757_v57 = vld [vmem:[#allocation8 + $0x1c] sm:$0xf0]  ;;  %v8849_v4 = vld [vmem:[#allocation8 + $0x8a4] sm:$0xf0]  ;;  %v9942_v26 = vld [vmem:[#allocation8 + $0x774] sm:$0xf] }
 0x1ad   :  { %5296 = vmatpush.bf16.msrb.mxu3 %v7928_v46  ;;  %v7788_v46 = vor.u32 %v9711_v40, %v7785_v42  ;;  %v7760_v18 = vor.u32 %v9704_v54, %v7757_v57  ;;  %v8852_v9 = vor.u32 %v9977_v51, %v8849_v4  ;;  %v9127_v40 = vld [vmem:[#allocation8 + $0xab8] sm:$0xf]  ;;  %v10050_v42 = vld [vmem:[#allocation8 + $0xad0] sm:$0xf0]  ;;  %v9928_v54 = vld [vmem:[#allocation8 + $0x704] sm:$0xf] }
 0x1ae   :  { %5334 = vmatpush.bf16.msrb.mxu0 %v8628_v7  ;;  %v2974_v47 = vmax.f32 %v2785_v43, 0.0  ;;  %v2810_v59 = vpop.f32.mrf.mxu2  ;;  %v9823_v7 = vld [vmem:[#allocation8 + $0x3bc] sm:$0xf]  ;;  %v2799_v58 = vpop.f32.mrf.mxu0  ;;  %v9128_v8 = vor.u32 %v10050_v42, %v9127_v40  ;;  %v8653_v57 = vld [vmem:[#allocation8 + $0x71c] sm:$0xf0] }
 0x1af   :  { %v2760_v60 = vpop.f32.mrf.mxu3  ;;  %v9809_v4 = vld [vmem:[#allocation8 + $0x34c] sm:$0xf]  ;;  %v9788_v42 = vld [vmem:[#allocation8 + $0x2a4] sm:$0xf] }
 0x1b0   :  { %5322 = vmatpush.bf16.msra.mxu2 %v8376_v6  ;;  %v10541_v1 = vpack.c.bf16 %v2974_v47, %v2974_v47  ;;  %v8488_v6 = vor.u32 %v9886_v63, %v8485_v0  ;;  %v9132_v47 = vor.u32 %v10047_v56, %v9129_v44  ;;  %5288 = vmatpush.bf16.msrb.mxu1 %v9128_v8  ;;  %v10043_v60 = vld [vmem:[#allocation8 + $0xa98] sm:$0xf0]  ;;  %v10040_v63 = vld [vmem:[#allocation8 + $0xa84] sm:$0xf]  ;;  %v9101_v0 = vld [vmem:[#allocation8 + $0xa9c] sm:$0xf0] }
 0x1b1   :  { %5297 = vmatpush.bf16.msrb.mxu3 %v7900_v5  ;;  %v8233_v5 = vld [vmem:[#allocation8 + $0x3d4] sm:$0xf0]  ;;  %v9104_v58 = vor.u32 %v10040_v63, %v9101_v0  ;;  %v8093_v56 = vld [vmem:[#allocation8 + $0x2bc] sm:$0xf0] }
 0x1b2   :  { %5335 = vmatpush.bf16.msrb.mxu0 %v8600_v13  ;;  %5264 = vmatmul.bf16.vlgmr.msrb.gmra.mxu2 %v10541_v1  ;;  %v8236_v35 = vor.u32 %v9823_v7, %v8233_v5  ;;  %v8205_v13 = vld [vmem:[#allocation8 + $0x39c] sm:$0xf0]  ;;  %v7931_v8 = vld [vmem:[#allocation8 + $0x158] sm:$0xf]  ;;  %v8096_v44 = vor.u32 %v9788_v42, %v8093_v56 }
 0x1b3   :  { %v8208_v41 = vor.u32 %v9816_v12, %v8205_v13  ;;  %v7819_v56 = vld [vmem:[#allocation8 + $0x78] sm:$0xf] }
 0x1b4   :  { %5323 = vmatpush.bf16.msra.mxu2 %v8348_v15 }
 0x1b5   :  { %5298 = vmatpush.bf16.msrb.mxu3 %v7872_v14  ;;  %v9879_v14 = vld [vmem:[#allocation8 + $0x57c] sm:$0xf] }
 0x1b6   :  { %5336 = vmatpush.bf16.msrb.mxu0 %v8572_v23  ;;  %v8460_v15 = vor.u32 %v9879_v14, %v8457_v37  ;;  %v2812_v16 = vpop.f32.mrf.mxu2  ;;  %v8432_v23 = vor.u32 %v9872_v48, %v8429_v17  ;;  %v8656_v37 = vor.u32 %v9928_v54, %v8653_v57  ;;  %v8379_v48 = vld [vmem:[#allocation8 + $0x4d8] sm:$0xf]  ;;  %v9862_v17 = vld [vmem:[#allocation8 + $0x4f0] sm:$0xf0]  ;;  %v8323_v54 = vld [vmem:[#allocation8 + $0x468] sm:$0xf] }
 0x1b7   :  { %v8149_v16 = vld [vmem:[#allocation8 + $0x32c] sm:$0xf0]  ;;  %v8380_v30 = vor.u32 %v9862_v17, %v8379_v48  ;;  %v9848_v57 = vld [vmem:[#allocation8 + $0x480] sm:$0xf0]  ;;  %v9767_v17 = vld [vmem:[#allocation8 + $0x1fc] sm:$0xf] }
 0x1b8   :  { %5324 = vmatpush.bf16.msra.mxu2 %v8320_v27  ;;  %v9956_v27 = vld [vmem:[#allocation8 + $0x7e4] sm:$0xf]  ;;  %v8324_v63 = vor.u32 %v9848_v57, %v8323_v54  ;;  %v9135_v57 = vld [vmem:[#allocation8 + $0xac0] sm:$0xf] }
 0x1b9   :  { %5299 = vmatpush.bf16.msrb.mxu3 %v7844_v3  ;;  %v532_v3 = vperm.slane %v10499_v32, 5  ;;  %v8768_v29 = vor.u32 %v9956_v27, %v8765_v28  ;;  %v9795_v27 = vld [vmem:[#allocation8 + $0x2dc] sm:$0xf]  ;;  %v8121_v28 = vld [vmem:[#allocation8 + $0x2f4] sm:$0xf0] }
 0x1ba   :  { %5337 = vmatpush.bf16.msrb.mxu0 %v8544_v21 }
 0x1bb   :  { %v2798_v55 = vadd.f32 %v10539_v33, %v532_v3 }
 0x1bc   :  { %5325 = vmatpush.bf16.msra.mxu2 %v8292_v39 }
 0x1bd   :  { %5300 = vmatpush.bf16.msrb.mxu3 %v7816_v36  ;;  %v2811_v52 = vadd.f32 %v2810_v59, %v2798_v55  ;;  %v8709_v36 = vld [vmem:[#allocation8 + $0x78c] sm:$0xf0]  ;;  %v9099_v59 = vld [vmem:[#allocation8 + $0xa80] sm:$0xf] }
 0x1be   :  { %5338 = vmatpush.bf16.msrb.mxu0 %v8516_v45  ;;  %v8712_v33 = vor.u32 %v9942_v26, %v8709_v36  ;;  %v8681_v45 = vld [vmem:[#allocation8 + $0x754] sm:$0xf0]  ;;  %v9100_v62 = vor.u32 %v10043_v60, %v9099_v59  ;;  %v8127_v55 = vld [vmem:[#allocation8 + $0x2e0] sm:$0xf]  ;;  %v9855_v36 = vld [vmem:[#allocation8 + $0x4b8] sm:$0xf0] }
 0x1bf   :  { %v8351_v26 = vld [vmem:[#allocation8 + $0x4a0] sm:$0xf]  ;;  %v9781_v60 = vld [vmem:[#allocation8 + $0x26c] sm:$0xf] }
 0x1c0   :  { %5326 = vmatpush.bf16.msra.mxu2 %v8264_v61  ;;  %v8684_v61 = vor.u32 %v9935_v2, %v8681_v45  ;;  %5289 = vmatpush.bf16.msrb.mxu1 %v9100_v62  ;;  %v8099_v2 = vld [vmem:[#allocation8 + $0x2a8] sm:$0xf]  ;;  %v9792_v45 = vld [vmem:[#allocation8 + $0x2c0] sm:$0xf0] }
 0x1c1   :  { %5301 = vmatpush.bf16.msrb.mxu3 %v7788_v46  ;;  %v8100_v59 = vor.u32 %v9792_v45, %v8099_v2  ;;  %v8211_v2 = vld [vmem:[#allocation8 + $0x388] sm:$0xf]  ;;  %v9820_v45 = vld [vmem:[#allocation8 + $0x3a0] sm:$0xf0] }
 0x1c2   :  { %5339 = vmatpush.bf16.msrb.mxu0 %v8488_v6  ;;  %v8177_v6 = vld [vmem:[#allocation8 + $0x364] sm:$0xf0] }
 0x1c3   :  { %v2836_v21 = vpop.f32.mrf.mxu1  ;;  %v8180_v12 = vor.u32 %v9809_v4, %v8177_v6  ;;  %v7903_v4 = vld [vmem:[#allocation8 + $0x120] sm:$0xf]  ;;  %v8295_v6 = vld [vmem:[#allocation8 + $0x430] sm:$0xf] }
 0x1c4   :  { %5327 = vmatpush.bf16.msra.mxu2 %v8236_v35 }
 0x1c5   :  { %5302 = vmatpush.bf16.msrb.mxu3 %v7760_v18  ;;  %v8183_v18 = vld [vmem:[#allocation8 + $0x350] sm:$0xf]  ;;  %5308 = vmatpush.bf16.msra.mxu1 %v8180_v12  ;;  %v8043_v12 = vld [vmem:[#allocation8 + $0x238] sm:$0xf] }
 0x1c6   :  { %5340 = vmatpush.bf16.msrb.mxu0 %v8460_v15  ;;  %v2849_v39 = vpop.f32.mrf.mxu0  ;;  %v9802_v15 = vld [vmem:[#allocation8 + $0x314] sm:$0xf] }
 0x1c7   :  { %v2823_v34 = vpop.f32.mrf.mxu3 }
 0x1c8   :  { %5303 = vmatmul.bf16.vlgmr.msrb.gmra.mxu3 %v10508_v11  ;;  %5328 = vmatpush.bf16.msra.mxu2 %v8208_v41  ;;  %v2824_v43 = vadd.f32 %v2823_v34, %v2811_v52  ;;  %v8152_v41 = vor.u32 %v9802_v15, %v8149_v16  ;;  %v8124_v52 = vor.u32 %v9795_v27, %v8121_v28  ;;  %v9778_v16 = vld [vmem:[#allocation8 + $0x250] sm:$0xf0]  ;;  %v7847_v27 = vld [vmem:[#allocation8 + $0xb0] sm:$0xf] }
 0x1c9   :  { %5347 = vmatpush.bf16.msra.mxu3 %v8852_v9  ;;  %v9813_v9 = vld [vmem:[#allocation8 + $0x368] sm:$0xf0]  ;;  %v8044_v48 = vor.u32 %v9778_v16, %v8043_v12  ;;  %v9708_v12 = vld [vmem:[#allocation8 + $0x20] sm:$0xf0] }
 0x1ca   :  { %5341 = vmatpush.bf16.msrb.mxu0 %v8432_v23  ;;  %v2837_v51 = vadd.f32 %v2836_v21, %v2824_v43  ;;  %v8184_v13 = vor.u32 %v9813_v9, %v8183_v18  ;;  %5309 = vmatpush.bf16.msra.mxu1 %v8152_v41  ;;  %v9757_v21 = vld [vmem:[#allocation8 + $0x1a8] sm:$0xf0]  ;;  %v8267_v41 = vld [vmem:[#allocation8 + $0x3f8] sm:$0xf] }
 0x1cb   :  { %5329 = vmatmul.bf16.vlgmr.msra.gmra.mxu2 %v10530_v24  ;;  %v2838_v5 = vpop.f32.mrf.mxu1  ;;  %v7960_v43 = vor.u32 %v9757_v21, %v7959_v31  ;;  %v9841_v18 = vld [vmem:[#allocation8 + $0x448] sm:$0xf0]  ;;  %v8239_v31 = vld [vmem:[#allocation8 + $0x3c0] sm:$0xf]  ;;  %v9760_v21 = vld [vmem:[#allocation8 + $0x1c4] sm:$0xf] }
 0x1cc   :  { %5379 = vmatpush.bf16.msrb.mxu2 %v9132_v47  ;;  %v2850_v14 = vadd.f32 %v2849_v39, %v2837_v51  ;;  %v8065_v51 = vld [vmem:[#allocation8 + $0x284] sm:$0xf0]  ;;  %v9785_v5 = vld [vmem:[#allocation8 + $0x288] sm:$0xf0] }
 0x1cd   :  { %5348 = vmatpush.bf16.msra.mxu3 %v8824_v53  ;;  %v8155_v53 = vld [vmem:[#allocation8 + $0x318] sm:$0xf] }
 0x1ce   :  { %v2862_v46 = vpop.f32.mrf.mxu2  ;;  %v2851_v35 = vpop.f32.mrf.mxu0  ;;  %v8156_v23 = vor.u32 %v9806_v50, %v8155_v53  ;;  %5310 = vmatpush.bf16.msra.mxu1 %v8124_v52  ;;  %v9834_v50 = vld [vmem:[#allocation8 + $0x410] sm:$0xf0]  ;;  %v9827_v52 = vld [vmem:[#allocation8 + $0x3d8] sm:$0xf0] }
 0x1cf   :  { %v2825_v7 = vpop.f32.mrf.mxu3  ;;  %v8037_v35 = vld [vmem:[#allocation8 + $0x24c] sm:$0xf0]  ;;  %v8240_v42 = vor.u32 %v9827_v52, %v8239_v31 }
 0x1d0   :  { %5380 = vmatpush.bf16.msrb.mxu2 %v9104_v58  ;;  %v8068_v7 = vor.u32 %v9781_v60, %v8065_v51  ;;  %v9743_v58 = vld [vmem:[#allocation8 + $0x138] sm:$0xf0]  ;;  %v8040_v15 = vor.u32 %v9774_v10, %v8037_v35  ;;  %v8212_v51 = vor.u32 %v9820_v45, %v8211_v2  ;;  %v7763_v35 = vld [vmem:[#allocation8 + $0x8] sm:$0xf] }
 0x1d1   :  { %5349 = vmatpush.bf16.msra.mxu3 %v8796_v25  ;;  %v2863_v25 = vadd.f32 %v2862_v46, %v2850_v14  ;;  %v9750_v46 = vld [vmem:[#allocation8 + $0x170] sm:$0xf0]  ;;  %v8296_v14 = vor.u32 %v9841_v18, %v8295_v6 }
 0x1d2   :  { %5311 = vmatpush.bf16.msra.mxu1 %v8096_v44  ;;  %v7932_v62 = vor.u32 %v9750_v46, %v7931_v8  ;;  %v9722_v44 = vld [vmem:[#allocation8 + $0x90] sm:$0xf0] }
 0x1d3   :  { %v7820_v60 = vor.u32 %v9722_v44, %v7819_v56  ;;  %v9782_v56 = vld [vmem:[#allocation8 + $0x274] sm:$0xf] }
 0x1d4   :  { %5399 = vmatpush.bf16.msra.mxu2 %v8184_v13  ;;  %v7904_v13 = vor.u32 %v9743_v58, %v7903_v4  ;;  %v10044_v4 = vld [vmem:[#allocation8 + $0xaa0] sm:$0xf0]  ;;  %v8185_v58 = vld [vmem:[#allocation8 + $0x36c] sm:$0xf0] }
 0x1d5   :  { %5350 = vmatpush.bf16.msra.mxu3 %v8768_v29 }
 0x1d6   :  { %v2864_v3 = vpop.f32.mrf.mxu2  ;;  %5312 = vmatpush.bf16.msra.mxu1 %v8068_v7  ;;  %v533_v7 = vperm.slane %v10499_v32, 6  ;;  %v9803_v32 = vld [vmem:[#allocation8 + $0x31c] sm:$0xf] }
 0x1d7   :  { %v2875_v29 = vpop.f32.mrf.mxu3 }
 0x1d8   :  { %5400 = vmatpush.bf16.msra.mxu2 %v8156_v23  ;;  %v2876_v34 = vadd.f32 %v2875_v29, %v2863_v25  ;;  %v8009_v23 = vld [vmem:[#allocation8 + $0x214] sm:$0xf0]  ;;  %v8268_v25 = vor.u32 %v9834_v50, %v8267_v41  ;;  %v9771_v29 = vld [vmem:[#allocation8 + $0x218] sm:$0xf0]  ;;  %v7764_v41 = vor.u32 %v9708_v12, %v7763_v35  ;;  %v9768_v12 = vld [vmem:[#allocation8 + $0x204] sm:$0xf] }
 0x1d9   :  { %5351 = vmatpush.bf16.msra.mxu3 %v8740_v49  ;;  %v9799_v49 = vld [vmem:[#allocation8 + $0x2f8] sm:$0xf0]  ;;  %v8012_v28 = vor.u32 %v9767_v17, %v8009_v23  ;;  %v8827_v17 = vld [vmem:[#allocation8 + $0x858] sm:$0xf]  ;;  %v9974_v23 = vld [vmem:[#allocation8 + $0x870] sm:$0xf0] }
 0x1da   :  { %v8128_v39 = vor.u32 %v9799_v49, %v8127_v55  ;;  %v2975_v40 = vmax.f32 %v2876_v34, 0.0  ;;  %5313 = vmatpush.bf16.msra.mxu1 %v8040_v15  ;;  %v8015_v55 = vld [vmem:[#allocation8 + $0x200] sm:$0xf]  ;;  %v9981_v15 = vld [vmem:[#allocation8 + $0x8a8] sm:$0xf0] }
 0x1db   :  { %v8016_v49 = vor.u32 %v9771_v29, %v8015_v55  ;;  %v8828_v55 = vor.u32 %v9974_v23, %v8827_v17  ;;  %v8799_v29 = vld [vmem:[#allocation8 + $0x820] sm:$0xf] }
 0x1dc   :  { %5401 = vmatpush.bf16.msra.mxu2 %v8128_v39  ;;  %v10549_v47 = vpack.c.bf16 %v2975_v40, %v2975_v40 }
 0x1dd   :  { %5352 = vmatpush.bf16.msra.mxu3 %v8712_v33  ;;  %v8352_v33 = vor.u32 %v9855_v36, %v8351_v26  ;;  %v7981_v26 = vld [vmem:[#allocation8 + $0x1dc] sm:$0xf0]  ;;  %v7987_v36 = vld [vmem:[#allocation8 + $0x1c8] sm:$0xf] }
 0x1de   :  { %5277 = vmatmul.bf16.vlgmr.msra.gmra.mxu0 %v10549_v47  ;;  %5314 = vmatpush.bf16.msra.mxu1 %v8012_v28 }
 0x1df   :  { %5386 = vmatpush.bf16.msra.mxu0 %v7960_v43  ;;  %v2877_v0 = vpop.f32.mrf.mxu3  ;;  %v7984_v43 = vor.u32 %v9760_v21, %v7981_v26 }
 0x1e0   :  { %5402 = vmatpush.bf16.msra.mxu2 %v8100_v59  ;;  %v10051_v59 = vld [vmem:[#allocation8 + $0xad8] sm:$0xf0]  ;;  %v9107_v0 = vld [vmem:[#allocation8 + $0xa88] sm:$0xf] }
 0x1e1   :  { %5353 = vmatpush.bf16.msra.mxu3 %v8684_v61  ;;  %v8071_v61 = vld [vmem:[#allocation8 + $0x270] sm:$0xf]  ;;  %v9108_v10 = vor.u32 %v10044_v4, %v9107_v0  ;;  %v9073_v4 = vld [vmem:[#allocation8 + $0xa64] sm:$0xf0] }
 0x1e2   :  { %v8072_v9 = vor.u32 %v9785_v5, %v8071_v61  ;;  %5315 = vmatpush.bf16.msra.mxu1 %v7984_v43  ;;  %v9136_v61 = vor.u32 %v10051_v59, %v9135_v57  ;;  %v9810_v5 = vld [vmem:[#allocation8 + $0x354] sm:$0xf]  ;;  %v8073_v43 = vld [vmem:[#allocation8 + $0x28c] sm:$0xf0]  ;;  %v9953_v57 = vld [vmem:[#allocation8 + $0x7c8] sm:$0xf0] }
 0x1e3   :  { %v10552_v38 = vpop.f32.mrf.mxu1  ;;  %5387 = vmatpush.bf16.msra.mxu0 %v7932_v62  ;;  %v7791_v62 = vld [vmem:[#allocation8 + $0x40] sm:$0xf]  ;;  %v8076_v45 = vor.u32 %v9782_v56, %v8073_v43  ;;  %v9866_v56 = vld [vmem:[#allocation8 + $0x514] sm:$0xf]  ;;  %v8409_v43 = vld [vmem:[#allocation8 + $0x52c] sm:$0xf0] }
 0x1e4   :  { %5403 = vmatpush.bf16.msra.mxu2 %v8072_v9  ;;  %v2889_v16 = vadd.f32 %v10552_v38, %v533_v7  ;;  %v9079_v7 = vld [vmem:[#allocation8 + $0xa50] sm:$0xf] }
 0x1e5   :  { %5354 = vmatpush.bf16.msra.mxu3 %v8656_v37  ;;  %v7875_v37 = vld [vmem:[#allocation8 + $0xe8] sm:$0xf] }
 0x1e6   :  { %v10554_v53 = vpop.f32.mrf.mxu0 }
 0x1e7   :  { %5388 = vmatpush.bf16.msra.mxu0 %v7904_v13 }
 0x1e8   :  { %5355 = vmatmul.bf16.vlgmr.msra.gmra.mxu3 %v10541_v1  ;;  %5404 = vmatpush.bf16.msra.mxu2 %v8044_v48 }
 0x1e9   :  { %5412 = vmatpush.bf16.msrb.mxu3 %v8408_v20  ;;  %v9736_v20 = vld [vmem:[#allocation8 + $0x100] sm:$0xf0] }
 0x1ea   :  { %v7876_v3 = vor.u32 %v9736_v20, %v7875_v37  ;;  %v8855_v37 = vld [vmem:[#allocation8 + $0x890] sm:$0xf]  ;;  %v8157_v20 = vld [vmem:[#allocation8 + $0x334] sm:$0xf0] }
 0x1eb   :  { %v2890_v34 = vpop.f32.mrf.mxu1  ;;  %v2901_v39 = vpop.f32.mrf.mxu3  ;;  %v8856_v50 = vor.u32 %v9981_v15, %v8855_v37  ;;  %v8160_v48 = vor.u32 %v9803_v32, %v8157_v20  ;;  %v10026_v15 = vld [vmem:[#allocation8 + $0xa14] sm:$0xf] }
 0x1ec   :  { %5389 = vmatpush.bf16.msra.mxu0 %v7876_v3  ;;  %5405 = vmatpush.bf16.msra.mxu2 %v8016_v49  ;;  %v2902_v3 = vadd.f32 %v2901_v39, %v2889_v16  ;;  %v9789_v49 = vld [vmem:[#allocation8 + $0x2ac] sm:$0xf]  ;;  %v8101_v34 = vld [vmem:[#allocation8 + $0x2c4] sm:$0xf0]  ;;  %v9960_v39 = vld [vmem:[#allocation8 + $0x800] sm:$0xf0] }
 0x1ed   :  { %5413 = vmatpush.bf16.msrb.mxu3 %v8380_v30  ;;  %v9729_v30 = vld [vmem:[#allocation8 + $0xc8] sm:$0xf0]  ;;  %v8104_v26 = vor.u32 %v9789_v49, %v8101_v34  ;;  %v9017_v34 = vld [vmem:[#allocation8 + $0x9f4] sm:$0xf0] }
 0x1ee   :  { %v7848_v40 = vor.u32 %v9729_v30, %v7847_v27  ;;  %v2916_v8 = vpop.f32.mrf.mxu0  ;;  %v10556_v46 = vpop.f32.mrf.mxu2  ;;  %5342 = vmatmul.bf16.vlgmr.msrb.gmra.mxu0 %v10532_v19  ;;  %v8129_v27 = vld [vmem:[#allocation8 + $0x2fc] sm:$0xf0]  ;;  %v9967_v30 = vld [vmem:[#allocation8 + $0x838] sm:$0xf0]  ;;  %v2915_v31 = vadd.f32 %v10554_v53, %v2902_v3 }
 0x1ef   :  { %v8800_v21 = vor.u32 %v9967_v30, %v8799_v29  ;;  %v8687_v3 = vld [vmem:[#allocation8 + $0x740] sm:$0xf]  ;;  %v10019_v29 = vld [vmem:[#allocation8 + $0x9dc] sm:$0xf]  ;;  %v10034_v30 = vld [vmem:[#allocation8 + $0xa54] sm:$0xf] }
 0x1f0   :  { %5390 = vmatpush.bf16.msra.mxu0 %v7848_v40  ;;  %v2928_v40 = vadd.f32 %v10556_v46, %v2915_v31  ;;  %v9081_v31 = vld [vmem:[#allocation8 + $0xa6c] sm:$0xf0] }
 0x1f1   :  { %5414 = vmatpush.bf16.msrb.mxu3 %v8352_v33  ;;  %v9764_v33 = vld [vmem:[#allocation8 + $0x1e0] sm:$0xf0] }
 0x1f2   :  { %v7988_v54 = vor.u32 %v9764_v33, %v7987_v36  ;;  %v8771_v36 = vld [vmem:[#allocation8 + $0x7e8] sm:$0xf] }
 0x1f3   :  { %v2903_v6 = vpop.f32.mrf.mxu3  ;;  %v8772_v53 = vor.u32 %v9960_v39, %v8771_v36  ;;  %v8659_v39 = vld [vmem:[#allocation8 + $0x708] sm:$0xf] }
 0x1f4   :  { %5406 = vmatpush.bf16.msra.mxu2 %v7988_v54  ;;  %5391 = vmatpush.bf16.msra.mxu0 %v7820_v60  ;;  %v8743_v54 = vld [vmem:[#allocation8 + $0x7b0] sm:$0xf] }
 0x1f5   :  { %5415 = vmatpush.bf16.msrb.mxu3 %v8324_v63  ;;  %v9715_v63 = vld [vmem:[#allocation8 + $0x58] sm:$0xf0]  ;;  %v8744_v0 = vor.u32 %v9953_v57, %v8743_v54  ;;  %v8989_v54 = vld [vmem:[#allocation8 + $0x9bc] sm:$0xf0]  ;;  %v8995_v57 = vld [vmem:[#allocation8 + $0x9a8] sm:$0xf] }
 0x1f6   :  { %v7792_v18 = vor.u32 %v9715_v63, %v7791_v62  ;;  %v2966_v9 = vpop.f32.mrf.mxu0  ;;  %v2929_v13 = vpop.f32.mrf.mxu2  ;;  %v10033_v62 = vld [vmem:[#allocation8 + $0xa4c] sm:$0xf] }
 0x1f7   :  { %v8017_v13 = vld [vmem:[#allocation8 + $0x21c] sm:$0xf0] }
 0x1f8   :  { %5392 = vmatpush.bf16.msra.mxu0 %v7792_v18  ;;  %v8715_v18 = vld [vmem:[#allocation8 + $0x778] sm:$0xf]  ;;  %v8020_v23 = vor.u32 %v9768_v12, %v8017_v13 }
 0x1f9   :  { %5416 = vmatpush.bf16.msrb.mxu3 %v8296_v14  ;;  %v8188_v14 = vor.u32 %v9810_v5, %v8185_v58  ;;  %v10037_v5 = vld [vmem:[#allocation8 + $0xa68] sm:$0xf0] }
 0x1fa   :  { %v9080_v37 = vor.u32 %v10037_v5, %v9079_v7  ;;  %v8967_v7 = vld [vmem:[#allocation8 + $0x970] sm:$0xf]  ;;  %v10009_v5 = vld [vmem:[#allocation8 + $0x988] sm:$0xf0] }
 0x1fc   :  { %5393 = vmatpush.bf16.msra.mxu0 %v7764_v41  ;;  %v9045_v41 = vld [vmem:[#allocation8 + $0xa2c] sm:$0xf0] }
 0x1fd   :  { %5417 = vmatpush.bf16.msrb.mxu3 %v8268_v25  ;;  %v9796_v25 = vld [vmem:[#allocation8 + $0x2e4] sm:$0xf] }
 0x1fe   :  { %v2968_v28 = vpop.f32.mrf.mxu0  ;;  %v8132_v38 = vor.u32 %v9796_v25, %v8129_v27  ;;  %v9939_v25 = vld [vmem:[#allocation8 + $0x758] sm:$0xf0]  ;;  %v9761_v27 = vld [vmem:[#allocation8 + $0x1cc] sm:$0xf] }
 0x1ff   :  { %5394 = vmatmul.bf16.vlgmr.msra.gmra.mxu0 %v10508_v11  ;;  %v7989_v28 = vld [vmem:[#allocation8 + $0x1e4] sm:$0xf0]  ;;  %v8688_v49 = vor.u32 %v9939_v25, %v8687_v3  ;;  %v9845_v3 = vld [vmem:[#allocation8 + $0x46c] sm:$0xf] }
 0x200   :  { %5438 = vmatpush.bf16.msrb.mxu0 %v8856_v50  ;;  %v9051_v50 = vld [vmem:[#allocation8 + $0xa18] sm:$0xf]  ;;  %v7992_v36 = vor.u32 %v9761_v27, %v7989_v28  ;;  %v8325_v25 = vld [vmem:[#allocation8 + $0x484] sm:$0xf0] }
 0x201   :  { %5418 = vmatpush.bf16.msrb.mxu3 %v8240_v42  ;;  %v3384_v42 = vld [vmem:[#allocation10] sm:$0x7f] }
 0x202   :  { %v3386_v2 = vperm.slane %v3384_v42, 0  ;;  %v9084_v42 = vor.u32 %v10034_v30, %v9081_v31  ;;  %v8328_v31 = vor.u32 %v9845_v3, %v8325_v25  ;;  %v8577_v3 = vld [vmem:[#allocation8 + $0x67c] sm:$0xf0]  ;;  %v8639_v25 = vld [vmem:[#allocation8 + $0x6d8] sm:$0xf] }
 0x203   :  { %v2940_v52 = vpop.f32.mrf.mxu1 }
 0x204   :  { %5439 = vmatpush.bf16.msrb.mxu0 %v8828_v55  ;;  %v2941_v33 = vadd.f32 %v2940_v52, %v2928_v40  ;;  %v9048_v55 = vor.u32 %v10026_v15, %v9045_v41  ;;  %v9932_v40 = vld [vmem:[#allocation8 + $0x720] sm:$0xf0]  ;;  %v10002_v41 = vld [vmem:[#allocation8 + $0x950] sm:$0xf0] }
 0x205   :  { %5419 = vmatpush.bf16.msrb.mxu3 %v8212_v51  ;;  %v9775_v51 = vld [vmem:[#allocation8 + $0x23c] sm:$0xf] }
 0x208   :  { %5420 = vmatmul.bf16.vlgmr.msrb.gmra.mxu3 %v10530_v24  ;;  %5440 = vmatpush.bf16.msrb.mxu0 %v8800_v21  ;;  %v9023_v21 = vld [vmem:[#allocation8 + $0x9e0] sm:$0xf] }
 0x209   :  { %5470 = vmatpush.bf16.msra.mxu3 %v9136_v61  ;;  %v8045_v61 = vld [vmem:[#allocation8 + $0x254] sm:$0xf0] }
 0x20a   :  { %v5226_v8 = vpop.f32.mrf.mxu0  ;;  %v8048_v6 = vor.u32 %v9775_v51, %v8045_v61  ;;  %v9859_v61 = vld [vmem:[#allocation8 + $0x4dc] sm:$0xf] }
 0x20b   :  { %v2953_v44 = vpop.f32.mrf.mxu3  ;;  %v2942_v60 = vpop.f32.mrf.mxu1 }
 0x20c   :  { %v2954_v59 = vadd.f32 %v2953_v44, %v2941_v33  ;;  %5441 = vmatpush.bf16.msrb.mxu0 %v8772_v53  ;;  %v9020_v33 = vor.u32 %v10019_v29, %v9017_v34  ;;  %v10012_v53 = vld [vmem:[#allocation8 + $0x9a4] sm:$0xf]  ;;  %v10027_v44 = vld [vmem:[#allocation8 + $0xa1c] sm:$0xf]  ;;  %v8412_v60 = vor.u32 %v9866_v56, %v8409_v43  ;;  %v8969_v34 = vld [vmem:[#allocation8 + $0x98c] sm:$0xf0] }
 0x20d   :  { %5471 = vmatpush.bf16.msra.mxu3 %v9108_v10  ;;  %v9946_v10 = vld [vmem:[#allocation8 + $0x790] sm:$0xf0]  ;;  %v9995_v29 = vld [vmem:[#allocation8 + $0x918] sm:$0xf0]  ;;  %v9984_v56 = vld [vmem:[#allocation8 + $0x8c4] sm:$0xf] }
 0x20e   :  { %v2967_v63 = vadd.f32 %v2966_v9, %v2954_v59  ;;  %v5213_v46 = vpop.f32.mrf.mxu2  ;;  %v8716_v20 = vor.u32 %v9946_v10, %v8715_v18  ;;  %v10016_v59 = vld [vmem:[#allocation8 + $0x9c0] sm:$0xf0]  ;;  %v9025_v18 = vld [vmem:[#allocation8 + $0x9fc] sm:$0xf0] }
 0x20f   :  { %v5214_v58 = vadd.f32 %v5213_v46, %v3386_v2  ;;  %v9053_v2 = vld [vmem:[#allocation8 + $0xa34] sm:$0xf0]  ;;  %v8996_v46 = vor.u32 %v10016_v59, %v8995_v57  ;;  %v9852_v10 = vld [vmem:[#allocation8 + $0x4a4] sm:$0xf]  ;;  %v8877_v43 = vld [vmem:[#allocation8 + $0x8dc] sm:$0xf0] }
 0x210   :  { %v2976_v35 = vmax.f32 %v2967_v63, 0.0  ;;  %5442 = vmatpush.bf16.msrb.mxu0 %v8744_v0  ;;  %v9056_v51 = vor.u32 %v10027_v44, %v9053_v2  ;;  %v8992_v63 = vor.u32 %v10012_v53, %v8989_v54  ;;  %v10005_v0 = vld [vmem:[#allocation8 + $0x96c] sm:$0xf]  ;;  %v9999_v53 = vld [vmem:[#allocation8 + $0x93c] sm:$0xf] }
 0x211   :  { %5490 = vmatpush.bf16.msrb.mxu3 %v8188_v14  ;;  %v9076_v14 = vor.u32 %v10033_v62, %v9073_v4  ;;  %v10565_v16 = vadd.f32 %v5226_v8, %v5214_v58  ;;  %v8381_v62 = vld [vmem:[#allocation8 + $0x4f4] sm:$0xf0]  ;;  %v8961_v4 = vld [vmem:[#allocation8 + $0x984] sm:$0xf0]  ;;  %v8631_v44 = vld [vmem:[#allocation8 + $0x6d0] sm:$0xf] }
 0x212   :  { %v10567_v9 = vpack.c.bf16 %v2976_v35, %v2976_v35  ;;  %v5228_v32 = vpop.f32.mrf.mxu0  ;;  %v8384_v58 = vor.u32 %v9859_v61, %v8381_v62  ;;  %v8353_v35 = vld [vmem:[#allocation8 + $0x4bc] sm:$0xf0]  ;;  %v8964_v13 = vor.u32 %v10005_v0, %v8961_v4  ;;  %v9925_v54 = vld [vmem:[#allocation8 + $0x6e8] sm:$0xf0]  ;;  %v9922_v57 = vld [vmem:[#allocation8 + $0x6d4] sm:$0xf]  ;;  %v8880_v62 = vor.u32 %v9984_v56, %v8877_v43 }
 0x213   :  { %v2955_v17 = vpop.f32.mrf.mxu3  ;;  %v8933_v32 = vld [vmem:[#allocation8 + $0x94c] sm:$0xf0]  ;;  %v8269_v61 = vld [vmem:[#allocation8 + $0x414] sm:$0xf0]  ;;  %v9992_v4 = vld [vmem:[#allocation8 + $0x904] sm:$0xf] }
 0x214   :  { %9153 = vmatmul.msk.bf16.vlgmr.msrb.gmra.mxu1 %vm5200_vm1, %v10567_v9  ;;  %9154 = vmatmul.msk.bf16.vlgmr.msrb.gmra.mxu2 %vm5200_vm1, %v10567_v9  ;;  %v10013_v17 = vld [vmem:[#allocation8 + $0x9ac] sm:$0xf]  ;;  %v8633_v59 = vld [vmem:[#allocation8 + $0x6ec] sm:$0xf0]  ;;  %v9919_v56 = vld [vmem:[#allocation8 + $0x6b8] sm:$0xf0] }
 0x215   :  { %5491 = vmatpush.bf16.msrb.mxu3 %v8160_v48  ;;  %v10030_v48 = vld [vmem:[#allocation8 + $0xa30] sm:$0xf0]  ;;  %5360 = vmatpush.bf16.msrb.mxu1 %v9076_v14  ;;  %v8968_v14 = vor.u32 %v10009_v5, %v8967_v7  ;;  %v8636_v0 = vor.u32 %v9922_v57, %v8633_v59  ;;  %v8603_v7 = vld [vmem:[#allocation8 + $0x698] sm:$0xf]  ;;  %v10041_v43 = vld [vmem:[#allocation8 + $0xa8c] sm:$0xf] }
 0x216   :  { %5451 = vmatpush.bf16.msrb.mxu2 %v9080_v37  ;;  %v5215_v52 = vpop.f32.mrf.mxu2  ;;  %5443 = vmatpush.bf16.msrb.mxu0 %v8716_v20  ;;  %v9998_v37 = vld [vmem:[#allocation8 + $0x934] sm:$0xf]  ;;  %v8939_v20 = vld [vmem:[#allocation8 + $0x938] sm:$0xf] }
 0x217   :  { %v8936_v27 = vor.u32 %v9998_v37, %v8933_v32  ;;  %v8940_v28 = vor.u32 %v10002_v41, %v8939_v20  ;;  %v10006_v52 = vld [vmem:[#allocation8 + $0x974] sm:$0xf]  ;;  %v9985_v32 = vld [vmem:[#allocation8 + $0x8cc] sm:$0xf]  ;;  %v8885_v20 = vld [vmem:[#allocation8 + $0x8e4] sm:$0xf0] }
 0x218   :  { %9155 = vmatmul.msk.bf16.vlgmr.msra.gmra.mxu3 %vm5200_vm1, %v10567_v9  ;;  %v8972_v2 = vor.u32 %v10006_v52, %v8969_v34  ;;  %v8575_v41 = vld [vmem:[#allocation8 + $0x660] sm:$0xf]  ;;  %v9904_v34 = vld [vmem:[#allocation8 + $0x640] sm:$0xf0] }
 0x219   :  { %5492 = vmatpush.bf16.msrb.mxu3 %v8132_v38  ;;  %v9052_v38 = vor.u32 %v10030_v48, %v9051_v50  ;;  %5361 = vmatpush.bf16.msrb.mxu1 %v9048_v55  ;;  %v8356_v48 = vor.u32 %v9852_v10, %v8353_v35  ;;  %v9991_v55 = vld [vmem:[#allocation8 + $0x8fc] sm:$0xf]  ;;  %v8605_v10 = vld [vmem:[#allocation8 + $0x6b4] sm:$0xf0] }
 0x21a   :  { %5444 = vmatpush.bf16.msrb.mxu0 %v8688_v49 }
 0x21b   :  { %5452 = vmatpush.bf16.msrb.mxu2 %v9052_v38  ;;  %v8911_v38 = vld [vmem:[#allocation8 + $0x900] sm:$0xf] }
 0x21d   :  { %5493 = vmatpush.bf16.msrb.mxu3 %v8104_v26  ;;  %v10023_v26 = vld [vmem:[#allocation8 + $0x9f8] sm:$0xf0]  ;;  %5362 = vmatpush.bf16.msrb.mxu1 %v9020_v33  ;;  %v8883_v33 = vld [vmem:[#allocation8 + $0x8c8] sm:$0xf] }
 0x21e   :  { %v9024_v8 = vor.u32 %v10023_v26, %v9023_v21  ;;  %v9838_v21 = vld [vmem:[#allocation8 + $0x434] sm:$0xf]  ;;  %v8297_v26 = vld [vmem:[#allocation8 + $0x44c] sm:$0xf0] }
 0x220   :  { %5453 = vmatpush.bf16.msrb.mxu2 %v9024_v8  ;;  %v9988_v8 = vld [vmem:[#allocation8 + $0x8e0] sm:$0xf0] }
 0x221   :  { %5494 = vmatpush.bf16.msrb.mxu3 %v8076_v45  ;;  %v8660_v45 = vor.u32 %v9932_v40, %v8659_v39  ;;  %5363 = vmatpush.bf16.msrb.mxu1 %v8992_v63  ;;  %v8884_v63 = vor.u32 %v9988_v8, %v8883_v33  ;;  %v9109_v33 = vld [vmem:[#allocation8 + $0xaa4] sm:$0xf0] }
 0x222   :  { %v9112_v59 = vor.u32 %v10041_v43, %v9109_v33  ;;  %v7967_v33 = vld [vmem:[#allocation8 + $0x198] sm:$0xf] }
 0x223   :  { %5445 = vmatpush.bf16.msrb.mxu0 %v8660_v45  ;;  %v5239_v12 = vpop.f32.mrf.mxu1  ;;  %v8300_v45 = vor.u32 %v9838_v21, %v8297_v26 }
 0x224   :  { %5454 = vmatpush.bf16.msrb.mxu2 %v8996_v46  ;;  %v5240_v15 = vadd.f32 %v5239_v12, %v10565_v16  ;;  %5316 = vmatmul.bf16.vlgmr.msra.gmra.mxu1 %v10510_v22  ;;  %v8905_v16 = vld [vmem:[#allocation8 + $0x914] sm:$0xf0]  ;;  %v8632_v46 = vor.u32 %v9925_v54, %v8631_v44  ;;  %v8913_v12 = vld [vmem:[#allocation8 + $0x91c] sm:$0xf0]  ;;  %v9814_v44 = vld [vmem:[#allocation8 + $0x370] sm:$0xf0] }
 0x225   :  { %5495 = vmatpush.bf16.msrb.mxu3 %v8048_v6  ;;  %v10020_v6 = vld [vmem:[#allocation8 + $0x9e4] sm:$0xf]  ;;  %5407 = vmatmul.bf16.vlgmr.msra.gmra.mxu2 %v10510_v22  ;;  %v8908_v40 = vor.u32 %v9991_v55, %v8905_v16  ;;  %v9926_v55 = vld [vmem:[#allocation8 + $0x6f0] sm:$0xf0]  ;;  %v9897_v54 = vld [vmem:[#allocation8 + $0x608] sm:$0xf0] }
 0x226   :  { %5446 = vmatmul.bf16.vlgmr.msrb.gmra.mxu0 %v10541_v1  ;;  %v9028_v50 = vor.u32 %v10020_v6, %v9025_v18  ;;  %5364 = vmatpush.bf16.msrb.mxu1 %v8964_v13  ;;  %v9918_v6 = vld [vmem:[#allocation8 + $0x6b0] sm:$0xf0]  ;;  %v9915_v18 = vld [vmem:[#allocation8 + $0x69c] sm:$0xf]  ;;  %v9824_v13 = vld [vmem:[#allocation8 + $0x3c4] sm:$0xf]  ;;  %v8640_v21 = vor.u32 %v9926_v55, %v8639_v25 }
 0x227   :  { %5503 = vmatpush.bf16.msra.mxu0 %v8412_v60  ;;  %v8941_v60 = vld [vmem:[#allocation8 + $0x954] sm:$0xf0]  ;;  %v8604_v37 = vor.u32 %v9918_v6, %v8603_v7  ;;  %v10048_v16 = vld [vmem:[#allocation8 + $0xac4] sm:$0xf]  ;;  %v9807_v7 = vld [vmem:[#allocation8 + $0x338] sm:$0xf0] }
 0x228   :  { %5455 = vmatpush.bf16.msrb.mxu2 %v8968_v14  ;;  %v8944_v5 = vor.u32 %v9999_v53, %v8941_v60  ;;  %v8241_v14 = vld [vmem:[#allocation8 + $0x3dc] sm:$0xf0]  ;;  %v8191_v53 = vld [vmem:[#allocation8 + $0x358] sm:$0xf]  ;;  %v9894_v60 = vld [vmem:[#allocation8 + $0x5f4] sm:$0xf] }
 0x229   :  { %5496 = vmatpush.bf16.msrb.mxu3 %v8020_v23  ;;  %v8997_v23 = vld [vmem:[#allocation8 + $0x9c4] sm:$0xf0]  ;;  %v8491_v6 = vld [vmem:[#allocation8 + $0x5b8] sm:$0xf] }
 0x22a   :  { %v9000_v30 = vor.u32 %v10013_v17, %v8997_v23  ;;  %5365 = vmatpush.bf16.msrb.mxu1 %v8936_v27  ;;  %v9911_v17 = vld [vmem:[#allocation8 + $0x678] sm:$0xf0]  ;;  %v9908_v23 = vld [vmem:[#allocation8 + $0x664] sm:$0xf]  ;;  %v9817_v27 = vld [vmem:[#allocation8 + $0x38c] sm:$0xf] }
 0x22b   :  { %5504 = vmatpush.bf16.msra.mxu0 %v8384_v58  ;;  %v5252_v49 = vpop.f32.mrf.mxu3  ;;  %v5241_v39 = vpop.f32.mrf.mxu1 }
 0x22c   :  { %5456 = vmatpush.bf16.msrb.mxu2 %v8940_v28  ;;  %v8213_v28 = vld [vmem:[#allocation8 + $0x3a4] sm:$0xf0]  ;;  %v9901_v39 = vld [vmem:[#allocation8 + $0x62c] sm:$0xf] }
 0x22d   :  { %5497 = vmatpush.bf16.msrb.mxu3 %v7992_v36  ;;  %v10580_v36 = vadd.f32 %v5252_v49, %v5240_v15  ;;  %v8608_v15 = vor.u32 %v9915_v18, %v8605_v10  ;;  %v8216_v52 = vor.u32 %v9817_v27, %v8213_v28  ;;  %v8547_v49 = vld [vmem:[#allocation8 + $0x628] sm:$0xf]  ;;  %v9890_v18 = vld [vmem:[#allocation8 + $0x5d0] sm:$0xf0]  ;;  %v8527_v27 = vld [vmem:[#allocation8 + $0x5f8] sm:$0xf] }
 0x22e   :  { %5366 = vmatpush.bf16.msrb.mxu1 %v8908_v40  ;;  %v8549_v40 = vld [vmem:[#allocation8 + $0x644] sm:$0xf0]  ;;  %v8548_v8 = vor.u32 %v9904_v34, %v8547_v49  ;;  %v9898_v28 = vld [vmem:[#allocation8 + $0x610] sm:$0xf0]  ;;  %v9873_v49 = vld [vmem:[#allocation8 + $0x54c] sm:$0xf] }
 0x22f   :  { %5505 = vmatpush.bf16.msra.mxu0 %v8356_v48  ;;  %v8244_v48 = vor.u32 %v9824_v13, %v8241_v14  ;;  %v8555_v14 = vld [vmem:[#allocation8 + $0x630] sm:$0xf]  ;;  %v8528_v34 = vor.u32 %v9898_v28, %v8527_v27 }
 0x230   :  { %5498 = vmatmul.bf16.vlgmr.msrb.gmra.mxu3 %v10510_v22 }
 0x231   :  { %5542 = vmatpush.bf16.msra.mxu3 %v9084_v42  ;;  %v8912_v42 = vor.u32 %v9995_v29, %v8911_v38  ;;  %v9137_v38 = vld [vmem:[#allocation8 + $0xadc] sm:$0xf0]  ;;  %v8576_v29 = vor.u32 %v9911_v17, %v8575_v41  ;;  %v9880_v17 = vld [vmem:[#allocation8 + $0x584] sm:$0xf] }
 0x232   :  { %5367 = vmatpush.bf16.msrb.mxu1 %v8880_v62  ;;  %v9140_v26 = vor.u32 %v10048_v16, %v9137_v38  ;;  %v8583_v62 = vld [vmem:[#allocation8 + $0x668] sm:$0xf]  ;;  %v8107_v38 = vld [vmem:[#allocation8 + $0x2b0] sm:$0xf] }
 0x233   :  { %5506 = vmatpush.bf16.msra.mxu0 %v8328_v31  ;;  %5457 = vmatpush.bf16.msrb.mxu2 %v8912_v42  ;;  %v5254_v35 = vpop.f32.mrf.mxu3  ;;  %v8888_v31 = vor.u32 %v9985_v32, %v8885_v20  ;;  %v8611_v42 = vld [vmem:[#allocation8 + $0x6a0] sm:$0xf]  ;;  %v8135_v32 = vld [vmem:[#allocation8 + $0x2e8] sm:$0xf]  ;;  %v9800_v20 = vld [vmem:[#allocation8 + $0x300] sm:$0xf0] }
 0x234   :  { %v8612_v57 = vor.u32 %v9919_v56, %v8611_v42  ;;  %v9887_v35 = vld [vmem:[#allocation8 + $0x5bc] sm:$0xf]  ;;  %v8136_v25 = vor.u32 %v9800_v20, %v8135_v32  ;;  %v8499_v42 = vld [vmem:[#allocation8 + $0x5c0] sm:$0xf]  ;;  %v9744_v32 = vld [vmem:[#allocation8 + $0x140] sm:$0xf0] }
 0x235   :  { %5543 = vmatpush.bf16.msra.mxu3 %v9056_v51  ;;  %v9831_v51 = vld [vmem:[#allocation8 + $0x3fc] sm:$0xf]  ;;  %5368 = vmatmul.bf16.vlgmr.msrb.gmra.mxu1 %v10549_v47 }
 0x236   :  { %v8272_v58 = vor.u32 %v9831_v51, %v8269_v61  ;;  %5425 = vmatpush.bf16.msra.mxu1 %v8632_v46  ;;  %v8521_v51 = vld [vmem:[#allocation8 + $0x60c] sm:$0xf0]  ;;  %v8192_v61 = vor.u32 %v9814_v44, %v8191_v53  ;;  %v5265_v46 = vpop.f32.mrf.mxu2  ;;  %v9891_v56 = vld [vmem:[#allocation8 + $0x5d8] sm:$0xf0] }
 0x237   :  { %5507 = vmatpush.bf16.msra.mxu0 %v8300_v45  ;;  %5458 = vmatpush.bf16.msrb.mxu2 %v8884_v63  ;;  %v8519_v45 = vld [vmem:[#allocation8 + $0x5f0] sm:$0xf]  ;;  %v9912_v63 = vld [vmem:[#allocation8 + $0x680] sm:$0xf0]  ;;  %v9755_v20 = vld [vmem:[#allocation8 + $0x19c] sm:$0xf] }
 0x238   :  { %v8584_v10 = vor.u32 %v9912_v63, %v8583_v62  ;;  %v9884_v62 = vld [vmem:[#allocation8 + $0x5a0] sm:$0xf0] }
 0x239   :  { %5544 = vmatpush.bf16.msra.mxu3 %v9028_v50  ;;  %v8916_v50 = vor.u32 %v9992_v4, %v8913_v12  ;;  %v8163_v4 = vld [vmem:[#allocation8 + $0x320] sm:$0xf]  ;;  %v8493_v12 = vld [vmem:[#allocation8 + $0x5d4] sm:$0xf0] }
 0x23a   :  { %5459 = vmatmul.bf16.vlgmr.msrb.gmra.mxu2 %v10549_v47  ;;  %5426 = vmatpush.bf16.msra.mxu1 %v8604_v37  ;;  %v8164_v13 = vor.u32 %v9807_v7, %v8163_v4  ;;  %v9905_v37 = vld [vmem:[#allocation8 + $0x648] sm:$0xf0]  ;;  %v8496_v41 = vor.u32 %v9887_v35, %v8493_v12  ;;  %v9751_v4 = vld [vmem:[#allocation8 + $0x178] sm:$0xf0]  ;;  %v7905_v35 = vld [vmem:[#allocation8 + $0x13c] sm:$0xf0] }
 0x23b   :  { %5516 = vmatpush.bf16.msra.mxu2 %v8636_v0  ;;  %5508 = vmatpush.bf16.msra.mxu0 %v8272_v58  ;;  %v8520_v0 = vor.u32 %v9897_v54, %v8519_v45  ;;  %v8524_v58 = vor.u32 %v9894_v60, %v8521_v51  ;;  %v9786_v45 = vld [vmem:[#allocation8 + $0x290] sm:$0xf0]  ;;  %v8500_v54 = vor.u32 %v9891_v56, %v8499_v42 }
 0x23d   :  { %5545 = vmatpush.bf16.msra.mxu3 %v9000_v30  ;;  %v8580_v30 = vor.u32 %v9908_v23, %v8577_v3  ;;  %v8465_v23 = vld [vmem:[#allocation8 + $0x59c] sm:$0xf0] }
 0x23e   :  { %5427 = vmatpush.bf16.msra.mxu1 %v8576_v29  ;;  %v5267_v55 = vpop.f32.mrf.mxu2  ;;  %v9793_v29 = vld [vmem:[#allocation8 + $0x2c8] sm:$0xf0] }
 0x23f   :  { %5517 = vmatpush.bf16.msra.mxu2 %v8608_v15  ;;  %5509 = vmatpush.bf16.msra.mxu0 %v8244_v48  ;;  %v8492_v15 = vor.u32 %v9890_v18, %v8491_v6  ;;  %v8556_v48 = vor.u32 %v9905_v37, %v8555_v14  ;;  %v9779_v6 = vld [vmem:[#allocation8 + $0x258] sm:$0xf0]  ;;  %v9877_v14 = vld [vmem:[#allocation8 + $0x568] sm:$0xf0]  ;;  %v7911_v37 = vld [vmem:[#allocation8 + $0x128] sm:$0xf] }
 0x240   :  { %v7912_v27 = vor.u32 %v9744_v32, %v7911_v37  ;;  %v7883_v55 = vld [vmem:[#allocation8 + $0xf0] sm:$0xf]  ;;  %v7799_v37 = vld [vmem:[#allocation8 + $0x48] sm:$0xf] }
 0x241   :  { %5546 = vmatpush.bf16.msra.mxu3 %v8972_v2  ;;  %v8552_v2 = vor.u32 %v9901_v39, %v8549_v40  ;;  %v7961_v39 = vld [vmem:[#allocation8 + $0x1ac] sm:$0xf0]  ;;  %v8108_v40 = vor.u32 %v9793_v29, %v8107_v38  ;;  %v9737_v29 = vld [vmem:[#allocation8 + $0x108] sm:$0xf0] }
 0x242   :  { %5428 = vmatpush.bf16.msra.mxu1 %v8548_v8  ;;  %v9758_v8 = vld [vmem:[#allocation8 + $0x1b0] sm:$0xf0]  ;;  %v7884_v42 = vor.u32 %v9737_v29, %v7883_v55  ;;  %v9709_v29 = vld [vmem:[#allocation8 + $0x28] sm:$0xf0] }
 0x243   :  { %5518 = vmatpush.bf16.msra.mxu2 %v8580_v30  ;;  %5510 = vmatpush.bf16.msra.mxu0 %v8216_v52  ;;  %v8468_v30 = vor.u32 %v9880_v17, %v8465_v23  ;;  %v9876_v52 = vld [vmem:[#allocation8 + $0x560] sm:$0xf0]  ;;  %v7968_v51 = vor.u32 %v9758_v8, %v7967_v33  ;;  %v9733_v23 = vld [vmem:[#allocation8 + $0xec] sm:$0xf]  ;;  %v9730_v8 = vld [vmem:[#allocation8 + $0xd0] sm:$0xf0] }
 0x245   :  { %5547 = vmatpush.bf16.msra.mxu3 %v8944_v5  ;;  %v10587_v5 = vadd.f32 %v5265_v46, %v10580_v36  ;;  %v8463_v36 = vld [vmem:[#allocation8 + $0x580] sm:$0xf] }
 0x246   :  { %5511 = vmatmul.bf16.vlgmr.msra.gmra.mxu0 %v10530_v24  ;;  %5429 = vmatpush.bf16.msra.mxu1 %v8520_v0  ;;  %v7939_v0 = vld [vmem:[#allocation8 + $0x160] sm:$0xf] }
 0x247   :  { %5561 = vmatpush.bf16.msrb.mxu0 %v9140_v26  ;;  %5519 = vmatpush.bf16.msra.mxu2 %v8552_v2  ;;  %v9754_v26 = vld [vmem:[#allocation8 + $0x194] sm:$0xf]  ;;  %v8079_v2 = vld [vmem:[#allocation8 + $0x278] sm:$0xf]  ;;  %v7940_v12 = vor.u32 %v9751_v4, %v7939_v0  ;;  %v7885_v4 = vld [vmem:[#allocation8 + $0x10c] sm:$0xf0] }
 0x248   :  { %v7964_v44 = vor.u32 %v9754_v26, %v7961_v39  ;;  %v8080_v46 = vor.u32 %v9786_v45, %v8079_v2  ;;  %v7849_v26 = vld [vmem:[#allocation8 + $0xcc] sm:$0xf0]  ;;  %v9087_v39 = vld [vmem:[#allocation8 + $0xa58] sm:$0xf]  ;;  %v9734_v0 = vld [vmem:[#allocation8 + $0xf4] sm:$0xf] }
 0x249   :  { %5548 = vmatpush.bf16.msra.mxu3 %v8916_v50  ;;  %v9883_v50 = vld [vmem:[#allocation8 + $0x598] sm:$0xf0] }
 0x24a   :  { %5430 = vmatpush.bf16.msra.mxu1 %v8492_v15  ;;  %v8464_v16 = vor.u32 %v9883_v50, %v8463_v36  ;;  %v8023_v50 = vld [vmem:[#allocation8 + $0x208] sm:$0xf] }
 0x24b   :  { %5562 = vmatpush.bf16.msrb.mxu0 %v9112_v59  ;;  %5520 = vmatpush.bf16.msra.mxu2 %v8524_v58  ;;  %v10589_v3 = vpop.f32.mrf.mxu3  ;;  %v7933_v59 = vld [vmem:[#allocation8 + $0x174] sm:$0xf0]  ;;  %v8051_v58 = vld [vmem:[#allocation8 + $0x240] sm:$0xf] }
 0x24c   :  { %v8052_v15 = vor.u32 %v9779_v6, %v8051_v58  ;;  %v9712_v6 = vld [vmem:[#allocation8 + $0x44] sm:$0xf] }
 0x24d   :  { %5549 = vmatpush.bf16.msra.mxu3 %v8888_v31  ;;  %v8435_v31 = vld [vmem:[#allocation8 + $0x548] sm:$0xf] }
 0x24e   :  { %5431 = vmatpush.bf16.msra.mxu1 %v8464_v16  ;;  %v8436_v43 = vor.u32 %v9876_v52, %v8435_v31  ;;  %v10591_v63 = vpop.f32.mrf.mxu2  ;;  %v7941_v31 = vld [vmem:[#allocation8 + $0x17c] sm:$0xf0] }
 0x24f   :  { %5581 = vmatpush.bf16.msra.mxu0 %v8192_v61  ;;  %5521 = vmatpush.bf16.msra.mxu2 %v8496_v41  ;;  %v8471_v61 = vld [vmem:[#allocation8 + $0x588] sm:$0xf]  ;;  %v7969_v41 = vld [vmem:[#allocation8 + $0x1b4] sm:$0xf0] }
 0x250   :  { %5550 = vmatmul.bf16.vlgmr.msra.gmra.mxu3 %v10549_v47  ;;  %v8472_v18 = vor.u32 %v9884_v62, %v8471_v61  ;;  %v7972_v28 = vor.u32 %v9755_v20, %v7969_v41  ;;  %v7827_v62 = vld [vmem:[#allocation8 + $0x80] sm:$0xf]  ;;  %v9716_v20 = vld [vmem:[#allocation8 + $0x60] sm:$0xf0]  ;;  %v9727_v41 = vld [vmem:[#allocation8 + $0xbc] sm:$0xf] }
 0x251   :  { %5607 = vmatpush.bf16.msrb.mxu3 %v8640_v21  ;;  %v8437_v21 = vld [vmem:[#allocation8 + $0x564] sm:$0xf0] }
 0x252   :  { %v8440_v53 = vor.u32 %v9873_v49, %v8437_v21  ;;  %5432 = vmatpush.bf16.msra.mxu1 %v8436_v43  ;;  %v7995_v49 = vld [vmem:[#allocation8 + $0x1d0] sm:$0xf]  ;;  %v9726_v21 = vld [vmem:[#allocation8 + $0xb4] sm:$0xf]  ;;  %v7855_v43 = vld [vmem:[#allocation8 + $0xb8] sm:$0xf] }
 0x253   :  { %5582 = vmatpush.bf16.msra.mxu0 %v8164_v13  ;;  %5522 = vmatpush.bf16.msra.mxu2 %v8468_v30  ;;  %v5306_v60 = vpop.f32.mrf.mxu3  ;;  %v8443_v13 = vld [vmem:[#allocation8 + $0x550] sm:$0xf]  ;;  %v9748_v30 = vld [vmem:[#allocation8 + $0x164] sm:$0xf]  ;;  %v7852_v2 = vor.u32 %v9726_v21, %v7849_v26  ;;  %v9982_v21 = vld [vmem:[#allocation8 + $0x8b0] sm:$0xf0] }
 0x254   :  { %v8444_v17 = vor.u32 %v9877_v14, %v8443_v13  ;;  %v7944_v56 = vor.u32 %v9748_v30, %v7941_v31  ;;  %v10031_v60 = vld [vmem:[#allocation8 + $0xa38] sm:$0xf0]  ;;  %v7888_v14 = vor.u32 %v9734_v0, %v7885_v4  ;;  %v9720_v30 = vld [vmem:[#allocation8 + $0x84] sm:$0xf]  ;;  %v7829_v31 = vld [vmem:[#allocation8 + $0x9c] sm:$0xf0] }
 0x255   :  { %5608 = vmatpush.bf16.msrb.mxu3 %v8612_v57  ;;  %v9747_v57 = vld [vmem:[#allocation8 + $0x15c] sm:$0xf]  ;;  %5433 = vmatmul.bf16.vlgmr.msra.gmra.mxu1 %v10532_v19  ;;  %v8801_v0 = vld [vmem:[#allocation8 + $0x83c] sm:$0xf0] }
 0x256   :  { %5477 = vmatpush.bf16.msrb.mxu1 %v7964_v44  ;;  %v7936_v7 = vor.u32 %v9747_v57, %v7933_v59  ;;  %9156 = vmatmul.msk.bf16.vlgmr.msrb.gmra.mxu0 %vm5200_vm1, %v10567_v9  ;;  %v5332_v16 = vpop.f32.mrf.mxu2  ;;  %v7913_v44 = vld [vmem:[#allocation8 + $0x144] sm:$0xf0]  ;;  %v7821_v57 = vld [vmem:[#allocation8 + $0x94] sm:$0xf0]  ;;  %v9059_v59 = vld [vmem:[#allocation8 + $0xa20] sm:$0xf] }
 0x257   :  { %5583 = vmatpush.bf16.msra.mxu0 %v8136_v25  ;;  %5523 = vmatpush.bf16.msra.mxu2 %v8440_v53  ;;  %v7877_v25 = vld [vmem:[#allocation8 + $0x104] sm:$0xf0]  ;;  %v9741_v53 = vld [vmem:[#allocation8 + $0x12c] sm:$0xf]  ;;  %v9060_v58 = vor.u32 %v10031_v60, %v9059_v59  ;;  %v7771_v16 = vld [vmem:[#allocation8 + $0x10] sm:$0xf] }
 0x258   :  { %v7880_v52 = vor.u32 %v9733_v23, %v7877_v25  ;;  %v7916_v61 = vor.u32 %v9741_v53, %v7913_v44  ;;  %v7765_v23 = vld [vmem:[#allocation8 + $0x24] sm:$0xf0]  ;;  %v9003_v25 = vld [vmem:[#allocation8 + $0x9b0] sm:$0xf]  ;;  %v9975_v59 = vld [vmem:[#allocation8 + $0x878] sm:$0xf0] }
 0x259   :  { %5609 = vmatpush.bf16.msrb.mxu3 %v8584_v10  ;;  %v9740_v10 = vld [vmem:[#allocation8 + $0x124] sm:$0xf] }
 0x25a   :  { %5524 = vmatmul.bf16.vlgmr.msra.gmra.mxu2 %v10532_v19  ;;  %5478 = vmatpush.bf16.msrb.mxu1 %v7936_v7  ;;  %v7908_v36 = vor.u32 %v9740_v10, %v7905_v35  ;;  %v9031_v10 = vld [vmem:[#allocation8 + $0x9e8] sm:$0xf]  ;;  %v10024_v35 = vld [vmem:[#allocation8 + $0xa00] sm:$0xf0] }
 0x25b   :  { %5584 = vmatpush.bf16.msra.mxu0 %v8108_v40  ;;  %5568 = vmatpush.bf16.msrb.mxu2 %v7968_v51  ;;  %v10038_v40 = vld [vmem:[#allocation8 + $0xa70] sm:$0xf0]  ;;  %v7856_v51 = vor.u32 %v9730_v8, %v7855_v43  ;;  %v7832_v43 = vor.u32 %v9720_v30, %v7829_v31  ;;  %v8829_v8 = vld [vmem:[#allocation8 + $0x874] sm:$0xf0]  ;;  %v8745_v30 = vld [vmem:[#allocation8 + $0x7cc] sm:$0xf0] }
 0x25c   :  { %v9088_v45 = vor.u32 %v10038_v40, %v9087_v39  ;;  %v8975_v39 = vld [vmem:[#allocation8 + $0x978] sm:$0xf]  ;;  %v10010_v40 = vld [vmem:[#allocation8 + $0x990] sm:$0xf0]  ;;  %v9923_v31 = vld [vmem:[#allocation8 + $0x6dc] sm:$0xf] }
 0x25d   :  { %5610 = vmatpush.bf16.msrb.mxu3 %v8556_v48  ;;  %v9772_v48 = vld [vmem:[#allocation8 + $0x220] sm:$0xf0] }
 0x25e   :  { %v8024_v38 = vor.u32 %v9772_v48, %v8023_v50  ;;  %5479 = vmatpush.bf16.msrb.mxu1 %v7908_v36  ;;  %v7857_v36 = vld [vmem:[#allocation8 + $0xd4] sm:$0xf0]  ;;  %v9032_v48 = vor.u32 %v10024_v35, %v9031_v10  ;;  %v9968_v10 = vld [vmem:[#allocation8 + $0x840] sm:$0xf0]  ;;  %v9979_v35 = vld [vmem:[#allocation8 + $0x89c] sm:$0xf] }
 0x25f   :  { %5585 = vmatpush.bf16.msra.mxu0 %v8080_v46  ;;  %5569 = vmatpush.bf16.msrb.mxu2 %v7940_v12  ;;  %v9723_v46 = vld [vmem:[#allocation8 + $0x98] sm:$0xf0]  ;;  %v5278_v12 = vpop.f32.mrf.mxu0  ;;  %v7860_v55 = vor.u32 %v9727_v41, %v7857_v36  ;;  %v9957_v36 = vld [vmem:[#allocation8 + $0x7ec] sm:$0xf] }
 0x260   :  { %v7828_v13 = vor.u32 %v9723_v46, %v7827_v62  ;;  %v9964_v46 = vld [vmem:[#allocation8 + $0x824] sm:$0xf] }
 0x261   :  { %5611 = vmatpush.bf16.msrb.mxu3 %v8528_v34  ;;  %v9765_v34 = vld [vmem:[#allocation8 + $0x1e8] sm:$0xf0] }
 0x262   :  { %v7996_v33 = vor.u32 %v9765_v34, %v7995_v49  ;;  %5480 = vmatpush.bf16.msrb.mxu1 %v7880_v52  ;;  %v8863_v34 = vld [vmem:[#allocation8 + $0x898] sm:$0xf] }
 0x263   :  { %5586 = vmatpush.bf16.msra.mxu0 %v8052_v15  ;;  %5570 = vmatpush.bf16.msrb.mxu2 %v7912_v27  ;;  %v10600_v15 = vadd.f32 %v5278_v12, %v10587_v5  ;;  %v10017_v27 = vld [vmem:[#allocation8 + $0x9c8] sm:$0xf0]  ;;  %v9978_v5 = vld [vmem:[#allocation8 + $0x894] sm:$0xf]  ;;  %v8864_v44 = vor.u32 %v9982_v21, %v8863_v34  ;;  %v8865_v12 = vld [vmem:[#allocation8 + $0x8b4] sm:$0xf0] }
 0x264   :  { %v9004_v49 = vor.u32 %v10017_v27, %v9003_v25  ;;  %v9961_v27 = vld [vmem:[#allocation8 + $0x808] sm:$0xf0]  ;;  %v8751_v21 = vld [vmem:[#allocation8 + $0x7b8] sm:$0xf] }
 0x265   :  { %5612 = vmatpush.bf16.msrb.mxu3 %v8500_v54  ;;  %v9719_v54 = vld [vmem:[#allocation8 + $0x7c] sm:$0xf] }
 0x266   :  { %5481 = vmatpush.bf16.msrb.mxu1 %v7852_v2  ;;  %v7824_v7 = vor.u32 %v9719_v54, %v7821_v57  ;;  %v9713_v2 = vld [vmem:[#allocation8 + $0x4c] sm:$0xf]  ;;  %v8976_v54 = vor.u32 %v10010_v40, %v8975_v39  ;;  %v8835_v57 = vld [vmem:[#allocation8 + $0x860] sm:$0xf]  ;;  %v9954_v39 = vld [vmem:[#allocation8 + $0x7d0] sm:$0xf0] }
 0x267   :  { %5587 = vmatpush.bf16.msra.mxu0 %v8024_v38  ;;  %5571 = vmatpush.bf16.msrb.mxu2 %v7884_v42  ;;  %v8857_v38 = vld [vmem:[#allocation8 + $0x8ac] sm:$0xf0]  ;;  %v5280_v42 = vpop.f32.mrf.mxu0  ;;  %v8836_v4 = vor.u32 %v9975_v59, %v8835_v57  ;;  %v9965_v40 = vld [vmem:[#allocation8 + $0x82c] sm:$0xf]  ;;  %v8723_v57 = vld [vmem:[#allocation8 + $0x780] sm:$0xf] }
 0x268   :  { %v8860_v26 = vor.u32 %v9978_v5, %v8857_v38  ;;  %v8891_v5 = vld [vmem:[#allocation8 + $0x8d0] sm:$0xf]  ;;  %v9989_v38 = vld [vmem:[#allocation8 + $0x8e8] sm:$0xf0]  ;;  %v8809_v42 = vld [vmem:[#allocation8 + $0x844] sm:$0xf0] }
 0x269   :  { %5613 = vmatpush.bf16.msrb.mxu3 %v8472_v18  ;;  %v7793_v18 = vld [vmem:[#allocation8 + $0x5c] sm:$0xf0]  ;;  %v9947_v59 = vld [vmem:[#allocation8 + $0x798] sm:$0xf0] }
 0x26a   :  { %5482 = vmatpush.bf16.msrb.mxu1 %v7824_v7  ;;  %v7796_v50 = vor.u32 %v9712_v6, %v7793_v18  ;;  %v9706_v7 = vld [vmem:[#allocation8 + $0x14] sm:$0xf]  ;;  %v8807_v6 = vld [vmem:[#allocation8 + $0x828] sm:$0xf] }
 0x26b   :  { %5588 = vmatpush.bf16.msra.mxu0 %v7996_v33  ;;  %5572 = vmatpush.bf16.msrb.mxu2 %v7856_v51  ;;  %v10602_v32 = vpop.f32.mrf.mxu3  ;;  %v9971_v33 = vld [vmem:[#allocation8 + $0x85c] sm:$0xf]  ;;  %v8947_v51 = vld [vmem:[#allocation8 + $0x940] sm:$0xf] }
 0x26c   :  { %v8832_v60 = vor.u32 %v9971_v33, %v8829_v8  ;;  %v9943_v33 = vld [vmem:[#allocation8 + $0x77c] sm:$0xf] }
 0x26d   :  { %5614 = vmatpush.bf16.msrb.mxu3 %v8444_v17  ;;  %v9705_v17 = vld [vmem:[#allocation8 + $0xc] sm:$0xf] }
 0x26e   :  { %5589 = vmatmul.bf16.vlgmr.msra.gmra.mxu0 %v10510_v22  ;;  %5483 = vmatpush.bf16.msrb.mxu1 %v7796_v50  ;;  %v7768_v52 = vor.u32 %v9705_v17, %v7765_v23  ;;  %v8773_v50 = vld [vmem:[#allocation8 + $0x804] sm:$0xf0]  ;;  %v8868_v17 = vor.u32 %v9979_v35, %v8865_v12  ;;  %v8779_v23 = vld [vmem:[#allocation8 + $0x7f0] sm:$0xf]  ;;  %v9940_v35 = vld [vmem:[#allocation8 + $0x760] sm:$0xf0] }
 0x26f   :  { %5633 = vmatpush.bf16.msrb.mxu0 %v9088_v45  ;;  %5573 = vmatpush.bf16.msrb.mxu2 %v7828_v13  ;;  %v7801_v45 = vld [vmem:[#allocation8 + $0x64] sm:$0xf0]  ;;  %v8804_v13 = vor.u32 %v9964_v46, %v8801_v0  ;;  %v9936_v46 = vld [vmem:[#allocation8 + $0x744] sm:$0xf]  ;;  %v8689_v0 = vld [vmem:[#allocation8 + $0x75c] sm:$0xf0] }
 0x270   :  { %5615 = vmatmul.bf16.vlgmr.msrb.gmra.mxu3 %v10532_v19  ;;  %v7804_v62 = vor.u32 %v9713_v2, %v7801_v45  ;;  %v8613_v2 = vld [vmem:[#allocation8 + $0x6bc] sm:$0xf0]  ;;  %v8752_v45 = vor.u32 %v9954_v39, %v8751_v21  ;;  %v9951_v12 = vld [vmem:[#allocation8 + $0x7bc] sm:$0xf]  ;;  %v8529_v21 = vld [vmem:[#allocation8 + $0x614] sm:$0xf0] }
 0x271   :  { %5659 = vmatpush.bf16.msra.mxu3 %v7972_v28  ;;  %v7800_v28 = vor.u32 %v9716_v20, %v7799_v37  ;;  %v9996_v37 = vld [vmem:[#allocation8 + $0x920] sm:$0xf0]  ;;  %v10606_v20 = vpop.f32.mrf.mxu0 }
 0x272   :  { %5484 = vmatpush.bf16.msrb.mxu1 %v7768_v52  ;;  %v8641_v52 = vld [vmem:[#allocation8 + $0x6f4] sm:$0xf0] }
 0x273   :  { %5634 = vmatpush.bf16.msrb.mxu0 %v9060_v58  ;;  %5574 = vmatpush.bf16.msrb.mxu2 %v7800_v28  ;;  %v5358_v53 = vpop.f32.mrf.mxu3  ;;  %v7773_v58 = vld [vmem:[#allocation8 + $0x2c] sm:$0xf0]  ;;  %v9972_v28 = vld [vmem:[#allocation8 + $0x864] sm:$0xf] }
 0x274   :  { %v7776_v41 = vor.u32 %v9706_v7, %v7773_v58  ;;  %v8717_v53 = vld [vmem:[#allocation8 + $0x794] sm:$0xf0]  ;;  %v8585_v7 = vld [vmem:[#allocation8 + $0x684] sm:$0xf0]  ;;  %v8724_v58 = vor.u32 %v9947_v59, %v8723_v57  ;;  %v9888_v57 = vld [vmem:[#allocation8 + $0x5c4] sm:$0xf] }
 0x275   :  { %5660 = vmatpush.bf16.msra.mxu3 %v7944_v56  ;;  %v7772_v56 = vor.u32 %v9709_v29, %v7771_v16  ;;  %5485 = vmatmul.bf16.vlgmr.msrb.gmra.mxu1 %v10508_v11  ;;  %v8776_v16 = vor.u32 %v9957_v36, %v8773_v50  ;;  %v9950_v29 = vld [vmem:[#allocation8 + $0x7b4] sm:$0xf]  ;;  %v8661_v50 = vld [vmem:[#allocation8 + $0x724] sm:$0xf0]  ;;  %v8501_v59 = vld [vmem:[#allocation8 + $0x5dc] sm:$0xf0] }
 0x276   :  { %5529 = vmatpush.bf16.msra.mxu1 %v8860_v26  ;;  %v8892_v26 = vor.u32 %v9989_v38, %v8891_v5  ;;  %v9944_v5 = vld [vmem:[#allocation8 + $0x784] sm:$0xf]  ;;  %v8725_v38 = vld [vmem:[#allocation8 + $0x79c] sm:$0xf0] }
 0x277   :  { %5635 = vmatpush.bf16.msrb.mxu0 %v9032_v48  ;;  %5575 = vmatpush.bf16.msrb.mxu2 %v7772_v56  ;;  %v8808_v48 = vor.u32 %v9968_v10, %v8807_v6  ;;  %v8748_v56 = vor.u32 %v9950_v29, %v8745_v30  ;;  %v8728_v39 = vor.u32 %v9944_v5, %v8725_v38  ;;  %v9874_v5 = vld [vmem:[#allocation8 + $0x554] sm:$0xf]  ;;  %v8445_v38 = vld [vmem:[#allocation8 + $0x56c] sm:$0xf0] }
 0x279   :  { %5661 = vmatpush.bf16.msra.mxu3 %v7916_v61  ;;  %v10003_v61 = vld [vmem:[#allocation8 + $0x958] sm:$0xf0]  ;;  %v5345_v8 = vpop.f32.mrf.mxu0 }
 0x27a   :  { %v8948_v18 = vor.u32 %v10003_v61, %v8947_v51  ;;  %5576 = vmatmul.bf16.vlgmr.msrb.gmra.mxu2 %v10508_v11  ;;  %5530 = vmatpush.bf16.msra.mxu1 %v8832_v60  ;;  %v9958_v60 = vld [vmem:[#allocation8 + $0x7f4] sm:$0xf]  ;;  %v8781_v51 = vld [vmem:[#allocation8 + $0x80c] sm:$0xf0]  ;;  %v8720_v61 = vor.u32 %v9943_v33, %v8717_v53  ;;  %v9937_v33 = vld [vmem:[#allocation8 + $0x74c] sm:$0xf] }
 0x27b   :  { %5636 = vmatpush.bf16.msrb.mxu0 %v9004_v49  ;;  %5620 = vmatpush.bf16.msra.mxu2 %v8864_v44  ;;  %v8780_v49 = vor.u32 %v9961_v27, %v8779_v23  ;;  %v9916_v44 = vld [vmem:[#allocation8 + $0x6a4] sm:$0xf]  ;;  %v8784_v6 = vor.u32 %v9958_v60, %v8781_v51  ;;  %v8667_v27 = vld [vmem:[#allocation8 + $0x710] sm:$0xf]  ;;  %v8697_v8 = vld [vmem:[#allocation8 + $0x764] sm:$0xf0] }
 0x27c   :  { %v8700_v60 = vor.u32 %v9937_v33, %v8697_v8  ;;  %v8359_v51 = vld [vmem:[#allocation8 + $0x4a8] sm:$0xf]  ;;  %v9835_v8 = vld [vmem:[#allocation8 + $0x418] sm:$0xf0] }
 0x27d   :  { %5662 = vmatpush.bf16.msra.mxu3 %v7888_v14  ;;  %v8919_v14 = vld [vmem:[#allocation8 + $0x908] sm:$0xf] }
 0x27e   :  { %v8920_v25 = vor.u32 %v9996_v37, %v8919_v14  ;;  %5531 = vmatpush.bf16.msra.mxu1 %v8804_v13  ;;  %v8753_v13 = vld [vmem:[#allocation8 + $0x7d4] sm:$0xf0]  ;;  %v8692_v14 = vor.u32 %v9936_v46, %v8689_v0  ;;  %v9930_v46 = vld [vmem:[#allocation8 + $0x714] sm:$0xf]  ;;  %v8669_v0 = vld [vmem:[#allocation8 + $0x72c] sm:$0xf0] }
 0x27f   :  { %5637 = vmatpush.bf16.msrb.mxu0 %v8976_v54  ;;  %5621 = vmatpush.bf16.msra.mxu2 %v8836_v4  ;;  %v8812_v54 = vor.u32 %v9965_v40, %v8809_v42  ;;  %v9909_v4 = vld [vmem:[#allocation8 + $0x66c] sm:$0xf]  ;;  %v8387_v40 = vld [vmem:[#allocation8 + $0x4e0] sm:$0xf]  ;;  %v9863_v42 = vld [vmem:[#allocation8 + $0x4f8] sm:$0xf0] }
 0x280   :  { %v8588_v37 = vor.u32 %v9909_v4, %v8585_v7  ;;  %v9853_v4 = vld [vmem:[#allocation8 + $0x4ac] sm:$0xf]  ;;  %v8504_v7 = vor.u32 %v9888_v57, %v8501_v59  ;;  %v9832_v57 = vld [vmem:[#allocation8 + $0x404] sm:$0xf]  ;;  %v8277_v59 = vld [vmem:[#allocation8 + $0x41c] sm:$0xf0] }
 0x281   :  { %5663 = vmatpush.bf16.msra.mxu3 %v7860_v55  ;;  %v8837_v55 = vld [vmem:[#allocation8 + $0x87c] sm:$0xf0]  ;;  %v10612_v36 = vpop.f32.mrf.mxu0 }
 0x282   :  { %v8840_v34 = vor.u32 %v9972_v28, %v8837_v55  ;;  %5532 = vmatpush.bf16.msra.mxu1 %v8776_v16  ;;  %v8415_v28 = vld [vmem:[#allocation8 + $0x518] sm:$0xf]  ;;  %v9870_v55 = vld [vmem:[#allocation8 + $0x530] sm:$0xf0]  ;;  %v9933_v16 = vld [vmem:[#allocation8 + $0x728] sm:$0xf0] }
 0x283   :  { %5638 = vmatpush.bf16.msrb.mxu0 %v8948_v18  ;;  %5622 = vmatpush.bf16.msra.mxu2 %v8808_v48  ;;  %v8695_v18 = vld [vmem:[#allocation8 + $0x748] sm:$0xf]  ;;  %v9902_v48 = vld [vmem:[#allocation8 + $0x634] sm:$0xf] }
 0x284   :  { %v8696_v23 = vor.u32 %v9940_v35, %v8695_v18  ;;  %v9871_v18 = vld [vmem:[#allocation8 + $0x538] sm:$0xf0] }
 0x285   :  { %5664 = vmatpush.bf16.msra.mxu3 %v7832_v43  ;;  %v8644_v43 = vor.u32 %v9923_v31, %v8641_v52  ;;  %v9867_v31 = vld [vmem:[#allocation8 + $0x51c] sm:$0xf]  ;;  %v8417_v52 = vld [vmem:[#allocation8 + $0x534] sm:$0xf0] }
 0x286   :  { %5533 = vmatpush.bf16.msra.mxu1 %v8748_v56 }
 0x287   :  { %5639 = vmatpush.bf16.msrb.mxu0 %v8920_v25  ;;  %5623 = vmatpush.bf16.msra.mxu2 %v8780_v49  ;;  %v8756_v25 = vor.u32 %v9951_v12, %v8753_v13  ;;  %v8416_v49 = vor.u32 %v9870_v55, %v8415_v28  ;;  %v9881_v12 = vld [vmem:[#allocation8 + $0x58c] sm:$0xf]  ;;  %v8473_v13 = vld [vmem:[#allocation8 + $0x5a4] sm:$0xf0]  ;;  %v9864_v28 = vld [vmem:[#allocation8 + $0x500] sm:$0xf0] }
 0x289   :  { %5665 = vmatpush.bf16.msra.mxu3 %v7804_v62  ;;  %v8616_v62 = vor.u32 %v9916_v44, %v8613_v2  ;;  %v9860_v44 = vld [vmem:[#allocation8 + $0x4e4] sm:$0xf]  ;;  %v8389_v2 = vld [vmem:[#allocation8 + $0x4fc] sm:$0xf0] }
 0x28a   :  { %5534 = vmatpush.bf16.msra.mxu1 %v8720_v61  ;;  %v9856_v61 = vld [vmem:[#allocation8 + $0x4c0] sm:$0xf0] }
 0x28b   :  { %5640 = vmatpush.bf16.msrb.mxu0 %v8892_v26  ;;  %5624 = vmatpush.bf16.msra.mxu2 %v8752_v45  ;;  %v10610_v10 = vpop.f32.mrf.mxu3  ;;  %v8668_v26 = vor.u32 %v9933_v16, %v8667_v27  ;;  %v5397_v45 = vpop.f32.mrf.mxu0  ;;  %v8360_v35 = vor.u32 %v9856_v61, %v8359_v51  ;;  %v8395_v27 = vld [vmem:[#allocation8 + $0x4e8] sm:$0xf]  ;;  %v9850_v51 = vld [vmem:[#allocation8 + $0x490] sm:$0xf0] }
 0x28d   :  { %5666 = vmatpush.bf16.msra.mxu3 %v7776_v41  ;;  %v9929_v41 = vld [vmem:[#allocation8 + $0x70c] sm:$0xf] }
 0x28e   :  { %5641 = vmatmul.bf16.vlgmr.msrb.gmra.mxu0 %v10549_v47  ;;  %5535 = vmatpush.bf16.msra.mxu1 %v8692_v14  ;;  %v8664_v29 = vor.u32 %v9929_v41, %v8661_v50  ;;  %v8672_v14 = vor.u32 %v9930_v46, %v8669_v0  ;;  %v9849_v41 = vld [vmem:[#allocation8 + $0x488] sm:$0xf0] }
 0x28f   :  { %5698 = vmatpush.bf16.msra.mxu0 %v8644_v43  ;;  %5625 = vmatpush.bf16.msra.mxu2 %v8724_v58  ;;  %v8420_v43 = vor.u32 %v9867_v31, %v8417_v52  ;;  %v8361_v58 = vld [vmem:[#allocation8 + $0x4c4] sm:$0xf0]  ;;  %v9842_v31 = vld [vmem:[#allocation8 + $0x450] sm:$0xf0]  ;;  %v7975_v52 = vld [vmem:[#allocation8 + $0x1a0] sm:$0xf] }
 0x290   :  { %5667 = vmatmul.bf16.vlgmr.msra.gmra.mxu3 %v10508_v11  ;;  %v8364_v50 = vor.u32 %v9853_v4, %v8361_v58  ;;  %v8247_v4 = vld [vmem:[#allocation8 + $0x3c8] sm:$0xf]  ;;  %v7919_v58 = vld [vmem:[#allocation8 + $0x130] sm:$0xf] }
 0x291   :  { %5711 = vmatpush.bf16.msrb.mxu3 %v8868_v17  ;;  %v8557_v17 = vld [vmem:[#allocation8 + $0x64c] sm:$0xf0]  ;;  %v5291_v55 = vpop.f32.mrf.mxu1 }
 0x292   :  { %v8560_v30 = vor.u32 %v9902_v48, %v8557_v17  ;;  %5536 = vmatpush.bf16.msra.mxu1 %v8664_v29  ;;  %v9846_v17 = vld [vmem:[#allocation8 + $0x474] sm:$0xf]  ;;  %v8303_v29 = vld [vmem:[#allocation8 + $0x438] sm:$0xf] }
 0x293   :  { %5699 = vmatpush.bf16.msra.mxu0 %v8616_v62  ;;  %5626 = vmatpush.bf16.msra.mxu2 %v8696_v23  ;;  %v5423_v56 = vpop.f32.mrf.mxu3  ;;  %v8392_v62 = vor.u32 %v9860_v44, %v8389_v2  ;;  %v8476_v23 = vor.u32 %v9881_v12, %v8473_v13  ;;  %v9752_v44 = vld [vmem:[#allocation8 + $0x180] sm:$0xf0]  ;;  %v8280_v12 = vor.u32 %v9832_v57, %v8277_v59  ;;  %v8255_v57 = vld [vmem:[#allocation8 + $0x3d0] sm:$0xf] }
 0x294   :  { %v9857_v56 = vld [vmem:[#allocation8 + $0x4c8] sm:$0xf0]  ;;  %v9115_v59 = vld [vmem:[#allocation8 + $0xa90] sm:$0xf] }
 0x295   :  { %5712 = vmatpush.bf16.msrb.mxu3 %v8840_v34  ;;  %v9895_v34 = vld [vmem:[#allocation8 + $0x5fc] sm:$0xf]  ;;  %5537 = vmatmul.bf16.vlgmr.msra.gmra.mxu1 %v10541_v1 }
 0x296   :  { %v8532_v53 = vor.u32 %v9895_v34, %v8529_v21  ;;  %5594 = vmatpush.bf16.msrb.mxu1 %v8416_v49  ;;  %v9759_v49 = vld [vmem:[#allocation8 + $0x1b8] sm:$0xf0]  ;;  %v8396_v21 = vor.u32 %v9864_v28, %v8395_v27  ;;  %v7891_v27 = vld [vmem:[#allocation8 + $0xf8] sm:$0xf]  ;;  %v9738_v28 = vld [vmem:[#allocation8 + $0x110] sm:$0xf0] }
 0x297   :  { %5700 = vmatpush.bf16.msra.mxu0 %v8588_v37  ;;  %5627 = vmatpush.bf16.msra.mxu2 %v8668_v26  ;;  %v8331_v37 = vld [vmem:[#allocation8 + $0x470] sm:$0xf]  ;;  %v9839_v26 = vld [vmem:[#allocation8 + $0x43c] sm:$0xf]  ;;  %v7976_v33 = vor.u32 %v9759_v49, %v7975_v52  ;;  %v10620_v2 = vpop.f32.mrf.mxu2  ;;  %v10052_v52 = vld [vmem:[#allocation8 + $0xae0] sm:$0xf0] }
 0x298   :  { %v8332_v16 = vor.u32 %v9849_v41, %v8331_v37  ;;  %v8249_v37 = vld [vmem:[#allocation8 + $0x3e4] sm:$0xf0]  ;;  %v8311_v41 = vld [vmem:[#allocation8 + $0x440] sm:$0xf] }
 0x299   :  { %5713 = vmatpush.bf16.msrb.mxu3 %v8812_v54  ;;  %v8388_v54 = vor.u32 %v9863_v42, %v8387_v40  ;;  %v8305_v40 = vld [vmem:[#allocation8 + $0x454] sm:$0xf0]  ;;  %v8367_v42 = vld [vmem:[#allocation8 + $0x4b0] sm:$0xf] }
 0x29a   :  { %5628 = vmatmul.bf16.vlgmr.msra.gmra.mxu2 %v10541_v1  ;;  %v8308_v45 = vor.u32 %v9839_v26, %v8305_v40  ;;  %v9836_v26 = vld [vmem:[#allocation8 + $0x420] sm:$0xf0] }
 0x29b   :  { %5701 = vmatpush.bf16.msra.mxu0 %v8560_v30  ;;  %5685 = vmatpush.bf16.msrb.mxu2 %v8420_v43  ;;  %v10617_v30 = vadd.f32 %v5291_v55, %v10600_v15  ;;  %v8304_v43 = vor.u32 %v9842_v31, %v8303_v29  ;;  %v8275_v15 = vld [vmem:[#allocation8 + $0x400] sm:$0xf]  ;;  %v10622_v61 = vpop.f32.mrf.mxu3  ;;  %v9818_v29 = vld [vmem:[#allocation8 + $0x394] sm:$0xf]  ;;  %v9143_v31 = vld [vmem:[#allocation8 + $0xac8] sm:$0xf] }
 0x29c   :  { %5595 = vmatpush.bf16.msrb.mxu1 %v8388_v54  ;;  %v8368_v54 = vor.u32 %v9857_v56, %v8367_v42  ;;  %v8276_v46 = vor.u32 %v9835_v8, %v8275_v15  ;;  %v7892_v56 = vor.u32 %v9738_v28, %v7891_v27 }
 0x29d   :  { %5714 = vmatpush.bf16.msrb.mxu3 %v8784_v6  ;;  %v8423_v6 = vld [vmem:[#allocation8 + $0x520] sm:$0xf] }
 0x29e   :  { %v8424_v48 = vor.u32 %v9871_v18, %v8423_v6  ;;  %v9745_v6 = vld [vmem:[#allocation8 + $0x148] sm:$0xf0]  ;;  %v10624_v18 = vld [vmem:[#allocation10] sm:$0x7f] }
 0x29f   :  { %5702 = vmatpush.bf16.msra.mxu0 %v8532_v53  ;;  %5686 = vmatpush.bf16.msrb.mxu2 %v8392_v62  ;;  %v7947_v53 = vld [vmem:[#allocation8 + $0x168] sm:$0xf]  ;;  %v5293_v62 = vpop.f32.mrf.mxu1  ;;  %v3388_v15 = vperm.slane %v10624_v18, 2 }
 0x2a0   :  { %5596 = vmatpush.bf16.msrb.mxu1 %v8360_v35  ;;  %v7948_v0 = vor.u32 %v9752_v44, %v7947_v53  ;;  %v3387_v35 = vperm.slane %v10624_v18, 1  ;;  %v9144_v53 = vor.u32 %v10052_v52, %v9143_v31  ;;  %v7863_v44 = vld [vmem:[#allocation8 + $0xc0] sm:$0xf] }
 0x2a1   :  { %5715 = vmatpush.bf16.msrb.mxu3 %v8756_v25  ;;  %v8333_v25 = vld [vmem:[#allocation8 + $0x48c] sm:$0xf0] }
 0x2a2   :  { %v8336_v34 = vor.u32 %v9846_v17, %v8333_v25  ;;  %v7920_v17 = vor.u32 %v9745_v6, %v7919_v58  ;;  %v9821_v25 = vld [vmem:[#allocation8 + $0x3a8] sm:$0xf0]  ;;  %v5305_v49 = vadd.f32 %v10589_v3, %v3387_v35  ;;  %v10042_v58 = vld [vmem:[#allocation8 + $0xa94] sm:$0xf]  ;;  %v9117_v6 = vld [vmem:[#allocation8 + $0xaac] sm:$0xf0] }
 0x2a3   :  { %5703 = vmatpush.bf16.msra.mxu0 %v8504_v7  ;;  %5687 = vmatpush.bf16.msrb.mxu2 %v8364_v50  ;;  %v9828_v7 = vld [vmem:[#allocation8 + $0x3e0] sm:$0xf0]  ;;  %v9843_v50 = vld [vmem:[#allocation8 + $0x458] sm:$0xf0]  ;;  %v10628_v55 = vpop.f32.mrf.mxu0  ;;  %v8199_v35 = vld [vmem:[#allocation8 + $0x360] sm:$0xf]  ;;  %v9120_v28 = vor.u32 %v10042_v58, %v9117_v6 }
 0x2a4   :  { %5597 = vmatpush.bf16.msrb.mxu1 %v8332_v16  ;;  %v5384_v16 = vpop.f32.mrf.mxu2 }
 0x2a5   :  { %5716 = vmatpush.bf16.msrb.mxu3 %v8728_v39  ;;  %v8448_v39 = vor.u32 %v9874_v5, %v8445_v38  ;;  %v8312_v38 = vor.u32 %v9843_v50, %v8311_v41  ;;  %v9724_v41 = vld [vmem:[#allocation8 + $0xa0] sm:$0xf0] }
 0x2a6   :  { %v9804_v16 = vld [vmem:[#allocation8 + $0x324] sm:$0xf] }
 0x2a7   :  { %5704 = vmatpush.bf16.msra.mxu0 %v8476_v23  ;;  %5688 = vmatpush.bf16.msrb.mxu2 %v8336_v34  ;;  %v8219_v23 = vld [vmem:[#allocation8 + $0x390] sm:$0xf]  ;;  %v5317_v40 = vpop.f32.mrf.mxu1 }
 0x2a8   :  { %5598 = vmatpush.bf16.msrb.mxu1 %v8304_v43  ;;  %v8221_v34 = vld [vmem:[#allocation8 + $0x3ac] sm:$0xf0]  ;;  %v8220_v42 = vor.u32 %v9821_v25, %v8219_v23  ;;  %v10049_v43 = vld [vmem:[#allocation8 + $0xacc] sm:$0xf]  ;;  %v5318_v8 = vadd.f32 %v5317_v40, %v5305_v49  ;;  %v8227_v25 = vld [vmem:[#allocation8 + $0x398] sm:$0xf] }
 0x2a9   :  { %5717 = vmatpush.bf16.msrb.mxu3 %v8700_v60  ;;  %v8339_v60 = vld [vmem:[#allocation8 + $0x478] sm:$0xf]  ;;  %v8224_v3 = vor.u32 %v9818_v29, %v8221_v34  ;;  %v9151_v49 = vld [vmem:[#allocation8 + $0xad0] sm:$0xf]  ;;  %v10053_v34 = vld [vmem:[#allocation8 + $0xae8] sm:$0xf0] }
 0x2aa   :  { %v8340_v13 = vor.u32 %v9850_v51, %v8339_v60  ;;  %v10045_v60 = vld [vmem:[#allocation8 + $0xaa8] sm:$0xf0]  ;;  %v5331_v51 = vadd.f32 %v10591_v63, %v5318_v8 }
 0x2ab   :  { %5705 = vmatpush.bf16.msra.mxu0 %v8448_v39  ;;  %5689 = vmatpush.bf16.msrb.mxu2 %v8308_v45  ;;  %v5475_v39 = vpop.f32.mrf.mxu3  ;;  %v9731_v45 = vld [vmem:[#allocation8 + $0xd8] sm:$0xf0]  ;;  %v5449_v63 = vpop.f32.mrf.mxu0  ;;  %v9717_v40 = vld [vmem:[#allocation8 + $0x68] sm:$0xf0] }
 0x2ac   :  { %5599 = vmatpush.bf16.msrb.mxu1 %v8276_v46  ;;  %v9829_v46 = vld [vmem:[#allocation8 + $0x3e8] sm:$0xf0]  ;;  %v5344_v50 = vadd.f32 %v10606_v20, %v5331_v51  ;;  %v7807_v39 = vld [vmem:[#allocation8 + $0x50] sm:$0xf]  ;;  %v8871_v51 = vld [vmem:[#allocation8 + $0x8a0] sm:$0xf] }
 0x2ad   :  { %5718 = vmatpush.bf16.msrb.mxu3 %v8672_v14  ;;  %v9825_v14 = vld [vmem:[#allocation8 + $0x3cc] sm:$0xf]  ;;  %v9976_v63 = vld [vmem:[#allocation8 + $0x880] sm:$0xf0] }
 0x2ae   :  { %5706 = vmatmul.bf16.vlgmr.msra.gmra.mxu0 %v10532_v19  ;;  %v8252_v5 = vor.u32 %v9825_v14, %v8249_v37  ;;  %v9815_v14 = vld [vmem:[#allocation8 + $0x378] sm:$0xf0]  ;;  %v7835_v37 = vld [vmem:[#allocation8 + $0x88] sm:$0xf] }
 0x2af   :  { %5750 = vmatpush.bf16.msrb.mxu0 %v7976_v33  ;;  %5690 = vmatpush.bf16.msrb.mxu2 %v8280_v12  ;;  %v9145_v33 = vld [vmem:[#allocation8 + $0xae4] sm:$0xf0]  ;;  %v5396_v12 = vadd.f32 %v10612_v36, %v3388_v15  ;;  %v9822_v36 = vld [vmem:[#allocation8 + $0x3b0] sm:$0xf0]  ;;  %v5319_v20 = vpop.f32.mrf.mxu1  ;;  %v8200_v31 = vor.u32 %v9815_v14, %v8199_v35  ;;  %v7836_v52 = vor.u32 %v9724_v41, %v7835_v37 }
 0x2b0   :  { %5719 = vmatmul.bf16.vlgmr.msrb.gmra.mxu3 %v10541_v1  ;;  %v9148_v62 = vor.u32 %v10049_v43, %v9145_v33  ;;  %v9152_v43 = vor.u32 %v10053_v34, %v9151_v49  ;;  %v9797_v33 = vld [vmem:[#allocation8 + $0x2ec] sm:$0xf]  ;;  %v8137_v15 = vld [vmem:[#allocation8 + $0x304] sm:$0xf0]  ;;  %v10069_v35 = vld [vmem:[#allocation11 + $0x78] sm:$0xff] }
 0x2b1   :  { %5776 = vmatpush.bf16.msra.mxu3 %v8424_v48  ;;  %v8248_v48 = vor.u32 %v9828_v7, %v8247_v4  ;;  %v8193_v4 = vld [vmem:[#allocation8 + $0x374] sm:$0xf0]  ;;  %v7864_v7 = vor.u32 %v9731_v45, %v7863_v44  ;;  %v10046_v45 = vld [vmem:[#allocation8 + $0xab0] sm:$0xf0]  ;;  %v9969_v20 = vld [vmem:[#allocation8 + $0x848] sm:$0xf0] }
 0x2b2   :  { %v9123_v44 = vld [vmem:[#allocation8 + $0xa98] sm:$0xf]  ;;  %v9794_v14 = vld [vmem:[#allocation8 + $0x2d0] sm:$0xf0] }
 0x2b3   :  { %5751 = vmatpush.bf16.msrb.mxu0 %v7948_v0  ;;  %5600 = vmatpush.bf16.msrb.mxu1 %v8248_v48  ;;  %v9811_v0 = vld [vmem:[#allocation8 + $0x35c] sm:$0xf]  ;;  %v5408_v48 = vpop.f32.mrf.mxu2  ;;  %v10639_v29 = vpop.f32.mrf.mxu3 }
 0x2b4   :  { %5691 = vmatpush.bf16.msrb.mxu2 %v8252_v5  ;;  %v8196_v23 = vor.u32 %v9811_v0, %v8193_v4  ;;  %v5409_v27 = vadd.f32 %v5408_v48, %v5396_v12  ;;  %v8165_v5 = vld [vmem:[#allocation8 + $0x33c] sm:$0xf0]  ;;  %v9790_v0 = vld [vmem:[#allocation8 + $0x2b4] sm:$0xf]  ;;  %v8109_v4 = vld [vmem:[#allocation8 + $0x2cc] sm:$0xf0] }
 0x2b5   :  { %5777 = vmatpush.bf16.msra.mxu3 %v8396_v21  ;;  %v8283_v21 = vld [vmem:[#allocation8 + $0x408] sm:$0xf]  ;;  %v8112_v41 = vor.u32 %v9790_v0, %v8109_v4  ;;  %v9783_v48 = vld [vmem:[#allocation8 + $0x27c] sm:$0xf]  ;;  %v10065_v0 = vld [vmem:[#allocation11 + $0x58] sm:$0xff] }
 0x2b6   :  { %v10035_v4 = vld [vmem:[#allocation8 + $0xa5c] sm:$0xf] }
 0x2b7   :  { %5752 = vmatpush.bf16.msrb.mxu0 %v7920_v17  ;;  %5601 = vmatpush.bf16.msrb.mxu1 %v8220_v42  ;;  %v8256_v17 = vor.u32 %v9829_v46, %v8255_v57  ;;  %v10643_v42 = vadd.f32 %v10610_v10, %v5409_v27  ;;  %v8140_v57 = vor.u32 %v9797_v33, %v8137_v15  ;;  %v9983_v46 = vld [vmem:[#allocation8 + $0x8b8] sm:$0xf0]  ;;  %v10645_v58 = vpop.f32.mrf.mxu1  ;;  %v8087_v27 = vld [vmem:[#allocation8 + $0x280] sm:$0xf]  ;;  %v9962_v33 = vld [vmem:[#allocation8 + $0x810] sm:$0xf0] }
 0x2b8   :  { %5692 = vmatpush.bf16.msrb.mxu2 %v8224_v3  ;;  %v8143_v3 = vld [vmem:[#allocation8 + $0x2f0] sm:$0xf]  ;;  %v8872_v37 = vor.u32 %v9983_v46, %v8871_v51  ;;  %v9769_v15 = vld [vmem:[#allocation8 + $0x20c] sm:$0xf] }
 0x2b9   :  { %5778 = vmatpush.bf16.msra.mxu3 %v8368_v54  ;;  %v8284_v54 = vor.u32 %v9836_v26, %v8283_v21  ;;  %v8171_v21 = vld [vmem:[#allocation8 + $0x328] sm:$0xf]  ;;  %v9808_v26 = vld [vmem:[#allocation8 + $0x340] sm:$0xf0]  ;;  %v7997_v51 = vld [vmem:[#allocation8 + $0x1ec] sm:$0xf0] }
 0x2ba   :  { %5602 = vmatmul.bf16.vlgmr.msrb.gmra.mxu1 %v10530_v24  ;;  %v8172_v8 = vor.u32 %v9808_v26, %v8171_v21  ;;  %v10067_v21 = vld [vmem:[#allocation11 + $0x68] sm:$0xff]  ;;  %v8059_v26 = vld [vmem:[#allocation8 + $0x248] sm:$0xf] }
 0x2bb   :  { %5753 = vmatpush.bf16.msrb.mxu0 %v7892_v56  ;;  %5652 = vmatpush.bf16.msra.mxu1 %v9144_v53  ;;  %v8168_v56 = vor.u32 %v9804_v16, %v8165_v5  ;;  %v7808_v53 = vor.u32 %v9717_v40, %v7807_v39  ;;  %v5410_v10 = vpop.f32.mrf.mxu2  ;;  %v8815_v5 = vld [vmem:[#allocation8 + $0x830] sm:$0xf]  ;;  %v9780_v39 = vld [vmem:[#allocation8 + $0x260] sm:$0xf0] }
 0x2bc   :  { %5743 = vmatpush.bf16.msra.mxu2 %v9148_v62  ;;  %v9124_v62 = vor.u32 %v10046_v45, %v9123_v44  ;;  %v8816_v40 = vor.u32 %v9969_v20, %v8815_v5  ;;  %v10066_v44 = vld [vmem:[#allocation11 + $0x60] sm:$0xff]  ;;  %v8031_v45 = vld [vmem:[#allocation8 + $0x210] sm:$0xf]  ;;  %v10032_v5 = vld [vmem:[#allocation8 + $0xa40] sm:$0xf0] }
 0x2bd   :  { %5779 = vmatpush.bf16.msra.mxu3 %v8340_v13  ;;  %v9116_v13 = vor.u32 %v10045_v60, %v9115_v59  ;;  %5693 = vmatmul.bf16.vlgmr.msrb.gmra.mxu2 %v10530_v24  ;;  %v7779_v59 = vld [vmem:[#allocation8 + $0x18] sm:$0xf]  ;;  %v9710_v60 = vld [vmem:[#allocation8 + $0x30] sm:$0xf0] }
 0x2be   :  { %v7780_v12 = vor.u32 %v9710_v60, %v7779_v59  ;;  %v9955_v59 = vld [vmem:[#allocation8 + $0x7d8] sm:$0xf0]  ;;  %v9762_v60 = vld [vmem:[#allocation8 + $0x1d4] sm:$0xf] }
 0x2bf   :  { %5754 = vmatpush.bf16.msrb.mxu0 %v7864_v7  ;;  %5653 = vmatpush.bf16.msra.mxu1 %v9116_v13  ;;  %v5501_v7 = vpop.f32.mrf.mxu3  ;;  %v8115_v13 = vld [vmem:[#allocation8 + $0x2b8] sm:$0xf]  ;;  %v5371_v49 = vpop.f32.mrf.mxu1 }
 0x2c0   :  { %5744 = vmatpush.bf16.msra.mxu2 %v9120_v28  ;;  %v9787_v28 = vld [vmem:[#allocation8 + $0x298] sm:$0xf0]  ;;  %v9089_v7 = vld [vmem:[#allocation8 + $0xa74] sm:$0xf0] }
 0x2c1   :  { %5780 = vmatpush.bf16.msra.mxu3 %v8312_v38  ;;  %v10637_v38 = vadd.f32 %v10602_v32, %v5344_v50  ;;  %v8228_v32 = vor.u32 %v9822_v36, %v8227_v25  ;;  %v8843_v50 = vld [vmem:[#allocation8 + $0x868] sm:$0xf]  ;;  %v8088_v34 = vor.u32 %v9787_v28, %v8087_v27  ;;  %v9061_v27 = vld [vmem:[#allocation8 + $0xa3c] sm:$0xf0] }
 0x2c2   :  { %v10068_v25 = vld [vmem:[#allocation11 + $0x70] sm:$0xff]  ;;  %v8844_v36 = vor.u32 %v9976_v63, %v8843_v50  ;;  %v9092_v50 = vor.u32 %v10035_v4, %v9089_v7  ;;  %v10007_v4 = vld [vmem:[#allocation8 + $0x97c] sm:$0xf]  ;;  %v8977_v7 = vld [vmem:[#allocation8 + $0x994] sm:$0xf0] }
 0x2c3   :  { %5672 = vmatpush.bf16.msrb.mxu1 %v8196_v23  ;;  %5755 = vmatpush.bf16.msrb.mxu0 %v7836_v52  ;;  %v8116_v23 = vor.u32 %v9794_v14, %v8115_v13  ;;  %v8053_v52 = vld [vmem:[#allocation8 + $0x25c] sm:$0xf0]  ;;  %v8000_v13 = vor.u32 %v9762_v60, %v7997_v51  ;;  %v8731_v63 = vld [vmem:[#allocation8 + $0x788] sm:$0xf] }
 0x2c4   :  { %5763 = vmatpush.bf16.msrb.mxu2 %v8200_v31  ;;  %v9776_v31 = vld [vmem:[#allocation8 + $0x244] sm:$0xf]  ;;  %v9095_v14 = vld [vmem:[#allocation8 + $0xa60] sm:$0xf] }
 0x2c5   :  { %5781 = vmatpush.bf16.msra.mxu3 %v8284_v54  ;;  %v9801_v54 = vld [vmem:[#allocation8 + $0x308] sm:$0xf0] }
 0x2c6   :  { %v8144_v6 = vor.u32 %v9801_v54, %v8143_v3  ;;  %v9773_v3 = vld [vmem:[#allocation8 + $0x228] sm:$0xf0] }
 0x2c7   :  { %5673 = vmatpush.bf16.msrb.mxu1 %v8168_v56  ;;  %5756 = vmatpush.bf16.msrb.mxu0 %v7808_v53  ;;  %v8787_v56 = vld [vmem:[#allocation8 + $0x7f8] sm:$0xf]  ;;  %v8060_v53 = vor.u32 %v9780_v39, %v8059_v26  ;;  %v8032_v46 = vor.u32 %v9773_v3, %v8031_v45  ;;  %v9033_v26 = vld [vmem:[#allocation8 + $0xa04] sm:$0xf0]  ;;  %v10014_v3 = vld [vmem:[#allocation8 + $0x9b4] sm:$0xf] }
 0x2c8   :  { %5764 = vmatpush.bf16.msrb.mxu2 %v8172_v8  ;;  %v8025_v8 = vld [vmem:[#allocation8 + $0x224] sm:$0xf0]  ;;  %v8788_v54 = vor.u32 %v9962_v33, %v8787_v56  ;;  %v8675_v33 = vld [vmem:[#allocation8 + $0x718] sm:$0xf] }
 0x2c9   :  { %5782 = vmatpush.bf16.msra.mxu3 %v8256_v17  ;;  %v8081_v17 = vld [vmem:[#allocation8 + $0x294] sm:$0xf0]  ;;  %v8028_v10 = vor.u32 %v9769_v15, %v8025_v8  ;;  %v9934_v15 = vld [vmem:[#allocation8 + $0x730] sm:$0xf0] }
 0x2ca   :  { %v8084_v16 = vor.u32 %v9783_v48, %v8081_v17  ;;  %9157 = vmatmul.msk.bf16.vlgmr.msra.gmra.mxu1 %vm5200_vm1, %v10567_v9  ;;  %v9948_v48 = vld [vmem:[#allocation8 + $0x7a0] sm:$0xf0] }
 0x2cb   :  { %5674 = vmatpush.bf16.msrb.mxu1 %v8140_v57  ;;  %5757 = vmatpush.bf16.msrb.mxu0 %v7780_v12  ;;  %v8759_v57 = vld [vmem:[#allocation8 + $0x7c0] sm:$0xf] }
 0x2cc   :  { %5765 = vmatpush.bf16.msrb.mxu2 %v8144_v6  ;;  %v8003_v6 = vld [vmem:[#allocation8 + $0x1d8] sm:$0xf]  ;;  %v8760_v12 = vor.u32 %v9955_v59, %v8759_v57  ;;  %v10077_v59 = vld [vmem:[#allocation11 + $0xb8] sm:$0xff] }
 0x2cd   :  { %5783 = vmatpush.bf16.msra.mxu3 %v8228_v32  ;;  %9158 = vmatmul.msk.bf16.vlgmr.msra.gmra.mxu2 %vm5200_vm1, %v10567_v9  ;;  %v8056_v32 = vor.u32 %v9776_v31, %v8053_v52  ;;  %v8703_v31 = vld [vmem:[#allocation8 + $0x750] sm:$0xf]  ;;  %v9941_v52 = vld [vmem:[#allocation8 + $0x768] sm:$0xf0]  ;;  %v9011_v57 = vld [vmem:[#allocation8 + $0x9b8] sm:$0xf] }
 0x2ce   :  { %5758 = vmatmul.bf16.vlgmr.msrb.gmra.mxu0 %v10508_v11 }
 0x2cf   :  { %5802 = vmatpush.bf16.msra.mxu0 %v8872_v37  ;;  %5675 = vmatpush.bf16.msrb.mxu1 %v8112_v41  ;;  %v10039_v37 = vld [vmem:[#allocation8 + $0xa78] sm:$0xf0] }
 0x2d0   :  { %5784 = vmatmul.bf16.vlgmr.msra.gmra.mxu3 %v10530_v24  ;;  %v10648_v24 = vpop.f32.mrf.mxu2  ;;  %5766 = vmatpush.bf16.msrb.mxu2 %v8116_v23  ;;  %v10064_v23 = vld [vmem:[#allocation11 + $0x50] sm:$0xff]  ;;  %v9096_v28 = vor.u32 %v10039_v37, %v9095_v14  ;;  %v8980_v37 = vor.u32 %v10007_v4, %v8977_v7  ;;  %v10070_v7 = vld [vmem:[#allocation11 + $0x80] sm:$0xff] }
 0x2d1   :  { %5834 = vmatpush.bf16.msrb.mxu3 %v9152_v43  ;;  %v10655_v43 = vpop.f32.mrf.mxu0 }
 0x2d3   :  { %5803 = vmatpush.bf16.msra.mxu0 %v8844_v36  ;;  %5676 = vmatpush.bf16.msrb.mxu1 %v8084_v16  ;;  %v8732_v36 = vor.u32 %v9948_v48, %v8731_v63  ;;  %v9067_v16 = vld [vmem:[#allocation8 + $0xa28] sm:$0xf]  ;;  %v8949_v63 = vld [vmem:[#allocation8 + $0x95c] sm:$0xf0] }
 0x2d4   :  { %5767 = vmatpush.bf16.msrb.mxu2 %v8088_v34  ;;  %v10063_v34 = vld [vmem:[#allocation11 + $0x48] sm:$0xff]  ;;  %v8955_v48 = vld [vmem:[#allocation8 + $0x948] sm:$0xf] }
 0x2d5   :  { %5835 = vmatpush.bf16.msrb.mxu3 %v9124_v62  ;;  %v10657_v62 = vpop.f32.mrf.mxu3 }
 0x2d7   :  { %5804 = vmatpush.bf16.msra.mxu0 %v8816_v40  ;;  %5677 = vmatpush.bf16.msrb.mxu1 %v8056_v32  ;;  %v9039_v40 = vld [vmem:[#allocation8 + $0x9f0] sm:$0xf]  ;;  %v10025_v32 = vld [vmem:[#allocation8 + $0xa08] sm:$0xf0] }
 0x2d8   :  { %v5462_v11 = vpop.f32.mrf.mxu2  ;;  %5768 = vmatpush.bf16.msrb.mxu2 %v8060_v53  ;;  %v10062_v53 = vld [vmem:[#allocation11 + $0x40] sm:$0xff]  ;;  %v9040_v45 = vor.u32 %v10025_v32, %v9039_v40 }
 0x2d9   :  { %6275 = vmatpush.bf16.msra.mxu3 %v10069_v35  ;;  %v9766_v35 = vld [vmem:[#allocation8 + $0x1f0] sm:$0xf0]  ;;  %v5514_v41 = vpop.f32.mrf.mxu0  ;;  %v9005_v11 = vld [vmem:[#allocation8 + $0x9cc] sm:$0xf0] }
 0x2da   :  { %v8004_v17 = vor.u32 %v9766_v35, %v8003_v6  ;;  %v9008_v51 = vor.u32 %v10014_v3, %v9005_v11  ;;  %v8983_v35 = vld [vmem:[#allocation8 + $0x980] sm:$0xf]  ;;  %v8591_v11 = vld [vmem:[#allocation8 + $0x670] sm:$0xf] }
 0x2db   :  { %5805 = vmatpush.bf16.msra.mxu0 %v8788_v54  ;;  %5678 = vmatpush.bf16.msrb.mxu1 %v8028_v10  ;;  %v8676_v10 = vor.u32 %v9934_v15, %v8675_v33  ;;  %v8619_v33 = vld [vmem:[#allocation8 + $0x6a8] sm:$0xf]  ;;  %v9920_v15 = vld [vmem:[#allocation8 + $0x6c0] sm:$0xf0] }
 0x2dc   :  { %5769 = vmatpush.bf16.msrb.mxu2 %v8032_v46 }
 0x2dd   :  { %6276 = vmatpush.bf16.msra.mxu3 %v10068_v25  ;;  %v10028_v25 = vld [vmem:[#allocation8 + $0xa24] sm:$0xf]  ;;  %v5553_v49 = vpop.f32.mrf.mxu3 }
 0x2de   :  { %v9064_v20 = vor.u32 %v10028_v25, %v9061_v27  ;;  %v9993_v27 = vld [vmem:[#allocation8 + $0x90c] sm:$0xf]  ;;  %v8893_v49 = vld [vmem:[#allocation8 + $0x8ec] sm:$0xf0] }
 0x2df   :  { %5806 = vmatpush.bf16.msra.mxu0 %v8760_v12  ;;  %5679 = vmatpush.bf16.msrb.mxu1 %v8000_v13  ;;  %v10076_v12 = vld [vmem:[#allocation11 + $0xb0] sm:$0xff] }
 0x2e0   :  { %9159 = vmatmul.msk.bf16.vlgmr.msrb.gmra.mxu3 %vm5200_vm1, %v10567_v9  ;;  %v5370_v9 = vadd.f32 %v10645_v58, %v10637_v38  ;;  %5770 = vmatpush.bf16.msrb.mxu2 %v8004_v17  ;;  %v9068_v38 = vor.u32 %v10032_v5, %v9067_v16  ;;  %v8704_v58 = vor.u32 %v9941_v52, %v8703_v31  ;;  %v10674_v14 = vpop.f32.mrf.mxu2  ;;  %v10004_v17 = vld [vmem:[#allocation8 + $0x960] sm:$0xf0]  ;;  %v10074_v16 = vld [vmem:[#allocation11 + $0xa0] sm:$0xff]  ;;  %v9986_v52 = vld [vmem:[#allocation8 + $0x8d4] sm:$0xf] }
 0x2e1   :  { %6277 = vmatpush.bf16.msra.mxu3 %v10067_v21  ;;  %v10021_v21 = vld [vmem:[#allocation8 + $0x9ec] sm:$0xf]  ;;  %v10666_v8 = vpop.f32.mrf.mxu0  ;;  %v8896_v40 = vor.u32 %v9986_v52, %v8893_v49  ;;  %v10078_v52 = vld [vmem:[#allocation11 + $0xc0] sm:$0xff] }
 0x2e2   :  { %v5383_v39 = vadd.f32 %v10620_v2, %v5370_v9  ;;  %5680 = vmatmul.bf16.vlgmr.msrb.gmra.mxu1 %v10510_v22  ;;  %v9036_v56 = vor.u32 %v10021_v21, %v9033_v26  ;;  %v5434_v2 = vpop.f32.mrf.mxu1  ;;  %v8921_v9 = vld [vmem:[#allocation8 + $0x924] sm:$0xf0]  ;;  %v9990_v26 = vld [vmem:[#allocation8 + $0x8f0] sm:$0xf0] }
 0x2e3   :  { %5724 = vmatpush.bf16.msra.mxu1 %v9092_v50  ;;  %5807 = vmatpush.bf16.msra.mxu0 %v8732_v36  ;;  %v5435_v54 = vadd.f32 %v5434_v2, %v10643_v42  ;;  %v10011_v42 = vld [vmem:[#allocation8 + $0x998] sm:$0xf0]  ;;  %v9997_v36 = vld [vmem:[#allocation8 + $0x928] sm:$0xf0] }
 0x2e4   :  { %5815 = vmatpush.bf16.msra.mxu2 %v9096_v28  ;;  %v8984_v50 = vor.u32 %v10011_v42, %v8983_v35  ;;  %v8927_v28 = vld [vmem:[#allocation8 + $0x910] sm:$0xf] }
 0x2e5   :  { %6278 = vmatpush.bf16.msra.mxu3 %v10066_v44  ;;  %5771 = vmatmul.bf16.vlgmr.msrb.gmra.mxu2 %v10510_v22  ;;  %v5842_v44 = vmax.f32 %v5383_v39, 0.0  ;;  %v10018_v22 = vld [vmem:[#allocation8 + $0x9d0] sm:$0xf0]  ;;  %v5448_v60 = vadd.f32 %v10628_v55, %v5435_v54  ;;  %v8928_v31 = vor.u32 %v9997_v36, %v8927_v28  ;;  %v8647_v39 = vld [vmem:[#allocation8 + $0x6e0] sm:$0xf] }
 0x2e6   :  { %v9913_v54 = vld [vmem:[#allocation8 + $0x688] sm:$0xf0]  ;;  %v8451_v28 = vld [vmem:[#allocation8 + $0x558] sm:$0xf]  ;;  %v9878_v36 = vld [vmem:[#allocation8 + $0x570] sm:$0xf0] }
 0x2e7   :  { %5725 = vmatpush.bf16.msra.mxu1 %v9064_v20  ;;  %5808 = vmatpush.bf16.msra.mxu0 %v8704_v58  ;;  %v5849_v46 = vpack.c.bf16 %v5842_v44, %v5842_v44  ;;  %v5461_v6 = vadd.f32 %v10648_v24, %v5448_v60  ;;  %v10000_v24 = vld [vmem:[#allocation8 + $0x944] sm:$0xf]  ;;  %v10073_v58 = vld [vmem:[#allocation11 + $0x98] sm:$0xff]  ;;  %v10072_v44 = vld [vmem:[#allocation11 + $0x90] sm:$0xff] }
 0x2e8   :  { %5816 = vmatpush.bf16.msra.mxu2 %v9068_v38  ;;  %v8952_v25 = vor.u32 %v10000_v24, %v8949_v63  ;;  %v5527_v5 = vpop.f32.mrf.mxu2  ;;  %v9927_v38 = vld [vmem:[#allocation8 + $0x6f8] sm:$0xf0] }
 0x2e9   :  { %6279 = vmatpush.bf16.msra.mxu3 %v10065_v0  ;;  %v9012_v0 = vor.u32 %v10018_v22, %v9011_v57  ;;  %v10672_v13 = vadd.f32 %v10622_v61, %v5461_v6  ;;  %v5566_v55 = vpop.f32.mrf.mxu0  ;;  %v8956_v61 = vor.u32 %v10004_v17, %v8955_v48  ;;  %v3389_v57 = vperm.slane %v10624_v18, 3  ;;  %v10071_v22 = vld [vmem:[#allocation11 + $0x88] sm:$0xff]  ;;  %v8507_v48 = vld [vmem:[#allocation8 + $0x5c8] sm:$0xf] }
 0x2ea   :  { %v5436_v41 = vpop.f32.mrf.mxu1  ;;  %v9899_v55 = vld [vmem:[#allocation8 + $0x618] sm:$0xf0] }
 0x2eb   :  { %5726 = vmatpush.bf16.msra.mxu1 %v9036_v56  ;;  %5809 = vmatpush.bf16.msra.mxu0 %v8676_v10  ;;  %v8648_v56 = vor.u32 %v9927_v38, %v8647_v39  ;;  %v10084_v10 = vld [vmem:[#allocation11 + $0xf0] sm:$0xff]  ;;  %v5843_v6 = vmax.f32 %v10672_v13, 0.0  ;;  %v9892_v13 = vld [vmem:[#allocation8 + $0x5e0] sm:$0xf0] }
 0x2ec   :  { %5817 = vmatpush.bf16.msra.mxu2 %v9040_v45  ;;  %v8620_v45 = vor.u32 %v9920_v15, %v8619_v33  ;;  %v8508_v17 = vor.u32 %v9892_v13, %v8507_v48  ;;  %v10059_v38 = vld [vmem:[#allocation11 + $0x28] sm:$0xff] }
 0x2ed   :  { %6280 = vmatpush.bf16.msra.mxu3 %v10064_v23  ;;  %v10075_v23 = vld [vmem:[#allocation11 + $0xa8] sm:$0xff]  ;;  %v5850_v41 = vpack.c.bf16 %v5843_v6, %v5843_v6  ;;  %v10090_v6 = vld [vmem:[#allocation11 + $0x120] sm:$0xff] }
 0x2ee   :  { %5810 = vmatmul.bf16.vlgmr.msra.gmra.mxu0 %v10541_v1  ;;  %v8924_v1 = vor.u32 %v9993_v27, %v8921_v9 }
 0x2ef   :  { %6288 = vmatpush.bf16.msrb.mxu0 %v10077_v59  ;;  %5727 = vmatpush.bf16.msra.mxu1 %v9008_v51  ;;  %v8592_v59 = vor.u32 %v9913_v54, %v8591_v11  ;;  %v8563_v51 = vld [vmem:[#allocation8 + $0x638] sm:$0xf] }
 0x2f0   :  { %5818 = vmatpush.bf16.msra.mxu2 %v9012_v0  ;;  %v10083_v0 = vld [vmem:[#allocation11 + $0xe8] sm:$0xff] }
 0x2f1   :  { %6281 = vmatpush.bf16.msra.mxu3 %v10063_v34  ;;  %v8899_v34 = vld [vmem:[#allocation8 + $0x8d8] sm:$0xf]  ;;  %v10679_v21 = vpop.f32.mrf.mxu0 }
 0x2f2   :  { %v8900_v32 = vor.u32 %v9990_v26, %v8899_v34  ;;  %v5486_v60 = vpop.f32.mrf.mxu1  ;;  %v10060_v34 = vld [vmem:[#allocation11 + $0x30] sm:$0xff] }
 0x2f3   :  { %6289 = vmatpush.bf16.msrb.mxu0 %v10076_v12  ;;  %5728 = vmatpush.bf16.msra.mxu1 %v8980_v37  ;;  %v10677_v20 = vpop.f32.mrf.mxu3  ;;  %v5487_v4 = vadd.f32 %v5486_v60, %v3389_v57  ;;  %v8535_v12 = vld [vmem:[#allocation8 + $0x600] sm:$0xf]  ;;  %v3390_v57 = vperm.slane %v10624_v18, 4  ;;  %v10092_v60 = vld [vmem:[#allocation11 + $0x130] sm:$0xff] }
 0x2f4   :  { %5819 = vmatpush.bf16.msra.mxu2 %v8984_v50  ;;  %v8536_v50 = vor.u32 %v9899_v55, %v8535_v12 }
 0x2f5   :  { %6282 = vmatpush.bf16.msra.mxu3 %v10062_v53  ;;  %v10085_v53 = vld [vmem:[#allocation11 + $0xf8] sm:$0xff]  ;;  %v5500_v35 = vadd.f32 %v10639_v29, %v5487_v4 }
 0x2f6   :  { %v10081_v29 = vld [vmem:[#allocation11 + $0xd8] sm:$0xff] }
 0x2f7   :  { %6290 = vmatpush.bf16.msrb.mxu0 %v10075_v23  ;;  %5729 = vmatpush.bf16.msra.mxu1 %v8952_v25  ;;  %v5513_v37 = vadd.f32 %v10655_v43, %v5500_v35  ;;  %v8479_v23 = vld [vmem:[#allocation8 + $0x590] sm:$0xf]  ;;  %v9885_v25 = vld [vmem:[#allocation8 + $0x5a8] sm:$0xf0] }
 0x2f8   :  { %6283 = vmatmul.bf16.vlgmr.msra.gmra.mxu3 %v5849_v46  ;;  %5820 = vmatpush.bf16.msra.mxu2 %v8956_v61  ;;  %v9906_v46 = vld [vmem:[#allocation8 + $0x650] sm:$0xf0]  ;;  %v10080_v61 = vld [vmem:[#allocation11 + $0xd0] sm:$0xff]  ;;  %v8480_v27 = vor.u32 %v9885_v25, %v8479_v23 }
 0x2f9   :  { %v5592_v3 = vpop.f32.mrf.mxu0  ;;  %v8564_v42 = vor.u32 %v9906_v46, %v8563_v51  ;;  %v5526_v39 = vadd.f32 %v10674_v14, %v5513_v37  ;;  %v10055_v14 = vld [vmem:[#allocation11 + $0x8] sm:$0xff]  ;;  %v10089_v35 = vld [vmem:[#allocation11 + $0x118] sm:$0xff]  ;;  %v10088_v37 = vld [vmem:[#allocation11 + $0x110] sm:$0xff] }
 0x2fa   :  { %v5488_v63 = vpop.f32.mrf.mxu1 }
 0x2fb   :  { %6291 = vmatpush.bf16.msrb.mxu0 %v10074_v16  ;;  %5730 = vmatpush.bf16.msra.mxu1 %v8924_v1  ;;  %v5618_v2 = vpop.f32.mrf.mxu3  ;;  %v10079_v16 = vld [vmem:[#allocation11 + $0xc8] sm:$0xff]  ;;  %v8452_v1 = vor.u32 %v9878_v36, %v8451_v28 }
 0x2fc   :  { %5821 = vmatpush.bf16.msra.mxu2 %v8928_v31  ;;  %v10061_v31 = vld [vmem:[#allocation11 + $0x38] sm:$0xff] }
 0x2fd   :  { %v10687_v24 = vpop.f32.mrf.mxu2 }
 0x2fe   :  { %v5578_v46 = vadd.f32 %v10687_v24, %v3390_v57  ;;  %v10087_v24 = vld [vmem:[#allocation11 + $0x108] sm:$0xff] }
 0x2ff   :  { %6292 = vmatpush.bf16.msrb.mxu0 %v10073_v58  ;;  %5731 = vmatpush.bf16.msra.mxu1 %v8896_v40 }
 0x300   :  { %5822 = vmatpush.bf16.msra.mxu2 %v8900_v32 }
 0x302   :  { %5732 = vmatmul.bf16.vlgmr.msra.gmra.mxu1 %v10549_v47 }
 0x303   :  { %5789 = vmatpush.bf16.msrb.mxu1 %v8648_v56  ;;  %6293 = vmatpush.bf16.msrb.mxu0 %v10072_v44  ;;  %v10058_v56 = vld [vmem:[#allocation11 + $0x20] sm:$0xff] }
 0x304   :  { %6301 = vmatpush.bf16.msrb.mxu2 %v10085_v53  ;;  %v10057_v53 = vld [vmem:[#allocation11 + $0x18] sm:$0xff] }
 0x305   :  { %5823 = vmatmul.bf16.vlgmr.msra.gmra.mxu2 %v10549_v47  ;;  %v10082_v47 = vld [vmem:[#allocation11 + $0xe0] sm:$0xff]  ;;  %v5579_v43 = vpop.f32.mrf.mxu2 }
 0x307   :  { %5790 = vmatpush.bf16.msrb.mxu1 %v8620_v45  ;;  %6294 = vmatpush.bf16.msrb.mxu0 %v10071_v22 }
 0x308   :  { %6302 = vmatpush.bf16.msrb.mxu2 %v10084_v10  ;;  %v10093_v10 = vld [vmem:[#allocation11 + $0x138] sm:$0xff] }
 0x30b   :  { %5791 = vmatpush.bf16.msrb.mxu1 %v8592_v59  ;;  %6295 = vmatpush.bf16.msrb.mxu0 %v10070_v7  ;;  %v10691_v5 = vpop.f32.mrf.mxu0  ;;  %v5591_v7 = vadd.f32 %v10679_v21, %v5578_v46 }
 0x30c   :  { %6303 = vmatpush.bf16.msrb.mxu2 %v10083_v0  ;;  %v10091_v0 = vld [vmem:[#allocation11 + $0x128] sm:$0xff] }
 0x30e   :  { %6296 = vmatmul.bf16.vlgmr.msrb.gmra.mxu0 %v5850_v41 }
 0x30f   :  { %5792 = vmatpush.bf16.msrb.mxu1 %v8564_v42 }
 0x310   :  { %6304 = vmatpush.bf16.msrb.mxu2 %v10082_v47  ;;  %v10101_v47 = vld [vmem:[#allocation11 + $0x178] sm:$0xff] }
 0x311   :  { %6327 = vmatpush.bf16.msrb.mxu3 %v10101_v47 }
 0x312   :  { %v5538_v58 = vpop.f32.mrf.mxu1 }
 0x313   :  { %5793 = vmatpush.bf16.msrb.mxu1 %v8536_v50  ;;  %v10689_v9 = vpop.f32.mrf.mxu3  ;;  %v5644_v26 = vpop.f32.mrf.mxu0  ;;  %v5539_v40 = vadd.f32 %v5538_v58, %v5526_v39  ;;  %v10100_v50 = vld [vmem:[#allocation11 + $0x170] sm:$0xff]  ;;  %v3392_v58 = vperm.slane %v10624_v18, 6 }
 0x314   :  { %6305 = vmatpush.bf16.msrb.mxu2 %v10081_v29  ;;  %v10099_v29 = vld [vmem:[#allocation11 + $0x168] sm:$0xff] }
 0x315   :  { %v5552_v32 = vadd.f32 %v10657_v62, %v5539_v40  ;;  %v10054_v62 = vld [vmem:[#allocation11] sm:$0xff]  ;;  %6328 = vmatpush.bf16.msrb.mxu3 %v10100_v50  ;;  %v10095_v26 = vld [vmem:[#allocation11 + $0x148] sm:$0xff] }
 0x317   :  { %5794 = vmatpush.bf16.msrb.mxu1 %v8508_v17  ;;  %v5565_v33 = vadd.f32 %v10666_v8, %v5552_v32  ;;  %v5841_v8 = vmax.f32 %v10617_v30, 0.0  ;;  %v10094_v32 = vld [vmem:[#allocation11 + $0x140] sm:$0xff] }
 0x318   :  { %6306 = vmatpush.bf16.msrb.mxu2 %v10080_v61  ;;  %v10098_v61 = vld [vmem:[#allocation11 + $0x160] sm:$0xff] }
 0x319   :  { %v5844_v15 = vmax.f32 %v5565_v33, 0.0  ;;  %v5848_v22 = vpack.c.bf16 %v5841_v8, %v5841_v8  ;;  %6329 = vmatpush.bf16.msrb.mxu3 %v10099_v29 }
 0x31a   :  { %v5540_v2 = vpop.f32.mrf.mxu1 }
 0x31b   :  { %5795 = vmatpush.bf16.msrb.mxu1 %v8480_v27  ;;  %v5670_v49 = vpop.f32.mrf.mxu3  ;;  %v5851_v45 = vpack.c.bf16 %v5844_v15, %v5844_v15 }
 0x31c   :  { %6307 = vmatpush.bf16.msrb.mxu2 %v10079_v16  ;;  %v10097_v16 = vld [vmem:[#allocation11 + $0x158] sm:$0xff] }
 0x31d   :  { %v5629_v44 = vpop.f32.mrf.mxu2  ;;  %6330 = vmatpush.bf16.msrb.mxu3 %v10098_v61 }
 0x31f   :  { %5796 = vmatpush.bf16.msrb.mxu1 %v8452_v1 }
 0x320   :  { %6308 = vmatpush.bf16.msrb.mxu2 %v10078_v52 }
 0x321   :  { %6331 = vmatpush.bf16.msrb.mxu3 %v10097_v16 }
 0x322   :  { %5797 = vmatmul.bf16.vlgmr.msrb.gmra.mxu1 %v10532_v19  ;;  %v10056_v19 = vld [vmem:[#allocation11 + $0x10] sm:$0xff] }
 0x323   :  { %6262 = vmatpush.bf16.msra.mxu1 %v10061_v31  ;;  %6309 = vmatmul.bf16.vlgmr.msrb.gmra.mxu2 %v5851_v45  ;;  %v3391_v31 = vperm.slane %v10624_v18, 5 }
 0x325   :  { %v5631_v3 = vpop.f32.mrf.mxu2 }
 0x327   :  { %6263 = vmatpush.bf16.msra.mxu1 %v10060_v34  ;;  %v5669_v34 = vadd.f32 %v10689_v9, %v3391_v31 }
 0x32b   :  { %6264 = vmatpush.bf16.msra.mxu1 %v10059_v38  ;;  %v10699_v54 = vpop.f32.mrf.mxu0 }
 0x32f   :  { %6265 = vmatpush.bf16.msra.mxu1 %v10058_v56 }
 0x333   :  { %6266 = vmatpush.bf16.msra.mxu1 %v10057_v53  ;;  %v10697_v11 = vpop.f32.mrf.mxu3  ;;  %v5709_v51 = vpop.f32.mrf.mxu0 }
 0x337   :  { %6267 = vmatpush.bf16.msra.mxu1 %v10056_v19  ;;  %v5603_v4 = vpop.f32.mrf.mxu1 }
 0x338   :  { %v5604_v30 = vadd.f32 %v5603_v4, %v5591_v7 }
 0x33a   :  { %v5617_v42 = vadd.f32 %v10677_v20, %v5604_v30  ;;  %v10086_v20 = vld [vmem:[#allocation11 + $0x100] sm:$0xff] }
 0x33b   :  { %6268 = vmatpush.bf16.msra.mxu1 %v10055_v14  ;;  %v5722_v59 = vpop.f32.mrf.mxu3 }
 0x33c   :  { %v5630_v41 = vadd.f32 %v5629_v44, %v5617_v42  ;;  %v10102_v59 = vld [vmem:[#allocation11 + $0x180] sm:$0xff] }
 0x33e   :  { %v5643_v48 = vadd.f32 %v10691_v5, %v5630_v41  ;;  %v10096_v5 = vld [vmem:[#allocation11 + $0x150] sm:$0xff] }
 0x33f   :  { %6269 = vmatpush.bf16.msra.mxu1 %v10054_v62  ;;  %v5605_v55 = vpop.f32.mrf.mxu1  ;;  %6332 = vmatpush.bf16.msrb.mxu3 %v10096_v5  ;;  %v10103_v62 = vld [vmem:[#allocation11 + $0x188] sm:$0xff]  ;;  %v10116_v41 = vld [vmem:[#allocation13] ss:$0 sm:$0xff] }
 0x340   :  { %v5694_v12 = vpop.f32.mrf.mxu2  ;;  %6346 = vmatpush.bf16.msra.mxu0 %v10103_v62 }
 0x342   :  { %6270 = vmatmul.bf16.vlgmr.msra.gmra.mxu1 %v5848_v22 }
 0x343   :  { %6314 = vmatpush.bf16.msrb.mxu1 %v10093_v10  ;;  %6333 = vmatpush.bf16.msrb.mxu3 %v10095_v26 }
 0x344   :  { %6347 = vmatpush.bf16.msra.mxu0 %v10102_v59 }
 0x347   :  { %6315 = vmatpush.bf16.msrb.mxu1 %v10092_v60  ;;  %v5655_v13 = vpop.f32.mrf.mxu1  ;;  %6334 = vmatpush.bf16.msrb.mxu3 %v10094_v32 }
 0x348   :  { %v5696_v63 = vpop.f32.mrf.mxu2  ;;  %v5656_v17 = vadd.f32 %v5655_v13, %v5643_v48 }
 0x34a   :  { %v5845_v25 = vmax.f32 %v5656_v17, 0.0 }
 0x34b   :  { %6316 = vmatpush.bf16.msrb.mxu1 %v10091_v0  ;;  %v5759_v23 = vpop.f32.mrf.mxu0 }
 0x34c   :  { %v5852_v27 = vpack.c.bf16 %v5845_v25, %v5845_v25  ;;  %v5760_v15 = vadd.f32 %v5759_v23, %v3392_v58 }
 0x34f   :  { %6317 = vmatpush.bf16.msrb.mxu1 %v10090_v6  ;;  %v5657_v36 = vpop.f32.mrf.mxu1 }
 0x350   :  { %v5746_v43 = vpop.f32.mrf.mxu2 }
 0x353   :  { %6318 = vmatpush.bf16.msrb.mxu1 %v10089_v35  ;;  %v5785_v21 = vpop.f32.mrf.mxu3  ;;  %v5761_v1 = vpop.f32.mrf.mxu0 }
 0x357   :  { %6319 = vmatpush.bf16.msrb.mxu1 %v10088_v37 }
 0x358   :  { %v5748_v52 = vpop.f32.mrf.mxu2 }
 0x35b   :  { %6320 = vmatpush.bf16.msrb.mxu1 %v10087_v24  ;;  %v5787_v28 = vpop.f32.mrf.mxu3 }
 0x35f   :  { %6321 = vmatpush.bf16.msrb.mxu1 %v10086_v20  ;;  %v5681_v39 = vpop.f32.mrf.mxu1 }
 0x360   :  { %v5682_v38 = vadd.f32 %v5681_v39, %v5669_v34 }
 0x362   :  { %6322 = vmatmul.bf16.vlgmr.msrb.gmra.mxu1 %v5852_v27  ;;  %v5695_v40 = vadd.f32 %v5694_v12, %v5682_v38 }
 0x363   :  { %v5837_v49 = vpop.f32.mrf.mxu3 }
 0x364   :  { %v5708_v56 = vadd.f32 %v10699_v54, %v5695_v40 }
 0x366   :  { %v5721_v53 = vadd.f32 %v10697_v11, %v5708_v56 }
 0x367   :  { %v5683_v2 = vpop.f32.mrf.mxu1 }
 0x368   :  { %v5772_v44 = vpop.f32.mrf.mxu2 }
 0x369   :  { %v5773_v45 = vadd.f32 %v5772_v44, %v5760_v15 }
 0x36b   :  { %v5839_v33 = vpop.f32.mrf.mxu3  ;;  %v5786_v19 = vadd.f32 %v5785_v21, %v5773_v45  ;;  %v5811_v9 = vpop.f32.mrf.mxu0 }
 0x370   :  { %v5774_v14 = vpop.f32.mrf.mxu2 }
 0x373   :  { %v5813_v8 = vpop.f32.mrf.mxu0 }
 0x37b   :  { %v6284_v3 = vpop.f32.mrf.mxu3 }
 0x37f   :  { %v5733_v10 = vpop.f32.mrf.mxu1 }
 0x380   :  { %v5734_v57 = vadd.f32 %v5733_v10, %v5721_v53 }
 0x382   :  { %v5747_v22 = vadd.f32 %v5746_v43, %v5734_v57 }
 0x383   :  { %v6286_v18 = vpop.f32.mrf.mxu3 }
 0x384   :  { %v5846_v54 = vmax.f32 %v5747_v22, 0.0 }
 0x386   :  { %v5853_v60 = vpack.c.bf16 %v5846_v54, %v5846_v54 }
 0x387   :  { %v5735_v46 = vpop.f32.mrf.mxu1 }
 0x388   :  { %v5824_v51 = vpop.f32.mrf.mxu2  ;;  %6335 = vmatmul.bf16.vlgmr.msrb.gmra.mxu3 %v5853_v60 }
 0x38b   :  { %v6297_v11 = vpop.f32.mrf.mxu0 }
 0x390   :  { %v5826_v0 = vpop.f32.mrf.mxu2 }
 0x393   :  { %v6299_v4 = vpop.f32.mrf.mxu0 }
 0x39f   :  { %v5798_v7 = vpop.f32.mrf.mxu1 }
 0x3a0   :  { %v5799_v6 = vadd.f32 %v5798_v7, %v5786_v19 }
 0x3a2   :  { %v5812_v30 = vadd.f32 %v5811_v9, %v5799_v6 }
 0x3a4   :  { %v5825_v35 = vadd.f32 %v5824_v51, %v5812_v30 }
 0x3a6   :  { %v5838_v42 = vadd.f32 %v5837_v49, %v5825_v35  ;;  %v6310_v37 = vpop.f32.mrf.mxu2 }
 0x3a7   :  { %v5800_v12 = vpop.f32.mrf.mxu1 }
 0x3a8   :  { %v5847_v55 = vmax.f32 %v5838_v42, 0.0 }
 0x3aa   :  { %v5854_v47 = vpack.c.bf16 %v5847_v55, %v5847_v55 }
 0x3ac   :  { %9360 = vmatmul.msk.bf16.vlgmr.msra.gmra.mxu0 %vm5200_vm1, %v5854_v47 }
 0x3ae   :  { %v6312_v50 = vpop.f32.mrf.mxu2 }
 0x3bf   :  { %v6271_v24 = vpop.f32.mrf.mxu1 }
 0x3c0   :  { %v6272_v63 = vadd.f32 %v10116_v41, %v6271_v24 }
 0x3c2   :  { %v6285_v21 = vadd.f32 %v6284_v3, %v6272_v63 }
 0x3c4   :  { %v6298_v48 = vadd.f32 %v6297_v11, %v6285_v21 }
 0x3c6   :  { %v6311_v13 = vadd.f32 %v6310_v37, %v6298_v48 }
 0x3c7   :  { %v6273_v29 = vpop.f32.mrf.mxu1 }
 0x3df   :  { %v6323_v17 = vpop.f32.mrf.mxu1 }
 0x3e0   :  { %v6324_v23 = vadd.f32 %v6323_v17, %v6311_v13 }
 0x3e7   :  { %v6325_v20 = vpop.f32.mrf.mxu1 }
 0x40b   :  { %v6336_v25 = vpop.f32.mrf.mxu3 }
 0x40c   :  { %v6337_v27 = vadd.f32 %v6336_v25, %v6324_v23 }
 0x413   :  { %v6338_v61 = vpop.f32.mrf.mxu3 }
 0x429   :  { %v6349_v43 = vpop.f32.mrf.mxu0 }
 0x42a   :  { %v6350_v28 = vadd.f32 %v6349_v43, %v6337_v27 }
 0x42c   :  { %6353 = vst [vmem:[#allocation14] sm:$0xff] %v6350_v28 }
 0x42d   :  { %6364 = dma.vmem_to_hbm [thread:$0]  %s6360_s6, 128, %s6362_s14, [#allocation4]  }
 0x431   :  { %v6351_v36 = vpop.f32.mrf.mxu0 }
 0x432   :  { %10319 = dma.done.wait [#allocation4], 128  }
 0x433   :  { %10320 = vsyncadd [#allocation4], 4294967168 }
 0x434   :  { %6369 = vsyncpa [#allocation3], 1 }
 0x435   :  { %6370 = vsyncpa [#allocation6], 1 }
 0x436   :  { %6371 = vsyncpa [#allocation9], 1 }
 0x437   :  { %6372 = vsyncpa [#allocation12], 1 }
 0x438   :  { %6373 = vsyncpa [#allocation4], 1 }

</bundles_post_ra>
